<compile_context>
chip_gen: v6e
topology: v6e:2x2x1
jax: 0.10.0
libtpu: 0.0.40
codegen_flags: <defaults>
</compile_context>

<pallas_src>
import math
import numpy as np
import jax
import jax.numpy as jnp
from jax.experimental import pallas as pl
from jax.experimental.pallas import tpu as pltpu

A = 3             # agent_num
B = 8             # batch size
SDIM = 16         # per-agent state dim
ADIM = 4          # per-agent (discrete) action dim
IDIM = SDIM + ADIM
H = 32            # critic_hid_size
NH = 4            # attend_heads
D = H // NH       # attend_dim
SCALE = 1.0 / math.sqrt(D)
NEG_SLOPE = 0.01  # nn.LeakyReLU default
PAD = 128         # lane-padded working width (A*H = 96 <= 127; lane 127 = carry 1)
NPANEL = 12       # number of 128-lane panels in the main packed weight slab
HI = jax.lax.Precision.HIGHEST


def _leaky(x):
    return jnp.maximum(x, NEG_SLOPE * x)


# --------------------------------------------------------------------------
# Host-side packing (numpy, runs once per parameter update, no device scatters)
# --------------------------------------------------------------------------
def pack_weights(params):
    ps = [np.asarray(p, dtype=np.float32) for p in params]
    (enc_w, enc_b, senc_w, senc_b, c_w1, c_b1, c_w2, c_b2,
     b_w1, b_b1, b_w2, b_b2, key_w, sel_w, val_w, val_b) = ps
    P = PAD

    def z():
        return np.zeros((P, P), np.float32)

    # per-agent encoders: sa block -> hidden block, bias in row 127, carry kept
    w_enc, w_senc = z(), z()
    for a in range(A):
        w_enc[a * IDIM:(a + 1) * IDIM, a * H:(a + 1) * H] = enc_w[a]
        w_enc[P - 1, a * H:(a + 1) * H] = enc_b[a, 0]
        w_senc[a * IDIM:a * IDIM + SDIM, a * H:(a + 1) * H] = senc_w[a]
        w_senc[P - 1, a * H:(a + 1) * H] = senc_b[a, 0]
    w_enc[P - 1, P - 1] = 1.0      # sa_enc lane 127 == 1 (value-extractor bias)
    w_senc[P - 1, P - 1] = 1.0     # s_enc lane 127 == 1 (fc1 / bias-head biases)

    # shared key / value / selector extractors + per-agent fc1 halves / bias fc1
    w_key, w_val, w_sel = z(), z(), z()
    w_c1a, w_c1b, w_b1 = z(), z(), z()
    for a in range(A):
        sl = slice(a * H, (a + 1) * H)
        w_key[sl, sl] = key_w
        w_val[sl, sl] = val_w
        w_val[P - 1, sl] = val_b[0]
        w_sel[sl, sl] = sel_w
        w_c1a[sl, sl] = c_w1[a][:H]
        w_c1a[P - 1, sl] = c_b1[a, 0]
        w_c1b[sl, sl] = c_w1[a][H:]
        w_b1[sl, sl] = b_w1[a]
        w_b1[P - 1, sl] = b_b1[a, 0]
    w_c1a[P - 1, P - 1] = 1.0      # carry into h1 lane 127 (critic fc2 bias)
    w_b1[P - 1, P - 1] = 1.0       # carry into bh lane 127 (bias-head fc2 bias)

    # "other agent" block permutations (others in sorted order)
    p_o1, p_o2 = z(), z()
    eye = np.eye(H, dtype=np.float32)
    for i in range(A):
        o1, o2 = [j for j in range(A) if j != i]
        p_o1[o1 * H:(o1 + 1) * H, i * H:(i + 1) * H] = eye
        p_o2[o2 * H:(o2 + 1) * H, i * H:(i + 1) * H] = eye

    # per-head sum, broadcast back over the head's D lanes (HEADSUM @ REP fused)
    m_grp = z()
    for i in range(A):
        for h in range(NH):
            sl = slice(i * H + h * D, i * H + (h + 1) * D)
            m_grp[sl, sl] = 1.0

    # critic fc2 + negated/broadcast bias head, one (256,128) RHS; outputs land
    # on each agent's ACTION lanes of the sa layout so `qb * sa` does the
    # argmax gather and already yields (all_q - b).
    w_qb = np.zeros((2 * P, P), np.float32)
    for a in range(A):
        cols = slice(a * IDIM + SDIM, a * IDIM + SDIM + ADIM)
        w_qb[a * H:(a + 1) * H, cols] = c_w2[a]
        w_qb[P - 1, cols] = c_b2[a, 0]
        w_qb[P + a * H:P + (a + 1) * H, cols] = -np.repeat(b_w2[a], ADIM, axis=1)
        w_qb[2 * P - 1, cols] = -b_b2[a, 0, 0]

    # epilogue matrix: cols 0..A-1 sum an agent's 4 action lanes (Q gather),
    # cols A..2A-1 reduce an agent's 32-lane block for the logit regulariser
    # (pre-scaled; each head value is duplicated D times -> divide by D too).
    m_epi = z()
    reg_scale = 0.001 / (B * (A - 1) * D)
    for a in range(A):
        m_epi[a * IDIM + SDIM:a * IDIM + SDIM + ADIM, a] = 1.0
        m_epi[a * H:(a + 1) * H, A + a] = reg_scale

    w_main = np.concatenate(
        [w_enc, w_senc,            # panels 0-1  : dot 1 RHS
         w_key, w_val,             # panels 2-3  : dot 2 RHS
         w_sel, w_c1a, w_b1,       # panels 4-6  : dot 3 RHS
         p_o1, p_o2,               # panels 7-8  : dot 4 RHS
         m_grp,                    # panel 9     : dot 5 RHS
         w_c1b,                    # panel 10    : dot 6 RHS
         m_epi],                   # panel 11    : dot 8 RHS
        axis=1)
    assert w_main.shape == (P, NPANEL * P)
    return jnp.asarray(w_main), jnp.asarray(w_qb)


# --------------------------------------------------------------------------
# The fused kernel: 8 MXU dots, elementwise softmax, two full-width stores.
# --------------------------------------------------------------------------
def attention_critic_kernel(sa_ref, wm_ref, wqb_ref, att_ref, epi_ref):
    sa = sa_ref[...]                                 # (B, 128), lane 127 == 1.0

    def mm(x, lo, hi):
        return jnp.dot(x, wm_ref[:, lo * PAD:hi * PAD],
                       precision=HI, preferred_element_type=jnp.float32)

    # 1) per-agent sa / state encoders (merged 256-wide RHS)
    es = mm(sa, 0, 2)
    sa_enc = _leaky(es[:, :PAD])                     # carry lane 127 stays 1
    s_enc = _leaky(es[:, PAD:])

    # 2) shared key / value extractors (merged)
    kv = mm(sa_enc, 2, 4)
    keys = kv[:, :PAD]
    vals = _leaky(kv[:, PAD:])

    # 3) selector + critic-fc1(s_enc half, incl. bias) + bias-head fc1 (merged)
    scb = mm(s_enc, 4, 7)
    sels = scb[:, :PAD]
    c1a = scb[:, PAD:2 * PAD]
    bh = _leaky(scb[:, 2 * PAD:])

    # 4) "other agent" block permutations: keys & vals row-stacked, one dot
    perm = mm(jnp.concatenate([keys, vals], axis=0), 7, 9)      # (2B, 256)
    keys_o1 = perm[:B, :PAD]
    keys_o2 = perm[:B, PAD:]
    vals_o1 = perm[B:, :PAD]
    vals_o2 = perm[B:, PAD:]

    # 5) per-head logit sums, broadcast back across each head's D lanes
    prods = jnp.concatenate([sels * keys_o1, sels * keys_o2], axis=0)
    lsum = mm(prods, 9, 10)                          # (2B, 128) unscaled logits
    l1 = lsum[:B]
    l2 = lsum[B:]

    # softmax over the A-1 == 2 other agents: purely elementwise (VPU/EUP)
    s1 = l1 * SCALE
    s2 = l2 * SCALE
    m = jnp.maximum(s1, s2)
    e1 = jnp.exp(s1 - m)
    e2 = jnp.exp(s2 - m)
    inv = 1.0 / (e1 + e2)
    w1 = e1 * inv
    w2 = e2 * inv

    ov = w1 * vals_o1 + w2 * vals_o2                 # attended values per head lane

    # 6) critic fc1 (attention half) + bias/s_enc half from dot 3
    h1 = _leaky(c1a + mm(ov, 10, 11))

    # 7) critic fc2 + negated bias head, one K=256 dot; output = (all_q - b)
    #    placed on each agent's action lanes of the sa layout
    qb = jnp.dot(jnp.concatenate([h1, bh], axis=1), wqb_ref[...],
                 precision=HI, preferred_element_type=jnp.float32)

    # 8) vectorised epilogue: the one-hot action lanes of `sa` perform the
    #    argmax gather; the logit regulariser reduction rides in the same dot
    qmasked = qb * sa
    sq = l1 * l1 + l2 * l2                           # regulariser: UNscaled logits
    sqsum = jnp.broadcast_to(jnp.sum(sq, axis=0, keepdims=True), (B, PAD))
    epi = mm(jnp.concatenate([qmasked, sqsum], axis=0), 11, 12)  # (2B, 128)

    # two full-width, unmasked stores (no zero-init / narrow lane writes)
    att_ref[...] = jnp.concatenate([w1, w2], axis=1)             # (B, 256)
    epi_ref[...] = epi                                           # (2B, 128)


# --------------------------------------------------------------------------
# Wrapper (jitted; packed weights are produced once and passed in).
# --------------------------------------------------------------------------
def _attention_critic_forward(sa, w_main, w_qb):
    sa_flat = sa.transpose(1, 0, 2).reshape(B, A * IDIM)
    sa_aug = jnp.zeros((B, PAD), jnp.float32)
    sa_aug = sa_aug.at[:, :A * IDIM].set(sa_flat).at[:, PAD - 1].set(1.0)

    vmem = pl.BlockSpec(memory_space=pltpu.MemorySpace.VMEM)
    att, epi = pl.pallas_call(
        attention_critic_kernel,
        out_shape=(jax.ShapeDtypeStruct((B, 2 * PAD), jnp.float32),
                   jax.ShapeDtypeStruct((2 * B, PAD), jnp.float32)),
        in_specs=[vmem, vmem, vmem],
        out_specs=(vmem, vmem),
    )(sa_aug, w_main, w_qb)
    # TODO(synk): for batches > 8 on v7x add a batch grid with a resident
    # weight block and dimension_semantics=("parallel",); pointless at B=8.

    # unpack: attention weights are broadcast across each head's D lanes
    w1 = att[:, :A * H].reshape(B, A, NH, D)[..., 0]             # (B, A, NH)
    w2 = att[:, PAD:PAD + A * H].reshape(B, A, NH, D)[..., 0]
    qmb = epi[:B, :A]                                            # (B, A) == q - b
    reg = epi[B, A:2 * A]                                        # (A,)
    all_rets = [[qmb[:, a:a + 1], reg[a].reshape(1, 1)] for a in range(A)]
    agent_att_weights = [jnp.stack([w1[:, a], w2[:, a]], axis=-1)  # (B, NH, A-1)
                         for a in range(A)]
    return all_rets, agent_att_weights


attention_critic_forward = jax.jit(_attention_critic_forward)


def init_params(key):
    ks = jax.random.split(key, 16)

    def w(k, shape, scale=0.1):
        return (scale * jax.random.normal(k, shape)).astype(jnp.float32)

    return [
        w(ks[0], (A, IDIM, H)),       # critic_encoders enc_fc1 W
        w(ks[1], (A, 1, H)),          # enc_fc1 b
        w(ks[2], (A, SDIM, H)),       # state_encoders s_enc_fc1 W
        w(ks[3], (A, 1, H)),          # s_enc_fc1 b
        w(ks[4], (A, 2 * H, H)),      # critics fc1 W
        w(ks[5], (A, 1, H)),          # critics fc1 b
        w(ks[6], (A, H, ADIM)),       # critics fc2 W
        w(ks[7], (A, 1, ADIM)),       # critics fc2 b
        w(ks[8], (A, H, H)),          # biases fc1 W
        w(ks[9], (A, 1, H)),          # biases fc1 b
        w(ks[10], (A, H, 1)),         # biases fc2 W
        w(ks[11], (A, 1, 1)),         # biases fc2 b
        w(ks[12], (H, H)),            # key extractors  (heads concat on out axis)
        w(ks[13], (H, H)),            # selector extractors
        w(ks[14], (H, H)),            # value extractors W
        w(ks[15], (1, H)),            # value extractors b
    ]


def reference_forward(states, actions, sa, params):
    (enc_w, enc_b, senc_w, senc_b, c_w1, c_b1, c_w2, c_b2,
     b_w1, b_b1, b_w2, b_b2, key_w, sel_w, val_w, val_b) = params
    lk = _leaky

    def dot(a, b):
        return jnp.dot(a, b, precision=HI)

    sa_encs = [lk(dot(sa[a], enc_w[a]) + enc_b[a]) for a in range(A)]
    s_encs = [lk(dot(states[a], senc_w[a]) + senc_b[a]) for a in range(A)]
    keys = [dot(e, key_w) for e in sa_encs]
    vals = [lk(dot(e, val_w) + val_b) for e in sa_encs]
    sels = [dot(e, sel_w) for e in s_encs]
    qmb, regs, atts = [], [], []
    for i in range(A):
        others = [j for j in range(A) if j != i]
        ovs, ws, reg = [], [], 0.0
        for h in range(NH):
            sel = sels[i][:, h * D:(h + 1) * D]
            K = jnp.stack([keys[j][:, h * D:(h + 1) * D] for j in others], axis=-1)
            V = jnp.stack([vals[j][:, h * D:(h + 1) * D] for j in others], axis=-1)
            logits = jnp.einsum('bd,bdj->bj', sel, K, precision=HI)
            w = jax.nn.softmax(logits * SCALE, axis=-1)
            ovs.append(jnp.einsum('bdj,bj->bd', V, w, precision=HI))
            reg = reg + jnp.mean(logits ** 2)
            ws.append(w)
        critic_in = jnp.concatenate([s_encs[i]] + ovs, axis=-1)
        h1 = lk(dot(critic_in, c_w1[i]) + c_b1[i])
        all_q = dot(h1, c_w2[i]) + c_b2[i]
        int_acs = jnp.argmax(actions[i], axis=-1)
        q = jnp.take_along_axis(all_q, int_acs[:, None], axis=-1)
        bh = lk(dot(s_encs[i], b_w1[i]) + b_b1[i])
        bb = dot(bh, b_w2[i]) + b_b2[i]
        qmb.append(q - bb)
        regs.append(0.001 * reg)
        atts.append(jnp.stack(ws, axis=1))
    return qmb, regs, atts


if __name__ == "__main__":
    key = jax.random.PRNGKey(0)
    k_s, k_a, k_p = jax.random.split(key, 3)
    states = jax.random.normal(k_s, (A, B, SDIM), jnp.float32)
    act_logits = jax.random.normal(k_a, (A, B, ADIM), jnp.float32)
    actions = jax.nn.one_hot(jnp.argmax(act_logits, -1), ADIM, dtype=jnp.float32)
    sa = jnp.concatenate([states, actions], axis=-1)
    params = init_params(k_p)

    # TODO(synk): BatchNorm1d(affine=False) input normalisation (norm_in=True)
    # is not implemented; this script uses the norm_in=False configuration.

    # pack once per parameter update; the jitted forward reuses the packed slabs
    w_main, w_qb = pack_weights(params)

    all_rets, att_weights = attention_critic_forward(sa, w_main, w_qb)
    jax.block_until_ready(all_rets)
    jax.block_until_ready(att_weights)

    # correctness check against a pure-JAX reference of the same math
    qmb_r, reg_r, att_r = reference_forward(states, actions, sa, params)
    for a in range(A):
        assert jnp.allclose(all_rets[a][0], qmb_r[a], atol=1e-4, rtol=1e-4)
        assert jnp.allclose(all_rets[a][1][0, 0], reg_r[a], atol=1e-5, rtol=1e-4)
        assert jnp.allclose(att_weights[a], att_r[a], atol=1e-5, rtol=1e-4)

    print("KERNEL_OK")
</pallas_src>

<mosaic_0001>
module attributes {stable_mosaic.version = 11 : i64} {
  func.func @attention_critic_kernel(%arg0: memref<8x128xf32, #tpu.memory_space<vmem>>, %arg1: memref<128x1536xf32, #tpu.memory_space<vmem>>, %arg2: memref<256x128xf32, #tpu.memory_space<vmem>>, %arg3: memref<8x256xf32, #tpu.memory_space<vmem>>, %arg4: memref<16x128xf32, #tpu.memory_space<vmem>>) attributes {dimension_semantics = [], scalar_prefetch = 0 : i64, scratch_operands = 0 : i64, tpu.core_type = #tpu.core_type<tc>} {
    %c0 = arith.constant 0 : index
    %c0_0 = arith.constant 0 : index
    %0 = vector.load %arg0[%c0, %c0_0] : memref<8x128xf32, #tpu.memory_space<vmem>>, vector<8x128xf32>
    %c0_1 = arith.constant 0 : index
    %c0_2 = arith.constant 0 : index
    %1 = vector.load %arg1[%c0_1, %c0_2] : memref<128x1536xf32, #tpu.memory_space<vmem>>, vector<128x256xf32>
    %cst = arith.constant dense<0.000000e+00> : vector<8x256xf32>
    %2 = tpu.matmul %0, %1, %cst {dimension_numbers = #tpu.dot_dimension_numbers<[1], [0], [0], [1], [0, 0, 1, 1], [], []>, precision = #tpu.contract_precision<fp32>} : vector<8x128xf32>, vector<128x256xf32>, vector<8x256xf32> -> vector<8x256xf32>
    %3 = vector.extract_strided_slice %2 {offsets = [0, 0], sizes = [8, 128], strides = [1, 1]} : vector<8x256xf32> to vector<8x128xf32>
    %cst_3 = arith.constant 0.00999999977 : f32
    %4 = vector.broadcast %cst_3 : f32 to vector<8x128xf32>
    %5 = arith.mulf %4, %3 : vector<8x128xf32>
    %6 = arith.maximumf %3, %5 : vector<8x128xf32>
    %7 = vector.extract_strided_slice %2 {offsets = [0, 128], sizes = [8, 128], strides = [1, 1]} : vector<8x256xf32> to vector<8x128xf32>
    %cst_4 = arith.constant 0.00999999977 : f32
    %8 = vector.broadcast %cst_4 : f32 to vector<8x128xf32>
    %9 = arith.mulf %8, %7 : vector<8x128xf32>
    %10 = arith.maximumf %7, %9 : vector<8x128xf32>
    %c0_5 = arith.constant 0 : index
    %c256 = arith.constant 256 : index
    %11 = vector.load %arg1[%c0_5, %c256] : memref<128x1536xf32, #tpu.memory_space<vmem>>, vector<128x256xf32>
    %cst_6 = arith.constant dense<0.000000e+00> : vector<8x256xf32>
    %12 = tpu.matmul %6, %11, %cst_6 {dimension_numbers = #tpu.dot_dimension_numbers<[1], [0], [0], [1], [0, 0, 1, 1], [], []>, precision = #tpu.contract_precision<fp32>} : vector<8x128xf32>, vector<128x256xf32>, vector<8x256xf32> -> vector<8x256xf32>
    %13 = vector.extract_strided_slice %12 {offsets = [0, 0], sizes = [8, 128], strides = [1, 1]} : vector<8x256xf32> to vector<8x128xf32>
    %14 = vector.extract_strided_slice %12 {offsets = [0, 128], sizes = [8, 128], strides = [1, 1]} : vector<8x256xf32> to vector<8x128xf32>
    %cst_7 = arith.constant 0.00999999977 : f32
    %15 = vector.broadcast %cst_7 : f32 to vector<8x128xf32>
    %16 = arith.mulf %15, %14 : vector<8x128xf32>
    %17 = arith.maximumf %14, %16 : vector<8x128xf32>
    %c0_8 = arith.constant 0 : index
    %c512 = arith.constant 512 : index
    %18 = vector.load %arg1[%c0_8, %c512] : memref<128x1536xf32, #tpu.memory_space<vmem>>, vector<128x384xf32>
    %cst_9 = arith.constant dense<0.000000e+00> : vector<8x384xf32>
    %19 = tpu.matmul %10, %18, %cst_9 {dimension_numbers = #tpu.dot_dimension_numbers<[1], [0], [0], [1], [0, 0, 1, 1], [], []>, precision = #tpu.contract_precision<fp32>} : vector<8x128xf32>, vector<128x384xf32>, vector<8x384xf32> -> vector<8x384xf32>
    %20 = vector.extract_strided_slice %19 {offsets = [0, 0], sizes = [8, 128], strides = [1, 1]} : vector<8x384xf32> to vector<8x128xf32>
    %21 = vector.extract_strided_slice %19 {offsets = [0, 128], sizes = [8, 128], strides = [1, 1]} : vector<8x384xf32> to vector<8x128xf32>
    %22 = vector.extract_strided_slice %19 {offsets = [0, 256], sizes = [8, 128], strides = [1, 1]} : vector<8x384xf32> to vector<8x128xf32>
    %cst_10 = arith.constant 0.00999999977 : f32
    %23 = vector.broadcast %cst_10 : f32 to vector<8x128xf32>
    %24 = arith.mulf %23, %22 : vector<8x128xf32>
    %25 = arith.maximumf %22, %24 : vector<8x128xf32>
    %26 = tpu.concatenate %13, %17 in 0 : vector<8x128xf32>, vector<8x128xf32> -> vector<16x128xf32>
    %c0_11 = arith.constant 0 : index
    %c896 = arith.constant 896 : index
    %27 = vector.load %arg1[%c0_11, %c896] : memref<128x1536xf32, #tpu.memory_space<vmem>>, vector<128x256xf32>
    %cst_12 = arith.constant dense<0.000000e+00> : vector<16x256xf32>
    %28 = tpu.matmul %26, %27, %cst_12 {dimension_numbers = #tpu.dot_dimension_numbers<[1], [0], [0], [1], [0, 0, 1, 1], [], []>, precision = #tpu.contract_precision<fp32>} : vector<16x128xf32>, vector<128x256xf32>, vector<16x256xf32> -> vector<16x256xf32>
    %29 = vector.extract_strided_slice %28 {offsets = [0, 0], sizes = [8, 128], strides = [1, 1]} : vector<16x256xf32> to vector<8x128xf32>
    %30 = vector.extract_strided_slice %28 {offsets = [0, 128], sizes = [8, 128], strides = [1, 1]} : vector<16x256xf32> to vector<8x128xf32>
    %31 = vector.extract_strided_slice %28 {offsets = [8, 0], sizes = [8, 128], strides = [1, 1]} : vector<16x256xf32> to vector<8x128xf32>
    %32 = vector.extract_strided_slice %28 {offsets = [8, 128], sizes = [8, 128], strides = [1, 1]} : vector<16x256xf32> to vector<8x128xf32>
    %33 = arith.mulf %20, %29 : vector<8x128xf32>
    %34 = arith.mulf %20, %30 : vector<8x128xf32>
    %35 = tpu.concatenate %33, %34 in 0 : vector<8x128xf32>, vector<8x128xf32> -> vector<16x128xf32>
    %c0_13 = arith.constant 0 : index
    %c1152 = arith.constant 1152 : index
    %36 = vector.load %arg1[%c0_13, %c1152] : memref<128x1536xf32, #tpu.memory_space<vmem>>, vector<128x128xf32>
    %cst_14 = arith.constant dense<0.000000e+00> : vector<16x128xf32>
    %37 = tpu.matmul %35, %36, %cst_14 {dimension_numbers = #tpu.dot_dimension_numbers<[1], [0], [0], [1], [0, 0, 1, 1], [], []>, precision = #tpu.contract_precision<fp32>} : vector<16x128xf32>, vector<128x128xf32>, vector<16x128xf32> -> vector<16x128xf32>
    %38 = vector.extract_strided_slice %37 {offsets = [0, 0], sizes = [8, 128], strides = [1, 1]} : vector<16x128xf32> to vector<8x128xf32>
    %39 = vector.extract_strided_slice %37 {offsets = [8, 0], sizes = [8, 128], strides = [1, 1]} : vector<16x128xf32> to vector<8x128xf32>
    %cst_15 = arith.constant 0.353553385 : f32
    %40 = vector.broadcast %cst_15 : f32 to vector<8x128xf32>
    %41 = arith.mulf %38, %40 : vector<8x128xf32>
    %cst_16 = arith.constant 0.353553385 : f32
    %42 = vector.broadcast %cst_16 : f32 to vector<8x128xf32>
    %43 = arith.mulf %39, %42 : vector<8x128xf32>
    %44 = arith.maximumf %41, %43 : vector<8x128xf32>
    %45 = arith.subf %41, %44 : vector<8x128xf32>
    %46 = math.exp %45 : vector<8x128xf32>
    %47 = arith.subf %43, %44 : vector<8x128xf32>
    %48 = math.exp %47 : vector<8x128xf32>
    %49 = arith.addf %46, %48 : vector<8x128xf32>
    %cst_17 = arith.constant 1.000000e+00 : f32
    %50 = vector.broadcast %cst_17 : f32 to vector<8x128xf32>
    %51 = arith.divf %50, %49 : vector<8x128xf32>
    %52 = arith.mulf %46, %51 : vector<8x128xf32>
    %53 = arith.mulf %48, %51 : vector<8x128xf32>
    %54 = arith.mulf %52, %31 : vector<8x128xf32>
    %55 = arith.mulf %53, %32 : vector<8x128xf32>
    %56 = arith.addf %54, %55 : vector<8x128xf32>
    %c0_18 = arith.constant 0 : index
    %c1280 = arith.constant 1280 : index
    %57 = vector.load %arg1[%c0_18, %c1280] : memref<128x1536xf32, #tpu.memory_space<vmem>>, vector<128x128xf32>
    %cst_19 = arith.constant dense<0.000000e+00> : vector<8x128xf32>
    %58 = tpu.matmul %56, %57, %cst_19 {dimension_numbers = #tpu.dot_dimension_numbers<[1], [0], [0], [1], [0, 0, 1, 1], [], []>, precision = #tpu.contract_precision<fp32>} : vector<8x128xf32>, vector<128x128xf32>, vector<8x128xf32> -> vector<8x128xf32>
    %59 = arith.addf %21, %58 : vector<8x128xf32>
    %cst_20 = arith.constant 0.00999999977 : f32
    %60 = vector.broadcast %cst_20 : f32 to vector<8x128xf32>
    %61 = arith.mulf %60, %59 : vector<8x128xf32>
    %62 = arith.maximumf %59, %61 : vector<8x128xf32>
    %63 = tpu.concatenate %62, %25 in 1 : vector<8x128xf32>, vector<8x128xf32> -> vector<8x256xf32>
    %c0_21 = arith.constant 0 : index
    %c0_22 = arith.constant 0 : index
    %64 = vector.load %arg2[%c0_21, %c0_22] : memref<256x128xf32, #tpu.memory_space<vmem>>, vector<256x128xf32>
    %cst_23 = arith.constant dense<0.000000e+00> : vector<8x128xf32>
    %65 = tpu.matmul %63, %64, %cst_23 {dimension_numbers = #tpu.dot_dimension_numbers<[1], [0], [0], [1], [0, 0, 1, 1], [], []>, precision = #tpu.contract_precision<fp32>} : vector<8x256xf32>, vector<256x128xf32>, vector<8x128xf32> -> vector<8x128xf32>
    %66 = arith.mulf %65, %0 : vector<8x128xf32>
    %67 = arith.mulf %38, %38 : vector<8x128xf32>
    %68 = arith.mulf %39, %39 : vector<8x128xf32>
    %69 = arith.addf %67, %68 : vector<8x128xf32>
    %cst_24 = arith.constant dense<0.000000e+00> : vector<128xf32>
    %70 = vector.multi_reduction <add>, %69, %cst_24 [0] : vector<8x128xf32> to vector<128xf32>
    %71 = vector.shape_cast %70 : vector<128xf32> to vector<1x128xf32>
    %72 = vector.shape_cast %71 : vector<1x128xf32> to vector<1x128xf32>
    %73 = vector.broadcast %72 : vector<1x128xf32> to vector<8x128xf32>
    %74 = tpu.concatenate %66, %73 in 0 : vector<8x128xf32>, vector<8x128xf32> -> vector<16x128xf32>
    %c0_25 = arith.constant 0 : index
    %c1408 = arith.constant 1408 : index
    %75 = vector.load %arg1[%c0_25, %c1408] : memref<128x1536xf32, #tpu.memory_space<vmem>>, vector<128x128xf32>
    %cst_26 = arith.constant dense<0.000000e+00> : vector<16x128xf32>
    %76 = tpu.matmul %74, %75, %cst_26 {dimension_numbers = #tpu.dot_dimension_numbers<[1], [0], [0], [1], [0, 0, 1, 1], [], []>, precision = #tpu.contract_precision<fp32>} : vector<16x128xf32>, vector<128x128xf32>, vector<16x128xf32> -> vector<16x128xf32>
    %77 = tpu.concatenate %52, %53 in 1 : vector<8x128xf32>, vector<8x128xf32> -> vector<8x256xf32>
    %c0_27 = arith.constant 0 : index
    %c0_28 = arith.constant 0 : index
    %78 = vector.load %arg3[%c0_27, %c0_28] : memref<8x256xf32, #tpu.memory_space<vmem>>, vector<8x256xf32>
    tpu.vector_store %arg3[%c0_27, %c0_28], %77 {strides = array<i32>} : memref<8x256xf32, #tpu.memory_space<vmem>>, vector<8x256xf32>,
    %c0_29 = arith.constant 0 : index
    %c0_30 = arith.constant 0 : index
    %79 = vector.load %arg4[%c0_29, %c0_30] : memref<16x128xf32, #tpu.memory_space<vmem>>, vector<16x128xf32>
    tpu.vector_store %arg4[%c0_29, %c0_30], %76 {strides = array<i32>} : memref<16x128xf32, #tpu.memory_space<vmem>>, vector<16x128xf32>,
    return
  }
}

</mosaic_0001>

<bundles_post_ra>
// kernel: _attention_critic_forward.1
= control target key start
LH: loop header
LB: loop body
LE: loop exit
PB: predicated region body
PF: predicated region fallthrough
CT: control target
= control target key end

     0   :  { %10 = vsyncpa [#allocation3], 0  ;;  %s13084_s0 = inlined_call_operand.vmem [shape: f32[8,128], index: 0, kind: input, shape index: {}]   ;;  %s13085_s1 = inlined_call_operand.hbm [shape: f32[128,1536], index: 1, kind: input, shape index: {}]   ;;  %s13086_s2 = inlined_call_operand.hbm [shape: f32[256,128], index: 2, kind: input, shape index: {}]   ;;  %s13087_s3 = inlined_call_operand.vmem [shape: f32[8,256], index: 3, kind: output, shape index: {0}]   ;;  %s13088_s4 = inlined_call_operand.vmem [shape: f32[16,128], index: 4, kind: output, shape index: {1}]  }
   0x1   :  { %11 = vsyncpa [#allocation5], 0  ;;  %s8833_s15 = smov [#allocation2]  }
   0x2   :  { %s19_s16 = sshll.u32 %s8833_s15, 4  ;;  %s20_s16 = int_to_ptr.vmem [resolvable:$true] %s19_s16 }
   0x3   :  { %s8797_s17 = scalar_lea.vmem %s20_s16, 24576  ;;  %p8802_p1 = scmp.lt.s32.totalorder %s20_s16, %s20_s16 }
   0x4   :  { %p8798_p0 = scmp.ne.s32.totalorder %s20_s16, %s8797_s17  ;;  %p8803_p2 = scmp.lt.s32.totalorder %s8797_s17, %s8797_s17 }
   0x6   :  { %p8804_p3 = por %p8803_p2, %p8802_p1 }
   0x8   :  { %p8805_p4 = pnand %p8804_p3, %p8798_p0 }
   0xa   :  { %8808 = shalt.err (!%p8805_p4)
}
   0xb   :  { %s8834_s18 = smov 1536   ;;  %s8835_s19 = smov 96  }
   0xc   :  { %25 = dma.hbm_to_vmem [thread:$0]  %s13085_s1, 24576, %s20_s16, [#allocation3], %s8834_s18, %s8834_s18, %s8835_s19  }
   0xd   :  { %s8836_s22 = smov [#allocation4]  }
   0xe   :  { %s31_s23 = sshll.u32 %s8836_s22, 4  ;;  %s32_s23 = int_to_ptr.vmem [resolvable:$true] %s31_s23 }
   0xf   :  { %s8817_s24 = scalar_lea.vmem %s32_s23, 4096  ;;  %p8822_p6 = scmp.lt.s32.totalorder %s32_s23, %s32_s23 }
  0x10   :  { %p8818_p5 = scmp.ne.s32.totalorder %s32_s23, %s8817_s24  ;;  %p8823_p7 = scmp.lt.s32.totalorder %s8817_s24, %s8817_s24 }
  0x12   :  { %p8824_p8 = por %p8823_p7, %p8822_p6 }
  0x14   :  { %p8825_p9 = pnand %p8824_p8, %p8818_p5 }
  0x16   :  { %8828 = shalt.err (!%p8825_p9)
}
  0x17   :  { %s8837_s25 = smov 128   ;;  %s8838_s26 = smov 8  }
  0x18   :  { %37 = dma.hbm_to_vmem [thread:$0]  %s13086_s2, 4096, %s32_s23, [#allocation5], %s8837_s25, %s8837_s25, %s8838_s26  }
  0x19   :  { %8829 = dma.done.wait [#allocation3], 24576  }
  0x1a   :  { %8830 = vsyncadd [#allocation3], 4294942720 }
  0x1b   :  { %8831 = dma.done.wait [#allocation5], 4096  }
  0x1c   :  { %8832 = vsyncadd [#allocation5], 4294963200  ;;  %v13103_v0 = vmov 0.0   ;;  %v76_v1 = vld [vmem:[#allocation2 + $0x5a8] sm:$0xff]  ;;  %v75_v2 = vld [vmem:[#allocation2 + $0x5a0] sm:$0xff]  ;;  %vm8840_vm0 = vmmov 0  }
  0x1d   :  { %173 = vmatprep.mubr.f32.mxu0 %v13103_v0  ;;  %409 = vmatprep.mubr.f32.mxu1 %v13103_v0  ;;  %v74_v3 = vld [vmem:[#allocation2 + $0x548] sm:$0xff]  ;;  %v8874_v4 = vand.u32 4294901760, %v76_v1  ;;  %v8876_v5 = vand.u32 4294901760, %v75_v2  ;;  %v73_v7 = vld [vmem:[#allocation2 + $0x540] sm:$0xff] }
  0x1e   :  { %v8878_v6 = vand.u32 4294901760, %v74_v3  ;;  %v72_v8 = vld [vmem:[#allocation2 + $0x4e8] sm:$0xff]  ;;  %v71_v9 = vld [vmem:[#allocation2 + $0x4e0] sm:$0xff]  ;;  %v8880_v10 = vand.u32 4294901760, %v73_v7 }
  0x1f   :  { %v8882_v11 = vand.u32 4294901760, %v72_v8  ;;  %v8884_v12 = vand.u32 4294901760, %v71_v9  ;;  %v70_v13 = vld [vmem:[#allocation2 + $0x488] sm:$0xff]  ;;  %v69_v14 = vld [vmem:[#allocation2 + $0x480] sm:$0xff]  ;;  %78 = vmatprep.subr.mxu0 %v8874_v4  ;;  %v8894_v19 = vsub.f32 %v76_v1, %v8874_v4  ;;  %v8907_v24 = vsub.f32 %v75_v2, %v8876_v5 }
  0x20   :  { %v68_v15 = vld [vmem:[#allocation2 + $0x428] sm:$0xff]  ;;  %v8887_v16 = vand.u32 4294901760, %v70_v13  ;;  %v8889_v17 = vand.u32 4294901760, %v69_v14  ;;  %v8896_v20 = vld [vmem:[#allocation2 + $0x420] sm:$0xff]  ;;  %80 = vmatpush1.msra.mxu0 %v8876_v5  ;;  %v8913_v26 = vsub.f32 %v74_v3, %v8878_v6  ;;  %v8927_v32 = vsub.f32 %v73_v7, %v8880_v10 }
  0x21   :  { %v8891_v18 = vand.u32 4294901760, %v68_v15  ;;  %v8898_v21 = vld [vmem:[#allocation2 + $0x3c8] sm:$0xff]  ;;  %v8900_v22 = vld [vmem:[#allocation2 + $0x3c0] sm:$0xff]  ;;  %v8904_v23 = vand.u32 4294901760, %v8896_v20  ;;  %82 = vmatprep.subr.mxu0 %v8878_v6  ;;  %v13101_v30 = vand.u32 4294901760, %v8894_v19  ;;  %v13100_v34 = vand.u32 4294901760, %v8907_v24 }
  0x22   :  { %v8910_v25 = vand.u32 4294901760, %v8898_v21  ;;  %v8915_v27 = vld [vmem:[#allocation2 + $0x368] sm:$0xff]  ;;  %v8917_v28 = vld [vmem:[#allocation2 + $0x360] sm:$0xff]  ;;  %v8924_v31 = vand.u32 4294901760, %v8900_v22  ;;  %84 = vmatpush1.msra.mxu0 %v8880_v10  ;;  %v13098_v35 = vand.u32 4294901760, %v8913_v26  ;;  %v8936_v36 = vsub.f32 %v72_v8, %v8882_v11 }
  0x23   :  { %v8919_v29 = vld [vmem:[#allocation2 + $0x308] sm:$0xff]  ;;  %v8930_v33 = vand.u32 4294901760, %v8915_v27  ;;  %v8939_v37 = vand.u32 4294901760, %v8917_v28  ;;  %v8941_v38 = vld [vmem:[#allocation2 + $0x300] sm:$0xff]  ;;  %86 = vmatprep.subr.mxu0 %v8882_v11  ;;  %v188_v39 = vsub.f32 %v8894_v19, %v13101_v30  ;;  %v13096_v40 = vand.u32 4294901760, %v8927_v32 }
  0x24   :  { %v8949_v41 = vsub.f32 %v71_v9, %v8884_v12  ;;  %v8952_v42 = vand.u32 4294901760, %v8919_v29  ;;  %88 = vmatpush1.msra.mxu0 %v8884_v12  ;;  %v194_v43 = vsub.f32 %v8907_v24, %v13100_v34  ;;  %v200_v44 = vsub.f32 %v8913_v26, %v13098_v35  ;;  %v8965_v47 = vld [vmem:[#allocation2 + $0x2a8] sm:$0xff]  ;;  %v8975_v52 = vld [vmem:[#allocation2 + $0x2a0] sm:$0xff] }
  0x25   :  { %13512 = vst [vmem:[#allocation8_spill] sm:$0xff] %v8930_v33  ;;  %13513 = vst [vmem:[#allocation9_spill] sm:$0xff] %v8939_v37  ;;  %v13095_v45 = vand.u32 4294901760, %v8936_v36  ;;  %v8963_v46 = vsub.f32 %v70_v13, %v8887_v16  ;;  %90 = vmatprep.subr.mxu0 %v8887_v16  ;;  %v189_v48 = vand.u32 4294901760, %v188_v39  ;;  %v206_v49 = vsub.f32 %v8927_v32, %v13096_v40  ;;  %v8982_v57 = vld [vmem:[#allocation2 + $0x248] sm:$0xff]  ;;  %v8994_v62 = vld [vmem:[#allocation2 + $0x240] sm:$0xff] }
  0x26   :  { %13514 = vst [vmem:[#allocation10_spill] sm:$0xff] %v8952_v42  ;;  %v13093_v50 = vand.u32 4294901760, %v8949_v41  ;;  %v8973_v51 = vand.u32 4294901760, %v8941_v38  ;;  %92 = vmatpush1.msra.mxu0 %v8889_v17  ;;  %v195_v53 = vand.u32 4294901760, %v194_v43  ;;  %v201_v54 = vand.u32 4294901760, %v200_v44  ;;  %v9006_v7 = vld [vmem:[#allocation2 + $0x1e8] sm:$0xff] }
  0x27   :  { %v212_v55 = vsub.f32 %v8936_v36, %v13095_v45  ;;  %v13091_v56 = vand.u32 4294901760, %v8963_v46  ;;  %94 = vmatprep.subr.mxu0 %v8891_v18  ;;  %190 = vmatprep.subr.mxu1 %v189_v48  ;;  %v207_v58 = vand.u32 4294901760, %v206_v49  ;;  %v8989_v60 = vsub.f32 %v69_v14, %v8889_v17  ;;  %v9084_v45 = vld [vmem:[#allocation2 + $0x120] sm:$0xff]  ;;  %v9097_v35 = vld [vmem:[#allocation2 + $0xc8] sm:$0xff] }
  0x28   :  { %13515 = vst [vmem:[#allocation11_spill] sm:$0xff] %v8973_v51  ;;  %v218_v59 = vsub.f32 %v8949_v41, %v13093_v50  ;;  %v8992_v61 = vand.u32 4294901760, %v8965_v47  ;;  %96 = vmatpush1.msra.mxu0 %v8904_v23  ;;  %196 = vmatpush1.msra.mxu1 %v195_v53  ;;  %v9001_v2 = vsub.f32 %v68_v15, %v8891_v18  ;;  %v9004_v3 = vand.u32 4294901760, %v8975_v52  ;;  %v9017_v15 = vld [vmem:[#allocation2 + $0x1e0] sm:$0xff] }
  0x29   :  { %v213_v63 = vand.u32 4294901760, %v212_v55  ;;  %v224_v1 = vsub.f32 %v8963_v46, %v13091_v56  ;;  %98 = vmatprep.subr.mxu0 %v8910_v25  ;;  %202 = vmatprep.subr.mxu1 %v201_v54  ;;  %v13090_v9 = vand.u32 4294901760, %v8989_v60  ;;  %v9012_v13 = vsub.f32 %v8896_v20, %v8904_v23  ;;  %v9107_v34 = vld [vmem:[#allocation2 + $0xc0] sm:$0xff] }
  0x2a   :  { %13516 = vst [vmem:[#allocation12_spill] sm:$0xff] %v8992_v61  ;;  %13517 = vst [vmem:[#allocation13_spill] sm:$0xff] %v9004_v3  ;;  %v219_v8 = vand.u32 4294901760, %v218_v59  ;;  %v9015_v14 = vand.u32 4294901760, %v8982_v57  ;;  %100 = vmatpush1.msra.mxu0 %v8924_v31  ;;  %208 = vmatpush1.msra.mxu1 %v207_v58  ;;  %v13089_v43 = vand.u32 4294901760, %v9001_v2  ;;  %v9023_v44 = vsub.f32 %v8898_v21, %v8910_v25  ;;  %v9040_v21 = vld [vmem:[#allocation2 + $0x188] sm:$0xff] }
  0x2b   :  { %v225_v39 = vand.u32 4294901760, %v224_v1  ;;  %v9026_v48 = vand.u32 4294901760, %v8994_v62  ;;  %102 = vmatprep.subr.mxu0 %v8930_v33  ;;  %214 = vmatprep.subr.mxu1 %v213_v63  ;;  %v230_v20 = vsub.f32 %v8989_v60, %v13090_v9  ;;  %v13092_v49 = vand.u32 4294901760, %v9012_v13  ;;  %v9063_v9 = vld [vmem:[#allocation2 + $0x180] sm:$0xff] }
  0x2c   :  { %13518 = vst [vmem:[#allocation14_spill] sm:$0xff] %v9015_v14  ;;  %v9035_v53 = vsub.f32 %v8900_v22, %v8924_v31  ;;  %v9038_v54 = vand.u32 4294901760, %v9006_v7  ;;  %104 = vmatpush1.msra.mxu0 %v8939_v37  ;;  %220 = vmatpush1.msra.mxu1 %v219_v8  ;;  %v236_v55 = vsub.f32 %v9001_v2, %v13089_v43  ;;  %v13094_v58 = vand.u32 4294901760, %v9023_v44 }
  0x2d   :  { %13519 = vst [vmem:[#allocation15_spill] sm:$0xff] %v9026_v48  ;;  %v9049_v59 = vsub.f32 %v8915_v27, %v8930_v33  ;;  %v9052_v22 = vand.u32 4294901760, %v9017_v15  ;;  %106 = vmatprep.subr.mxu0 %v8952_v42  ;;  %226 = vmatprep.subr.mxu1 %v225_v39  ;;  %v231_v63 = vand.u32 4294901760, %v230_v20  ;;  %v242_v1 = vsub.f32 %v9012_v13, %v13092_v49  ;;  %v9073_v49 = vld [vmem:[#allocation2 + $0x128] sm:$0xff] }
  0x2e   :  { %13520 = vst [vmem:[#allocation16_spill] sm:$0xff] %v9038_v54  ;;  %v13097_v8 = vand.u32 4294901760, %v9035_v53  ;;  %v9061_v43 = vsub.f32 %v8917_v28, %v8939_v37  ;;  %108 = vmatpush1.msra.mxu0 %v8973_v51  ;;  %v237_v27 = vand.u32 4294901760, %v236_v55  ;;  %v248_v39 = vsub.f32 %v9023_v44, %v13094_v58 }
  0x2f   :  { %13521 = vst [vmem:[#allocation17_spill] sm:$0xff] %v9052_v22  ;;  %v13099_v20 = vand.u32 4294901760, %v9049_v59  ;;  %v9071_v56 = vand.u32 4294901760, %v9040_v21  ;;  %232 = vmatpush1.msra.mxu1 %v231_v63  ;;  %110 = vmatprep.subr.mxu0 %v8992_v61  ;;  %v243_v28 = vand.u32 4294901760, %v242_v1  ;;  %v9082_v58 = vsub.f32 %v8919_v29, %v8952_v42 }
  0x30   :  { %v254_v50 = vsub.f32 %v9035_v53, %v13097_v8  ;;  %v13102_v55 = vand.u32 4294901760, %v9061_v43  ;;  %238 = vmatprep.subr.mxu1 %v237_v27  ;;  %112 = vmatpush1.msra.mxu0 %v9004_v3  ;;  %v249_v40 = vand.u32 4294901760, %v248_v39  ;;  %v9091_v1 = vand.u32 4294901760, %v9063_v9 }
  0x31   :  { %13522 = vst [vmem:[#allocation18_spill] sm:$0xff] %v9071_v56  ;;  %v260_v63 = vsub.f32 %v9049_v59, %v13099_v20  ;;  %v9095_v8 = vsub.f32 %v8941_v38, %v8973_v51  ;;  %244 = vmatpush1.msra.mxu1 %v243_v28  ;;  %114 = vmatprep.subr.mxu0 %v9015_v14  ;;  %v13107_v39 = vand.u32 4294901760, %v9082_v58  ;;  %v9105_v20 = vand.u32 4294901760, %v9073_v49 }
  0x32   :  { %13523 = vst [vmem:[#allocation19_spill] sm:$0xff] %v9091_v1  ;;  %v255_v29 = vand.u32 4294901760, %v254_v50  ;;  %v266_v27 = vsub.f32 %v9061_v43, %v13102_v55  ;;  %250 = vmatprep.subr.mxu1 %v249_v40  ;;  %116 = vmatpush1.msra.mxu0 %v9026_v48  ;;  %v9113_v50 = vsub.f32 %v8965_v47, %v8992_v61  ;;  %v9116_v30 = vand.u32 4294901760, %v9084_v45  ;;  %v9118_v55 = vld [vmem:[#allocation2 + $0x68] sm:$0xff] }
  0x33   :  { %v261_v38 = vand.u32 4294901760, %v260_v63  ;;  %v13110_v28 = vand.u32 4294901760, %v9095_v8  ;;  %118 = vmatprep.subr.mxu0 %v9038_v54  ;;  %v272_v40 = vsub.f32 %v9082_v58, %v13107_v39  ;;  %v9126_v63 = vsub.f32 %v8975_v52, %v9004_v3  ;;  %v9143_v52 = vld [vmem:[#allocation2 + $0x60] sm:$0xff] }
  0x34   :  { %13524 = vst [vmem:[#allocation20_spill] sm:$0xff] %v9116_v30  ;;  %256 = vmatpush1.msra.mxu1 %v255_v29  ;;  %v267_v0 = vand.u32 4294901760, %v266_v27  ;;  %v9129_v47 = vand.u32 4294901760, %v9097_v35  ;;  %120 = vmatpush1.msra.mxu0 %v9052_v22  ;;  %v9138_v61 = vsub.f32 %v8982_v57, %v9015_v14  ;;  %v9141_v39 = vand.u32 4294901760, %v9107_v34  ;;  %v9154_v57 = vld [vmem:[#allocation2 + $0x8] sm:$0xff] }
  0x35   :  { %262 = vmatprep.subr.mxu1 %v261_v38  ;;  %v278_v29 = vsub.f32 %v9095_v8, %v13110_v28  ;;  %122 = vmatprep.subr.mxu0 %v9071_v56  ;;  %v273_v38 = vand.u32 4294901760, %v272_v40  ;;  %v9149_v28 = vsub.f32 %v8994_v62, %v9026_v48  ;;  %v9152_v27 = vand.u32 4294901760, %v9118_v55  ;;  %v9177_v40 = vld [vmem:[#allocation2] sm:$0xff] }
  0x36   :  { %13525 = vst [vmem:[#allocation21_spill] sm:$0xff] %v9129_v47  ;;  %13526 = vst [vmem:[#allocation22_spill] sm:$0xff] %v9141_v39  ;;  %268 = vmatpush1.msra.mxu1 %v267_v0  ;;  %124 = vmatpush1.msra.mxu0 %v9091_v1  ;;  %v13527_v51 = vand.u32 4294901760, %v9113_v50  ;;  %v9163_v3 = vsub.f32 %v9006_v7, %v9038_v54  ;;  %v13529_v62 = vand.u32 4294901760, %v9126_v63  ;;  %v9185_v42 = vand.u32 4294901760, %v9154_v57 }
  0x37   :  { %v279_v14 = vand.u32 4294901760, %v278_v29  ;;  %274 = vmatprep.subr.mxu1 %v273_v38  ;;  %126 = vmatprep.subr.mxu0 %v9105_v20  ;;  %v9171_v29 = vand.u32 4294901760, %v9143_v52  ;;  %v13531_v38 = vand.u32 4294901760, %v9138_v61 }
  0x38   :  { %v284_v0 = vsub.f32 %v9113_v50, %v13527_v51  ;;  %13528 = vst [vmem:[#allocation23_spill] sm:$0xff] %v9163_v3  ;;  %v290_v48 = vsub.f32 %v9126_v63, %v13529_v62  ;;  %v9175_v51 = vsub.f32 %v9017_v15, %v9052_v22  ;;  %128 = vmatpush1.msra.mxu0 %v9116_v30  ;;  %v13532_v15 = vand.u32 4294901760, %v9149_v28 }
  0x39   :  { %13530 = vst [vmem:[#allocation24_spill] sm:$0xff] %v9171_v29  ;;  %280 = vmatpush1.msra.mxu1 %v279_v14  ;;  %v296_v54 = vsub.f32 %v9138_v61, %v13531_v38  ;;  %130 = vmatprep.subr.mxu0 %v9129_v47  ;;  %v44_v38 = vld [vmem:[%s13084_s0] sm:$0xff]  ;;  %v9208_v14 = vsub.f32 %v9063_v9, %v9091_v1 }
  0x3a   :  { %v285_v7 = vand.u32 4294901760, %v284_v0  ;;  %v291_v37 = vand.u32 4294901760, %v290_v48  ;;  %v302_v22 = vsub.f32 %v9149_v28, %v13532_v15  ;;  %v9194_v0 = vsub.f32 %v9040_v21, %v9071_v56  ;;  %132 = vmatpush1.msra.mxu0 %v9141_v39 }
  0x3b   :  { %v297_v62 = vand.u32 4294901760, %v296_v54  ;;  %v13533_v48 = vand.u32 4294901760, %v9163_v3  ;;  %v9204_v15 = vand.u32 4294901760, %v9177_v40  ;;  %134 = vmatprep.subr.mxu0 %v9152_v27  ;;  %v13134_v9 = vand.u32 4294901760, %v9208_v14 }
  0x3c   :  { %286 = vmatprep.subr.mxu1 %v285_v7  ;;  %v303_v21 = vand.u32 4294901760, %v302_v22  ;;  %v13534_v7 = vand.u32 4294901760, %v9175_v51  ;;  %v13131_v56 = vand.u32 4294901760, %v9194_v0  ;;  %136 = vmatpush1.msra.mxu0 %v9171_v29  ;;  %v9225_v22 = vsub.f32 %v9084_v45, %v9116_v30 }
  0x3d   :  { %v308_v33 = vsub.f32 %v9163_v3, %v13533_v48  ;;  %292 = vmatpush1.msra.mxu1 %v291_v37  ;;  %v9217_v48 = vsub.f32 %v9073_v49, %v9105_v20  ;;  %v9221_v37 = vand.u32 4294901760, %v44_v38  ;;  %138 = vmatprep.subr.mxu0 %v9185_v42  ;;  %v326_v45 = vsub.f32 %v9208_v14, %v13134_v9 }
  0x3e   :  { %v314_v54 = vsub.f32 %v9175_v51, %v13534_v7  ;;  %298 = vmatprep.subr.mxu1 %v297_v62  ;;  %v320_v49 = vsub.f32 %v9194_v0, %v13131_v56  ;;  %v9234_v62 = vsub.f32 %v9097_v35, %v9129_v47  ;;  %140 = vmatpush1.msra.mxu0 %v9204_v15 }
  0x3f   :  { %v309_v3 = vand.u32 4294901760, %v308_v33  ;;  %13535 = vst [vmem:[#allocation25_spill] sm:$0xff] %v9221_v37  ;;  %304 = vmatpush1.msra.mxu1 %v303_v21  ;;  %v9241_v21 = vsub.f32 %v44_v38, %v9221_v37  ;;  %v9246_v56 = vsub.f32 %v9107_v34, %v9141_v39  ;;  %v13536_v35 = vand.u32 4294901760, %v9217_v48  ;;  %419 = vmatprep.subr.mxu0 %v8894_v19 }
  0x40   :  { %v315_v7 = vand.u32 4294901760, %v314_v54  ;;  %v321_v33 = vand.u32 4294901760, %v320_v49  ;;  %v13139_v47 = vand.u32 4294901760, %v9234_v62  ;;  %v9255_v38 = vsub.f32 %v9118_v55, %v9152_v27 }
  0x41   :  { %310 = vmatprep.subr.mxu1 %v309_v3  ;;  %v332_v3 = vsub.f32 %v9217_v48, %v13536_v35  ;;  %v327_v9 = vand.u32 4294901760, %v326_v45  ;;  %v13140_v54 = vand.u32 4294901760, %v9241_v21  ;;  %v13537_v34 = vand.u32 4294901760, %v9225_v22 }
  0x42   :  { %316 = vmatpush1.msra.mxu1 %v315_v7  ;;  %v13143_v49 = vand.u32 4294901760, %v9246_v56  ;;  %v344_v35 = vsub.f32 %v9234_v62, %v13139_v47  ;;  %v13147_v30 = vand.u32 4294901760, %v9255_v38  ;;  %v9268_v55 = vsub.f32 %v9143_v52, %v9171_v29 }
  0x43   :  { %v338_v7 = vsub.f32 %v9225_v22, %v13537_v34  ;;  %322 = vmatprep.subr.mxu1 %v321_v33  ;;  %v333_v39 = vand.u32 4294901760, %v332_v3  ;;  %v177_v45 = vsub.f32 %v9241_v21, %v13140_v54  ;;  %v9278_v3 = vsub.f32 %v9154_v57, %v9185_v42 }
  0x44   :  { %13538 = vst [vmem:[#allocation26_spill] sm:$0xff] %v9268_v55  ;;  %328 = vmatpush1.msra.mxu1 %v327_v9  ;;  %v350_v33 = vsub.f32 %v9246_v56, %v13143_v49  ;;  %v345_v47 = vand.u32 4294901760, %v344_v35  ;;  %v356_v52 = vsub.f32 %v9255_v38, %v13147_v30  ;;  %v13146_v9 = vand.u32 4294901760, %v9268_v55 }
  0x45   :  { %v339_v34 = vand.u32 4294901760, %v338_v7  ;;  %334 = vmatprep.subr.mxu1 %v333_v39  ;;  %v9286_v54 = vsub.f32 %v9177_v40, %v9204_v15  ;;  %v178_v7 = vand.u32 4294901760, %v177_v45  ;;  %v13145_v49 = vand.u32 4294901760, %v9278_v3 }
  0x46   :  { %v351_v29 = vand.u32 4294901760, %v350_v33  ;;  %v357_v57 = vand.u32 4294901760, %v356_v52  ;;  %v362_v39 = vsub.f32 %v9268_v55, %v13146_v9  ;;  %v13540_v33 = vmov 0.0   ;;  %v13541_v52 = vld [vmem:[#allocation8_spill] sm:$0xff]  ;;  %v13552_v9 = vld [vmem:[#allocation18_spill] sm:$0xff] }
  0x47   :  { %13539 = vst [vmem:[#allocation27_spill] sm:$0xff] %v9286_v54  ;;  %340 = vmatpush1.msra.mxu1 %v339_v34  ;;  %v13144_v35 = vand.u32 4294901760, %v9286_v54  ;;  %179 = vmatmul.mubr.f32.vlgmr.msra.gmra.mxu0 %v178_v7  ;;  %v368_v40 = vsub.f32 %v9278_v3, %v13145_v49  ;;  %v13542_v7 = vld [vmem:[#allocation23_spill] sm:$0xff]  ;;  %v13551_v49 = vld [vmem:[#allocation17_spill] sm:$0xff]  ;;  %v13553_v30 = vand.u32 4294901760, %v8894_v19  ;;  %v13560_v19 = vand.u32 4294901760, %v8936_v36 }
  0x48   :  { %346 = vmatprep.subr.mxu1 %v345_v47  ;;  %422 = vmatpush1.msra.mxu0 %v8907_v24  ;;  %v363_v45 = vand.u32 4294901760, %v362_v39  ;;  %v13544_v39 = vld [vmem:[#allocation10_spill] sm:$0xff] }
  0x49   :  { %352 = vmatpush1.msra.mxu1 %v351_v29  ;;  %v374_v47 = vsub.f32 %v9286_v54, %v13144_v35  ;;  %425 = vmatprep.subr.mxu0 %v8913_v26  ;;  %v369_v34 = vand.u32 4294901760, %v368_v40  ;;  %v13545_v40 = vld [vmem:[#allocation11_spill] sm:$0xff]  ;;  %v13550_v35 = vld [vmem:[#allocation16_spill] sm:$0xff] }
  0x4a   :  { %358 = vmatprep.subr.mxu1 %v357_v57  ;;  %545 = vmatprep.mubr.f32.mxu0 %v13540_v33  ;;  %v13543_v57 = vld [vmem:[#allocation9_spill] sm:$0xff] }
  0x4b   :  { %428 = vmatpush1.msra.mxu0 %v8927_v32  ;;  %364 = vmatpush1.msra.mxu1 %v363_v45  ;;  %v375_v29 = vand.u32 4294901760, %v374_v47  ;;  %v13546_v45 = vld [vmem:[#allocation12_spill] sm:$0xff]  ;;  %v13547_v47 = vld [vmem:[#allocation13_spill] sm:$0xff] }
  0x4c   :  { %431 = vmatprep.subr.mxu0 %v8936_v36  ;;  %370 = vmatprep.subr.mxu1 %v369_v34  ;;  %v13548_v34 = vld [vmem:[#allocation14_spill] sm:$0xff]  ;;  %v13565_v36 = vand.u32 4294901760, %v9241_v21 }
  0x4d   :  { %434 = vmatpush1.msra.mxu0 %v8949_v41  ;;  %376 = vmatpush1.msra.mxu1 %v375_v29  ;;  %v13549_v29 = vld [vmem:[#allocation15_spill] sm:$0xff] }
  0x4e   :  { %437 = vmatprep.subr.mxu0 %v8963_v46  ;;  %411 = vmatmul.mubr.f32.vlgmr.msra.gmra.mxu1 %v9221_v37  ;;  %v13554_v37 = vld [vmem:[#allocation20_spill] sm:$0xff] }
  0x4f   :  { %440 = vmatpush1.msra.mxu0 %v8989_v60  ;;  %555 = vmatprep.subr.mxu1 %v8874_v4 }
  0x50   :  { %443 = vmatprep.subr.mxu0 %v9001_v2  ;;  %557 = vmatpush1.msra.mxu1 %v8876_v5 }
  0x51   :  { %446 = vmatpush1.msra.mxu0 %v9012_v13  ;;  %559 = vmatprep.subr.mxu1 %v8878_v6 }
  0x52   :  { %449 = vmatprep.subr.mxu0 %v9023_v44  ;;  %561 = vmatpush1.msra.mxu1 %v8880_v10 }
  0x53   :  { %452 = vmatpush1.msra.mxu0 %v9035_v53  ;;  %563 = vmatprep.subr.mxu1 %v8882_v11 }
  0x54   :  { %455 = vmatprep.subr.mxu0 %v9049_v59  ;;  %565 = vmatpush1.msra.mxu1 %v8884_v12 }
  0x55   :  { %458 = vmatpush1.msra.mxu0 %v9061_v43  ;;  %567 = vmatprep.subr.mxu1 %v8887_v16 }
  0x56   :  { %461 = vmatprep.subr.mxu0 %v9082_v58  ;;  %569 = vmatpush1.msra.mxu1 %v8889_v17 }
  0x57   :  { %464 = vmatpush1.msra.mxu0 %v9095_v8  ;;  %571 = vmatprep.subr.mxu1 %v8891_v18 }
  0x58   :  { %467 = vmatprep.subr.mxu0 %v9113_v50  ;;  %573 = vmatpush1.msra.mxu1 %v8904_v23 }
  0x59   :  { %470 = vmatpush1.msra.mxu0 %v9126_v63  ;;  %575 = vmatprep.subr.mxu1 %v8910_v25 }
  0x5a   :  { %473 = vmatprep.subr.mxu0 %v9138_v61  ;;  %577 = vmatpush1.msra.mxu1 %v8924_v31 }
  0x5b   :  { %476 = vmatpush1.msra.mxu0 %v9149_v28  ;;  %579 = vmatprep.subr.mxu1 %v13541_v52 }
  0x5c   :  { %479 = vmatprep.subr.mxu0 %v13542_v7  ;;  %581 = vmatpush1.msra.mxu1 %v13543_v57 }
  0x5d   :  { %482 = vmatpush1.msra.mxu0 %v9175_v51  ;;  %583 = vmatprep.subr.mxu1 %v13544_v39 }
  0x5e   :  { %485 = vmatprep.subr.mxu0 %v9194_v0  ;;  %585 = vmatpush1.msra.mxu1 %v13545_v40 }
  0x5f   :  { %488 = vmatpush1.msra.mxu0 %v9208_v14  ;;  %587 = vmatprep.subr.mxu1 %v13546_v45 }
  0x60   :  { %491 = vmatprep.subr.mxu0 %v9217_v48  ;;  %589 = vmatpush1.msra.mxu1 %v13547_v47 }
  0x61   :  { %494 = vmatpush1.msra.mxu0 %v9225_v22  ;;  %591 = vmatprep.subr.mxu1 %v13548_v34 }
  0x62   :  { %497 = vmatprep.subr.mxu0 %v9234_v62  ;;  %593 = vmatpush1.msra.mxu1 %v13549_v29 }
  0x63   :  { %500 = vmatpush1.msra.mxu0 %v9246_v56  ;;  %595 = vmatprep.subr.mxu1 %v13550_v35 }
  0x64   :  { %503 = vmatprep.subr.mxu0 %v9255_v38  ;;  %597 = vmatpush1.msra.mxu1 %v13551_v49  ;;  %v13555_v49 = vand.u32 4294901760, %v8907_v24  ;;  %v13562_v24 = vand.u32 4294901760, %v8949_v41  ;;  %v13567_v41 = vand.u32 4294901760, %v9012_v13  ;;  %v13584_v13 = vand.u32 4294901760, %v9234_v62  ;;  %v963_v62 = vld [vmem:[#allocation2 + $0x4f8] sm:$0xff] }
  0x65   :  { %506 = vmatpush1.msra.mxu0 %v9268_v55  ;;  %599 = vmatprep.subr.mxu1 %v13552_v9  ;;  %v13556_v55 = vld [vmem:[#allocation21_spill] sm:$0xff]  ;;  %v13557_v9 = vand.u32 4294901760, %v8913_v26  ;;  %v13563_v26 = vand.u32 4294901760, %v8963_v46  ;;  %v13568_v46 = vand.u32 4294901760, %v9023_v44  ;;  %v13586_v44 = vand.u32 4294901760, %v9255_v38  ;;  %v961_v38 = vld [vmem:[#allocation2 + $0x498] sm:$0xff] }
  0x66   :  { %509 = vmatprep.subr.mxu0 %v9278_v3  ;;  %601 = vmatpush1.msra.mxu1 %v9091_v1  ;;  %v13558_v1 = vld [vmem:[#allocation22_spill] sm:$0xff] }
  0x67   :  { %512 = vmatpush1.msra.mxu0 %v9286_v54  ;;  %603 = vmatprep.subr.mxu1 %v9105_v20  ;;  %v13559_v54 = vand.u32 4294901760, %v8927_v32  ;;  %v13564_v32 = vand.u32 4294901760, %v8989_v60  ;;  %v13569_v60 = vand.u32 4294901760, %v9035_v53  ;;  %v13587_v53 = vld [vmem:[#allocation26_spill] sm:$0xff] }
  0x68   :  { %548 = vmatmul.mubr.f32.vlgmr.msra.gmra.mxu0 %v9241_v21  ;;  %663 = vmatprep.subr.mxu0 %v13553_v30  ;;  %v13561_v30 = vld [vmem:[#allocation24_spill] sm:$0xff]  ;;  %v962_v21 = vld [vmem:[#allocation2 + $0x4f0] sm:$0xff] }
  0x69   :  { %605 = vmatpush1.msra.mxu1 %v13554_v37  ;;  %667 = vmatpush1.msra.mxu0 %v13555_v49 }
  0x6a   :  { %607 = vmatprep.subr.mxu1 %v13556_v55  ;;  %671 = vmatprep.subr.mxu0 %v13557_v9  ;;  %v9492_v9 = vand.u32 4294901760, %v962_v21 }
  0x6b   :  { %609 = vmatpush1.msra.mxu1 %v13558_v1  ;;  %675 = vmatpush1.msra.mxu0 %v13559_v54  ;;  %v13566_v54 = vand.u32 4294901760, %v9001_v2  ;;  %v13570_v2 = vand.u32 4294901760, %v9049_v59  ;;  %v13589_v59 = vld [vmem:[#allocation17_spill] sm:$0xff] }
  0x6c   :  { %611 = vmatprep.subr.mxu1 %v9152_v27  ;;  %679 = vmatprep.subr.mxu0 %v13560_v19 }
  0x6d   :  { %613 = vmatpush1.msra.mxu1 %v13561_v30  ;;  %683 = vmatpush1.msra.mxu0 %v13562_v24 }
  0x6e   :  { %615 = vmatprep.subr.mxu1 %v9185_v42  ;;  %687 = vmatprep.subr.mxu0 %v13563_v26  ;;  %v959_v26 = vld [vmem:[#allocation2 + $0x438] sm:$0xff] }
  0x6f   :  { %617 = vmatpush1.msra.mxu1 %v9204_v15  ;;  %650 = vmatprep.mubr.f32.mxu1 %v13540_v33 }
  0x70   :  { %691 = vmatpush1.msra.mxu0 %v13564_v32  ;;  %654 = vmatmul.mubr.f32.vlgmr.msra.gmra.mxu1 %v13565_v36 }
  0x71   :  { %695 = vmatprep.subr.mxu0 %v13566_v54  ;;  %829 = vmatprep.subr.mxu1 %v8874_v4  ;;  %v13571_v4 = vand.u32 4294901760, %v9061_v43  ;;  %v13585_v43 = vand.u32 4294901760, %v9246_v56 }
  0x72   :  { %699 = vmatpush1.msra.mxu0 %v13567_v41  ;;  %831 = vmatpush1.msra.mxu1 %v8876_v5  ;;  %v13572_v5 = vand.u32 4294901760, %v9082_v58  ;;  %v13588_v58 = vand.u32 4294901760, %v13587_v53 }
  0x73   :  { %703 = vmatprep.subr.mxu0 %v13568_v46  ;;  %833 = vmatprep.subr.mxu1 %v8878_v6  ;;  %v13573_v6 = vand.u32 4294901760, %v9095_v8  ;;  %v13590_v8 = vand.u32 4294901760, %v9278_v3  ;;  %v9490_v3 = vand.u32 4294901760, %v963_v62  ;;  %v958_v46 = vld [vmem:[#allocation2 + $0x430] sm:$0xff] }
  0x74   :  { %707 = vmatpush1.msra.mxu0 %v13569_v60  ;;  %835 = vmatpush1.msra.mxu1 %v8880_v10  ;;  %v13574_v10 = vand.u32 4294901760, %v9113_v50  ;;  %v13592_v50 = vld [vmem:[#allocation27_spill] sm:$0xff] }
  0x75   :  { %711 = vmatprep.subr.mxu0 %v13570_v2  ;;  %837 = vmatprep.subr.mxu1 %v8882_v11  ;;  %v13575_v11 = vand.u32 4294901760, %v9126_v63  ;;  %v13593_v56 = vand.u32 4294901760, %v13592_v50  ;;  %v13594_v63 = vld [vmem:[#allocation19_spill] sm:$0xff] }
  0x76   :  { %715 = vmatpush1.msra.mxu0 %v13571_v4  ;;  %839 = vmatpush1.msra.mxu1 %v8884_v12  ;;  %v13576_v12 = vand.u32 4294901760, %v9138_v61  ;;  %v13583_v61 = vand.u32 4294901760, %v9225_v22  ;;  %v964_v22 = vld [vmem:[#allocation2 + $0x550] sm:$0xff] }
  0x77   :  { %719 = vmatprep.subr.mxu0 %v13572_v5  ;;  %841 = vmatprep.subr.mxu1 %v8887_v16  ;;  %v13577_v16 = vand.u32 4294901760, %v9149_v28  ;;  %v13591_v28 = vld [vmem:[#allocation18_spill] sm:$0xff] }
  0x78   :  { %723 = vmatpush1.msra.mxu0 %v13573_v6  ;;  %843 = vmatpush1.msra.mxu1 %v8889_v17  ;;  %v13578_v17 = vand.u32 4294901760, %v13542_v7  ;;  %v957_v6 = vld [vmem:[#allocation2 + $0x3d8] sm:$0xff] }
  0x79   :  { %727 = vmatprep.subr.mxu0 %v13574_v10  ;;  %845 = vmatprep.subr.mxu1 %v8891_v18  ;;  %v13579_v18 = vand.u32 4294901760, %v9175_v51  ;;  %v13595_v51 = vld [vmem:[#allocation25_spill] sm:$0xff] }
  0x7a   :  { %731 = vmatpush1.msra.mxu0 %v13575_v11  ;;  %847 = vmatpush1.msra.mxu1 %v8904_v23  ;;  %v13580_v23 = vand.u32 4294901760, %v9194_v0  ;;  %v966_v0 = vld [vmem:[#allocation2 + $0x5b0] sm:$0xff] }
  0x7b   :  { %735 = vmatprep.subr.mxu0 %v13576_v12  ;;  %849 = vmatprep.subr.mxu1 %v8910_v25  ;;  %v13581_v25 = vand.u32 4294901760, %v9208_v14 }
  0x7c   :  { %739 = vmatpush1.msra.mxu0 %v13577_v16  ;;  %851 = vmatpush1.msra.mxu1 %v8924_v31  ;;  %v13582_v31 = vand.u32 4294901760, %v9217_v48  ;;  %v9472_v48 = vand.u32 4294901760, %v966_v0  ;;  %v9544_v16 = vand.u32 4294901760, %v959_v26 }
  0x7d   :  { %743 = vmatprep.subr.mxu0 %v13578_v17  ;;  %853 = vmatprep.subr.mxu1 %v13541_v52  ;;  %v956_v17 = vld [vmem:[#allocation2 + $0x3d0] sm:$0xff] }
  0x7e   :  { %747 = vmatpush1.msra.mxu0 %v13579_v18  ;;  %855 = vmatpush1.msra.mxu1 %v13543_v57  ;;  %v9499_v57 = vand.u32 4294901760, %v961_v38  ;;  %v9555_v53 = vsub.f32 %v959_v26, %v9544_v16 }
  0x7f   :  { %751 = vmatprep.subr.mxu0 %v13580_v23  ;;  %857 = vmatprep.subr.mxu1 %v13544_v39 }
  0x80   :  { %755 = vmatpush1.msra.mxu0 %v13581_v25  ;;  %859 = vmatpush1.msra.mxu1 %v13545_v40 }
  0x81   :  { %759 = vmatprep.subr.mxu0 %v13582_v31  ;;  %861 = vmatprep.subr.mxu1 %v13546_v45  ;;  %v9552_v31 = vand.u32 4294901760, %v958_v46 }
  0x82   :  { %763 = vmatpush1.msra.mxu0 %v13583_v61  ;;  %863 = vmatpush1.msra.mxu1 %v13547_v47  ;;  %v9509_v47 = vsub.f32 %v963_v62, %v9490_v3  ;;  %v955_v61 = vld [vmem:[#allocation2 + $0x378] sm:$0xff] }
  0x83   :  { %767 = vmatprep.subr.mxu0 %v13584_v13  ;;  %865 = vmatprep.subr.mxu1 %v13548_v34  ;;  %v9512_v34 = vsub.f32 %v962_v21, %v9492_v9  ;;  %v954_v13 = vld [vmem:[#allocation2 + $0x370] sm:$0xff] }
  0x84   :  { %771 = vmatpush1.msra.mxu0 %v13585_v43  ;;  %867 = vmatpush1.msra.mxu1 %v13549_v29  ;;  %v13165_v54 = vand.u32 4294901760, %v9509_v47 }
  0x85   :  { %775 = vmatprep.subr.mxu0 %v13586_v44  ;;  %869 = vmatprep.subr.mxu1 %v13550_v35  ;;  %v960_v35 = vld [vmem:[#allocation2 + $0x490] sm:$0xff]  ;;  %v13163_v41 = vand.u32 4294901760, %v9512_v34 }
  0x86   :  { %779 = vmatpush1.msra.mxu0 %v13588_v58  ;;  %871 = vmatpush1.msra.mxu1 %v13589_v59  ;;  %v9501_v39 = vand.u32 4294901760, %v960_v35  ;;  %v1103_v11 = vsub.f32 %v9509_v47, %v13165_v54  ;;  %v9557_v58 = vand.u32 4294901760, %v957_v6  ;;  %v953_v59 = vld [vmem:[#allocation2 + $0x318] sm:$0xff] }
  0x87   :  { %783 = vmatprep.subr.mxu0 %v13590_v8  ;;  %873 = vmatprep.subr.mxu1 %v13591_v28  ;;  %v1109_v12 = vsub.f32 %v9512_v34, %v13163_v41  ;;  %v952_v8 = vld [vmem:[#allocation2 + $0x310] sm:$0xff]  ;;  %v9579_v21 = vand.u32 4294901760, %v953_v59 }
  0x88   :  { %787 = vmatpush1.msra.mxu0 %v13593_v56  ;;  %820 = vmatprep.mubr.f32.mxu0 %v13540_v33  ;;  %v9523_v24 = vsub.f32 %v960_v35, %v9501_v39  ;;  %v1104_v43 = vand.u32 4294901760, %v1103_v11  ;;  %v9561_v56 = vsub.f32 %v958_v46, %v9552_v31 }
  0x89   :  { %875 = vmatpush1.msra.mxu1 %v13594_v63  ;;  %822 = vmatmul.mubr.f32.vlgmr.msra.gmra.mxu0 %v13595_v51  ;;  %v1110_v44 = vand.u32 4294901760, %v1109_v12  ;;  %v9563_v63 = vand.u32 4294901760, %v956_v17  ;;  %v9600_v46 = vsub.f32 %v953_v59, %v9579_v21 }
  0x8a   :  { %877 = vmatprep.subr.mxu1 %v9105_v20  ;;  %924 = vmatprep.mubr.f32.mxu1 %v13540_v33  ;;  %v967_v20 = vld [vmem:[#allocation2 + $0x5b8] sm:$0xff]  ;;  %v13161_v5 = vand.u32 4294901760, %v9523_v24 }
  0x8b   :  { %879 = vmatpush1.msra.mxu1 %v13554_v37  ;;  %1064 = vmatprep.mubr.f32.mxu0 %v13540_v33  ;;  %v9470_v14 = vand.u32 4294901760, %v967_v20  ;;  %v965_v37 = vld [vmem:[#allocation2 + $0x558] sm:$0xff]  ;;  %v9577_v62 = vsub.f32 %v956_v17, %v9563_v63  ;;  %v950_v17 = vld [vmem:[#allocation2 + $0x2b0] sm:$0xff] }
  0x8c   :  { %881 = vmatprep.subr.mxu1 %v13556_v55  ;;  %v1121_v25 = vsub.f32 %v9523_v24, %v13161_v5 }
  0x8d   :  { %883 = vmatpush1.msra.mxu1 %v13558_v1  ;;  %13596 = vst [vmem:[#allocation8_spill] sm:$0xff] %v9470_v14  ;;  %v9475_v1 = vsub.f32 %v967_v20, %v9470_v14  ;;  %969 = vmatprep.subr.mxu0 %v9470_v14  ;;  %v9568_v20 = vsub.f32 %v957_v6, %v9557_v58 }
  0x8e   :  { %885 = vmatprep.subr.mxu1 %v9152_v27  ;;  %v9477_v27 = vand.u32 4294901760, %v965_v37  ;;  %971 = vmatpush1.msra.mxu0 %v9472_v48  ;;  %v1122_v50 = vand.u32 4294901760, %v1121_v25  ;;  %v13158_v25 = vand.u32 4294901760, %v9600_v46 }
  0x8f   :  { %887 = vmatpush1.msra.mxu1 %v13561_v30  ;;  %13597 = vst [vmem:[#allocation23_spill] sm:$0xff] %v9475_v1  ;;  %v13171_v49 = vand.u32 4294901760, %v9475_v1  ;;  %v9520_v30 = vsub.f32 %v961_v38, %v9499_v57  ;;  %v9581_v38 = vand.u32 4294901760, %v952_v8 }
  0x90   :  { %889 = vmatprep.subr.mxu1 %v9185_v42  ;;  %v9481_v42 = vsub.f32 %v966_v0, %v9472_v48  ;;  %v9488_v55 = vsub.f32 %v965_v37, %v9477_v27  ;;  %973 = vmatprep.subr.mxu0 %v9477_v27  ;;  %v9570_v0 = vand.u32 4294901760, %v955_v61  ;;  %v9572_v37 = vand.u32 4294901760, %v954_v13 }
  0x91   :  { %891 = vmatpush1.msra.mxu1 %v9204_v15  ;;  %v9483_v15 = vand.u32 4294901760, %v964_v22  ;;  %v1079_v40 = vsub.f32 %v9475_v1, %v13171_v49  ;;  %v13162_v4 = vand.u32 4294901760, %v9520_v30 }
  0x92   :  { %926 = vmatmul.mubr.f32.vlgmr.msra.gmra.mxu1 %v13595_v51  ;;  %v13169_v52 = vand.u32 4294901760, %v9481_v42  ;;  %v13168_v45 = vand.u32 4294901760, %v9488_v55  ;;  %v13159_v51 = vand.u32 4294901760, %v9555_v53  ;;  %v9592_v26 = vsub.f32 %v954_v13, %v9572_v37  ;;  %v949_v13 = vld [vmem:[#allocation2 + $0x258] sm:$0xff] }
  0x93   :  { %1300 = vmatprep.mubr.f32.mxu1 %v13540_v33  ;;  %v9497_v7 = vsub.f32 %v964_v22, %v9483_v15  ;;  %975 = vmatpush1.msra.mxu0 %v9483_v15  ;;  %v1080_v32 = vand.u32 4294901760, %v1079_v40  ;;  %v1115_v23 = vsub.f32 %v9520_v30, %v13162_v4  ;;  %v13157_v22 = vand.u32 4294901760, %v9561_v56 }
  0x94   :  { %977 = vmatprep.subr.mxu0 %v9490_v3  ;;  %v1085_v29 = vsub.f32 %v9481_v42, %v13169_v52  ;;  %v1091_v36 = vsub.f32 %v9488_v55, %v13168_v45  ;;  %v1127_v35 = vsub.f32 %v9555_v53, %v13159_v51  ;;  %v13156_v40 = vand.u32 4294901760, %v9568_v20  ;;  %v941_v52 = vld [vmem:[#allocation2 + $0xd8] sm:$0xff] }
  0x95   :  { %v13167_v19 = vand.u32 4294901760, %v9497_v7  ;;  %979 = vmatpush1.msra.mxu0 %v9492_v9  ;;  %1081 = vmatprep.subr.mxu1 %v1080_v32  ;;  %v1116_v28 = vand.u32 4294901760, %v1115_v23  ;;  %v1133_v32 = vsub.f32 %v9561_v56, %v13157_v22  ;;  %v13155_v12 = vand.u32 4294901760, %v9592_v26  ;;  %v944_v22 = vld [vmem:[#allocation2 + $0x190] sm:$0xff] }
  0x96   :  { %981 = vmatprep.subr.mxu0 %v9499_v57  ;;  %v1086_v60 = vand.u32 4294901760, %v1085_v29  ;;  %v1092_v10 = vand.u32 4294901760, %v1091_v36  ;;  %v9589_v29 = vsub.f32 %v955_v61, %v9570_v0  ;;  %v13154_v36 = vand.u32 4294901760, %v9577_v62 }
  0x97   :  { %v1097_v2 = vsub.f32 %v9497_v7, %v13167_v19  ;;  %983 = vmatpush1.msra.mxu0 %v9501_v39  ;;  %v1128_v6 = vand.u32 4294901760, %v1127_v35  ;;  %v1157_v59 = vsub.f32 %v9592_v26, %v13155_v12  ;;  %v1163_v35 = vsub.f32 %v9600_v46, %v13158_v25  ;;  %v942_v19 = vld [vmem:[#allocation2 + $0x130] sm:$0xff] }
  0x98   :  { %1087 = vmatpush1.msra.mxu1 %v1086_v60  ;;  %985 = vmatprep.subr.mxu0 %v9544_v16  ;;  %v9603_v60 = vsub.f32 %v952_v8, %v9581_v38  ;;  %v13153_v11 = vand.u32 4294901760, %v9589_v29  ;;  %v1145_v23 = vsub.f32 %v9577_v62, %v13154_v36 }
  0x99   :  { %v1098_v18 = vand.u32 4294901760, %v1097_v2  ;;  %1093 = vmatprep.subr.mxu1 %v1092_v10  ;;  %987 = vmatpush1.msra.mxu0 %v9552_v31  ;;  %v951_v2 = vld [vmem:[#allocation2 + $0x2b8] sm:$0xff]  ;;  %v1139_v10 = vsub.f32 %v9568_v20, %v13156_v40  ;;  %v1158_v12 = vand.u32 4294901760, %v1157_v59  ;;  %v1164_v25 = vand.u32 4294901760, %v1163_v35 }
  0x9a   :  { %989 = vmatprep.subr.mxu0 %v9557_v58  ;;  %v13160_v61 = vand.u32 4294901760, %v9603_v60  ;;  %v9624_v8 = vand.u32 4294901760, %v951_v2 }
  0x9b   :  { %1099 = vmatpush1.msra.mxu1 %v1098_v18  ;;  %991 = vmatpush1.msra.mxu0 %v9563_v63  ;;  %v1134_v18 = vand.u32 4294901760, %v1133_v32 }
  0x9c   :  { %1105 = vmatprep.subr.mxu1 %v1104_v43  ;;  %993 = vmatprep.subr.mxu0 %v9570_v0  ;;  %v1140_v43 = vand.u32 4294901760, %v1139_v10  ;;  %v1169_v32 = vsub.f32 %v9603_v60, %v13160_v61  ;;  %v947_v10 = vld [vmem:[#allocation2 + $0x1f8] sm:$0xff]  ;;  %v9635_v40 = vsub.f32 %v951_v2, %v9624_v8 }
  0x9d   :  { %1111 = vmatpush1.msra.mxu1 %v1110_v44  ;;  %995 = vmatpush1.msra.mxu0 %v9572_v37  ;;  %v1151_v44 = vsub.f32 %v9589_v29, %v13153_v11  ;;  %v946_v11 = vld [vmem:[#allocation2 + $0x1f0] sm:$0xff] }
  0x9e   :  { %1117 = vmatprep.subr.mxu1 %v1116_v28  ;;  %997 = vmatprep.subr.mxu0 %v9579_v21  ;;  %v948_v28 = vld [vmem:[#allocation2 + $0x250] sm:$0xff]  ;;  %13598 = vst [vmem:[#allocation9_spill] sm:$0xff] %v9635_v40  ;;  %v1170_v51 = vand.u32 4294901760, %v1169_v32  ;;  %v13164_v2 = vand.u32 4294901760, %v9635_v40  ;;  %v9652_v59 = vand.u32 4294901760, %v946_v11 }
  0x9f   :  { %1123 = vmatpush1.msra.mxu1 %v1122_v50  ;;  %999 = vmatpush1.msra.mxu0 %v9581_v38  ;;  %v1146_v50 = vand.u32 4294901760, %v1145_v23  ;;  %v1152_v36 = vand.u32 4294901760, %v1151_v44  ;;  %v945_v23 = vld [vmem:[#allocation2 + $0x198] sm:$0xff]  ;;  %v9643_v5 = vand.u32 4294901760, %v948_v28  ;;  %v9650_v44 = vand.u32 4294901760, %v947_v10 }
  0xa0   :  { %1129 = vmatprep.subr.mxu1 %v1128_v6  ;;  %v9632_v6 = vand.u32 4294901760, %v950_v17  ;;  %1001 = vmatprep.subr.mxu0 %v9624_v8  ;;  %v9659_v35 = vand.u32 4294901760, %v945_v23  ;;  %v9672_v4 = vsub.f32 %v946_v11, %v9652_v59 }
  0xa1   :  { %1135 = vmatpush1.msra.mxu1 %v1134_v18  ;;  %v9637_v18 = vand.u32 4294901760, %v949_v13 }
  0xa2   :  { %1141 = vmatprep.subr.mxu1 %v1140_v43  ;;  %v9641_v61 = vsub.f32 %v950_v17, %v9632_v6  ;;  %1003 = vmatpush1.msra.mxu0 %v9632_v6  ;;  %13604 = vst [vmem:[#allocation15_spill] sm:$0xff] %v9672_v4  ;;  %v9680_v41 = vsub.f32 %v945_v23, %v9659_v35 }
  0xa3   :  { %1147 = vmatpush1.msra.mxu1 %v1146_v50  ;;  %v9648_v43 = vsub.f32 %v949_v13, %v9637_v18  ;;  %1005 = vmatprep.subr.mxu0 %v9637_v18  ;;  %v9657_v50 = vsub.f32 %v948_v28, %v9643_v5  ;;  %v1175_v13 = vsub.f32 %v9635_v40, %v13164_v2 }
  0xa4   :  { %13599 = vst [vmem:[#allocation10_spill] sm:$0xff] %v9641_v61  ;;  %1153 = vmatprep.subr.mxu1 %v1152_v36  ;;  %v13166_v17 = vand.u32 4294901760, %v9641_v61  ;;  %v9661_v36 = vand.u32 4294901760, %v944_v22  ;;  %1007 = vmatpush1.msra.mxu0 %v9643_v5  ;;  %13605 = vst [vmem:[#allocation16_spill] sm:$0xff] %v9680_v41 }
  0xa5   :  { %13600 = vst [vmem:[#allocation11_spill] sm:$0xff] %v9648_v43  ;;  %1159 = vmatpush1.msra.mxu1 %v1158_v12  ;;  %13601 = vst [vmem:[#allocation12_spill] sm:$0xff] %v9657_v50  ;;  %v13170_v32 = vand.u32 4294901760, %v9648_v43  ;;  %v9669_v12 = vsub.f32 %v947_v10, %v9650_v44  ;;  %1009 = vmatprep.subr.mxu0 %v9650_v44  ;;  %v943_v10 = vld [vmem:[#allocation2 + $0x138] sm:$0xff]  ;;  %v1176_v11 = vand.u32 4294901760, %v1175_v13  ;;  %v13607_v13 = vand.u32 4294901760, %v9680_v41 }
  0xa6   :  { %13602 = vst [vmem:[#allocation13_spill] sm:$0xff] %v9661_v36  ;;  %1165 = vmatprep.subr.mxu1 %v1164_v25  ;;  %v1181_v28 = vsub.f32 %v9641_v61, %v13166_v17  ;;  %v13174_v25 = vand.u32 4294901760, %v9657_v50  ;;  %v9683_v2 = vsub.f32 %v944_v22, %v9661_v36  ;;  %1011 = vmatpush1.msra.mxu0 %v9652_v59  ;;  %v13184_v17 = vand.u32 4294901760, %v9672_v4 }
  0xa7   :  { %13603 = vst [vmem:[#allocation14_spill] sm:$0xff] %v9669_v12  ;;  %1171 = vmatpush1.msra.mxu1 %v1170_v51  ;;  %v1187_v51 = vsub.f32 %v9648_v43, %v13170_v32  ;;  %v13179_v54 = vand.u32 4294901760, %v9669_v12  ;;  %1013 = vmatprep.subr.mxu0 %v9659_v35  ;;  %v9704_v43 = vand.u32 4294901760, %v943_v10  ;;  %v9712_v61 = vand.u32 4294901760, %v942_v19 }
  0xa8   :  { %13606 = vst [vmem:[#allocation20_spill] sm:$0xff] %v9683_v2  ;;  %v1182_v23 = vand.u32 4294901760, %v1181_v28  ;;  %v1193_v22 = vsub.f32 %v9657_v50, %v13174_v25  ;;  %1015 = vmatpush1.msra.mxu0 %v9661_v36  ;;  %1177 = vmatprep.subr.mxu1 %v1176_v11  ;;  %v1205_v28 = vsub.f32 %v9672_v4, %v13184_v17  ;;  %v940_v25 = vld [vmem:[#allocation2 + $0xd0] sm:$0xff]  ;;  %v13608_v11 = vand.u32 4294901760, %v9683_v2 }
  0xa9   :  { %v1188_v32 = vand.u32 4294901760, %v1187_v51  ;;  %v1199_v49 = vsub.f32 %v9669_v12, %v13179_v54  ;;  %v1211_v50 = vsub.f32 %v9680_v41, %v13607_v13  ;;  %v939_v54 = vld [vmem:[#allocation2 + $0x78] sm:$0xff]  ;;  %v938_v12 = vld [vmem:[#allocation2 + $0x70] sm:$0xff]  ;;  %v9715_v4 = vsub.f32 %v943_v10, %v9704_v43  ;;  %1017 = vmatprep.subr.mxu0 %v9704_v43 }
  0xaa   :  { %1183 = vmatpush1.msra.mxu1 %v1182_v23  ;;  %v1194_v45 = vand.u32 4294901760, %v1193_v22  ;;  %v1217_v51 = vsub.f32 %v9683_v2, %v13608_v11  ;;  %v1206_v17 = vand.u32 4294901760, %v1205_v28  ;;  %v9717_v23 = vand.u32 4294901760, %v941_v52  ;;  %v937_v22 = vld [vmem:[#allocation2 + $0x18] sm:$0xff]  ;;  %v936_v36 = vld [vmem:[#allocation2 + $0x10] sm:$0xff]  ;;  %1019 = vmatpush1.msra.mxu0 %v9712_v61 }
  0xab   :  { %1189 = vmatprep.subr.mxu1 %v1188_v32  ;;  %v1200_v40 = vand.u32 4294901760, %v1199_v49  ;;  %13609 = vst [vmem:[#allocation21_spill] sm:$0xff] %v9715_v4  ;;  %v1212_v13 = vand.u32 4294901760, %v1211_v50  ;;  %v9721_v11 = vsub.f32 %v942_v19, %v9712_v61  ;;  %v9723_v2 = vand.u32 4294901760, %v940_v25 }
  0xac   :  { %13610 = vst [vmem:[#allocation22_spill] sm:$0xff] %v9717_v23  ;;  %1195 = vmatpush1.msra.mxu1 %v1194_v45  ;;  %v1218_v41 = vand.u32 4294901760, %v1217_v51  ;;  %v13197_v49 = vand.u32 4294901760, %v9715_v4  ;;  %v9728_v32 = vsub.f32 %v941_v52, %v9717_v23  ;;  %v9730_v10 = vand.u32 4294901760, %v939_v54  ;;  %1021 = vmatprep.subr.mxu0 %v9717_v23 }
  0xad   :  { %13611 = vst [vmem:[#allocation24_spill] sm:$0xff] %v9721_v11  ;;  %13612 = vst [vmem:[#allocation26_spill] sm:$0xff] %v9723_v2  ;;  %1201 = vmatprep.subr.mxu1 %v1200_v40  ;;  %v9732_v28 = vand.u32 4294901760, %v938_v12  ;;  %v9737_v19 = vsub.f32 %v940_v25, %v9723_v2  ;;  %v9739_v50 = vand.u32 4294901760, %v937_v22  ;;  %v9741_v40 = vand.u32 4294901760, %v936_v36  ;;  %1023 = vmatpush1.msra.mxu0 %v9723_v2 }
  0xae   :  { %13613 = vst [vmem:[#allocation17_spill] sm:$0xff] %v9728_v32  ;;  %1207 = vmatpush1.msra.mxu1 %v1206_v17  ;;  %v1223_v52 = vsub.f32 %v9715_v4, %v13197_v49  ;;  %v13202_v51 = vand.u32 4294901760, %v9728_v32  ;;  %v9749_v17 = vsub.f32 %v939_v54, %v9730_v10  ;;  %1025 = vmatprep.subr.mxu0 %v9730_v10  ;;  %v13618_v25 = vand.u32 4294901760, %v9721_v11 }
  0xaf   :  { %13614 = vst [vmem:[#allocation18_spill] sm:$0xff] %v9737_v19  ;;  %13615 = vst [vmem:[#allocation27_spill] sm:$0xff] %v9741_v40  ;;  %1213 = vmatprep.subr.mxu1 %v1212_v13  ;;  %v9752_v45 = vsub.f32 %v938_v12, %v9732_v28  ;;  %v13203_v13 = vand.u32 4294901760, %v9737_v19  ;;  %v9760_v23 = vsub.f32 %v937_v22, %v9739_v50  ;;  %1027 = vmatpush1.msra.mxu0 %v9732_v28 }
  0xb0   :  { %13616 = vst [vmem:[#allocation19_spill] sm:$0xff] %v9749_v17  ;;  %1219 = vmatpush1.msra.mxu1 %v1218_v41  ;;  %v1229_v2 = vsub.f32 %v9721_v11, %v13618_v25  ;;  %v9763_v49 = vsub.f32 %v936_v36, %v9741_v40  ;;  %v1224_v54 = vand.u32 4294901760, %v1223_v52  ;;  %v1235_v12 = vsub.f32 %v9728_v32, %v13202_v51 }
  0xb1   :  { %13617 = vst [vmem:[#allocation25_spill] sm:$0xff] %v9752_v45  ;;  %13619 = vst [vmem:[#allocation28_spill] sm:$0xff] %v9760_v23  ;;  %v13208_v41 = vand.u32 4294901760, %v9749_v17  ;;  %v13211_v4 = vand.u32 4294901760, %v9752_v45  ;;  %1029 = vmatprep.subr.mxu0 %v9739_v50  ;;  %v1241_v22 = vsub.f32 %v9737_v19, %v13203_v13  ;;  %v13212_v36 = vand.u32 4294901760, %v9760_v23 }
  0xb2   :  { %13620 = vst [vmem:[#allocation29_spill] sm:$0xff] %v9763_v49  ;;  %v1230_v25 = vand.u32 4294901760, %v1229_v2  ;;  %1031 = vmatpush1.msra.mxu0 %v9741_v40  ;;  %1225 = vmatprep.subr.mxu1 %v1224_v54  ;;  %v1236_v52 = vand.u32 4294901760, %v1235_v12  ;;  %v13621_v19 = vand.u32 4294901760, %v9763_v49 }
  0xb3   :  { %v1247_v51 = vsub.f32 %v9749_v17, %v13208_v41  ;;  %v1253_v2 = vsub.f32 %v9752_v45, %v13211_v4  ;;  %1310 = vmatprep.subr.mxu0 %v9475_v1  ;;  %v1242_v13 = vand.u32 4294901760, %v1241_v22  ;;  %v1259_v11 = vsub.f32 %v9760_v23, %v13212_v36 }
  0xb4   :  { %1231 = vmatpush1.msra.mxu1 %v1230_v25  ;;  %v1265_v54 = vsub.f32 %v9763_v49, %v13621_v19 }
  0xb5   :  { %1237 = vmatprep.subr.mxu1 %v1236_v52  ;;  %v1248_v12 = vand.u32 4294901760, %v1247_v51  ;;  %v1254_v32 = vand.u32 4294901760, %v1253_v2  ;;  %v1260_v41 = vand.u32 4294901760, %v1259_v11 }
  0xb6   :  { %1243 = vmatpush1.msra.mxu1 %v1242_v13  ;;  %v1266_v17 = vand.u32 4294901760, %v1265_v54 }
  0xb7   :  { %1249 = vmatprep.subr.mxu1 %v1248_v12 }
  0xb8   :  { %1255 = vmatpush1.msra.mxu1 %v1254_v32 }
  0xb9   :  { %1261 = vmatprep.subr.mxu1 %v1260_v41 }
  0xba   :  { %1267 = vmatpush1.msra.mxu1 %v1266_v17 }
  0xbb   :  { %1446 = vmatprep.subr.mxu1 %v9470_v14 }
 0x107   :  { %v180_v25 = vpop.f32.mrf.mxu0 }
 0x109   :  { %v182_v4 = vpop.f32.mrf.mxu0 }
 0x10e   :  { %v412_v22 = vpop.f32.mrf.mxu1 }
 0x10f   :  { %v413_v11 = vadd.f32 %v412_v22, %v180_v25  ;;  %v13627_v25 = vld [vmem:[#allocation11_spill] sm:$0xff]  ;;  %v13628_v22 = vld [vmem:[#allocation22_spill] sm:$0xff] }
 0x110   :  { %v414_v36 = vpop.f32.mrf.mxu1 }
 0x111   :  { %v415_v1 = vadd.f32 %v414_v36, %v182_v4  ;;  %v13626_v36 = vld [vmem:[#allocation10_spill] sm:$0xff] }
 0x128   :  { %v549_v23 = vpop.f32.mrf.mxu0 }
 0x129   :  { %v550_v13 = vadd.f32 %v549_v23, %v413_v11  ;;  %v13632_v11 = vld [vmem:[#allocation15_spill] sm:$0xff] }
 0x12a   :  { %v551_v45 = vpop.f32.mrf.mxu0 }
 0x12b   :  { %v552_v19 = vadd.f32 %v551_v45, %v415_v1  ;;  %v13625_v45 = vld [vmem:[#allocation9_spill] sm:$0xff] }
 0x130   :  { %v655_v52 = vpop.f32.mrf.mxu1 }
 0x131   :  { %v656_v32 = vadd.f32 %v655_v52, %v550_v13  ;;  %v13630_v52 = vld [vmem:[#allocation26_spill] sm:$0xff]  ;;  %v13633_v13 = vld [vmem:[#allocation16_spill] sm:$0xff] }
 0x132   :  { %v657_v51 = vpop.f32.mrf.mxu1 }
 0x133   :  { %v9792_v2 = vadd.f32 %v657_v51, %v552_v19  ;;  %v13629_v19 = vld [vmem:[#allocation12_spill] sm:$0xff]  ;;  %v13631_v51 = vld [vmem:[#allocation14_spill] sm:$0xff] }
 0x135   :  { %13622 = vst [vmem:[#allocation30_spill] sm:$0xff] %v9792_v2  ;;  %v13641_v2 = vld [vmem:[#allocation19_spill] sm:$0xff] }
 0x149   :  { %v823_v54 = vpop.f32.mrf.mxu0 }
 0x14a   :  { %v824_v41 = vadd.f32 %v823_v54, %v656_v32  ;;  %v13634_v54 = vld [vmem:[#allocation20_spill] sm:$0xff]  ;;  %v13635_v32 = vld [vmem:[#allocation27_spill] sm:$0xff] }
 0x152   :  { %v927_v17 = vpop.f32.mrf.mxu1 }
 0x153   :  { %v928_v12 = vadd.f32 %v927_v17, %v824_v41  ;;  %v13636_v41 = vld [vmem:[#allocation21_spill] sm:$0xff]  ;;  %v13637_v17 = vld [vmem:[#allocation8_spill] sm:$0xff] }
 0x155   :  { %v932_v49 = vmul.f32 0.01, %v928_v12 }
 0x157   :  { %v933_v14 = vmax.f32 %v928_v12, %v932_v49  ;;  %v13624_v49 = vld [vmem:[#allocation13_spill] sm:$0xff]  ;;  %v13638_v12 = vld [vmem:[#allocation24_spill] sm:$0xff] }
 0x159   :  { %v9794_v40 = vand.u32 4294901760, %v933_v14 }
 0x15b   :  { %13623 = vst [vmem:[#allocation31_spill] sm:$0xff] %v9794_v40  ;;  %v9797_v4 = vsub.f32 %v933_v14, %v9794_v40  ;;  %1302 = vmatmul.mubr.f32.vlgmr.msra.gmra.mxu1 %v9794_v40  ;;  %v1871_v40 = vld [vmem:[#allocation2 + $0x5c8] sm:$0xff] }
 0x15c   :  { %1448 = vmatpush1.msra.mxu1 %v9472_v48  ;;  %1541 = vmatprep.mubr.f32.mxu1 %v13540_v33 }
 0x15d   :  { %v1067_v1 = vand.u32 4294901760, %v9797_v4  ;;  %1450 = vmatprep.subr.mxu1 %v9477_v27 }
 0x15e   :  { %1452 = vmatpush1.msra.mxu1 %v9483_v15 }
 0x15f   :  { %1454 = vmatprep.subr.mxu1 %v9490_v3  ;;  %v1068_v23 = vsub.f32 %v9797_v4, %v1067_v1 }
 0x160   :  { %1456 = vmatpush1.msra.mxu1 %v9492_v9 }
 0x161   :  { %1458 = vmatprep.subr.mxu1 %v9499_v57  ;;  %v1069_v14 = vand.u32 4294901760, %v1068_v23  ;;  %v13639_v23 = vld [vmem:[#allocation17_spill] sm:$0xff] }
 0x162   :  { %1460 = vmatpush1.msra.mxu1 %v9501_v39 }
 0x163   :  { %1462 = vmatprep.subr.mxu1 %v9544_v16  ;;  %1070 = vmatmul.mubr.f32.vlgmr.msra.gmra.mxu0 %v1069_v14  ;;  %v13640_v14 = vld [vmem:[#allocation18_spill] sm:$0xff] }
 0x164   :  { %1313 = vmatpush1.msra.mxu0 %v9481_v42  ;;  %1464 = vmatpush1.msra.mxu1 %v9552_v31 }
 0x165   :  { %1316 = vmatprep.subr.mxu0 %v9488_v55  ;;  %1466 = vmatprep.subr.mxu1 %v9557_v58 }
 0x166   :  { %1319 = vmatpush1.msra.mxu0 %v9497_v7  ;;  %1468 = vmatpush1.msra.mxu1 %v9563_v63 }
 0x167   :  { %1322 = vmatprep.subr.mxu0 %v9509_v47  ;;  %1470 = vmatprep.subr.mxu1 %v9570_v0 }
 0x168   :  { %1325 = vmatpush1.msra.mxu0 %v9512_v34  ;;  %1472 = vmatpush1.msra.mxu1 %v9572_v37 }
 0x169   :  { %1328 = vmatprep.subr.mxu0 %v9520_v30  ;;  %1474 = vmatprep.subr.mxu1 %v9579_v21 }
 0x16a   :  { %1331 = vmatpush1.msra.mxu0 %v9523_v24  ;;  %1476 = vmatpush1.msra.mxu1 %v9581_v38 }
 0x16b   :  { %1334 = vmatprep.subr.mxu0 %v9555_v53  ;;  %1478 = vmatprep.subr.mxu1 %v9624_v8 }
 0x16c   :  { %1337 = vmatpush1.msra.mxu0 %v9561_v56  ;;  %1480 = vmatpush1.msra.mxu1 %v9632_v6 }
 0x16d   :  { %1340 = vmatprep.subr.mxu0 %v9568_v20  ;;  %1482 = vmatprep.subr.mxu1 %v9637_v18 }
 0x16e   :  { %1343 = vmatpush1.msra.mxu0 %v9577_v62  ;;  %1484 = vmatpush1.msra.mxu1 %v9643_v5 }
 0x16f   :  { %1346 = vmatprep.subr.mxu0 %v9589_v29  ;;  %1486 = vmatprep.subr.mxu1 %v9650_v44 }
 0x170   :  { %1349 = vmatpush1.msra.mxu0 %v9592_v26  ;;  %1488 = vmatpush1.msra.mxu1 %v9652_v59 }
 0x171   :  { %1352 = vmatprep.subr.mxu0 %v9600_v46  ;;  %1490 = vmatprep.subr.mxu1 %v9659_v35 }
 0x172   :  { %1355 = vmatpush1.msra.mxu0 %v9603_v60  ;;  %1492 = vmatpush1.msra.mxu1 %v13624_v49 }
 0x173   :  { %1358 = vmatprep.subr.mxu0 %v13625_v45  ;;  %1494 = vmatprep.subr.mxu1 %v9704_v43 }
 0x174   :  { %1361 = vmatpush1.msra.mxu0 %v13626_v36  ;;  %1496 = vmatpush1.msra.mxu1 %v9712_v61 }
 0x175   :  { %1364 = vmatprep.subr.mxu0 %v13627_v25  ;;  %1498 = vmatprep.subr.mxu1 %v13628_v22 }
 0x176   :  { %1367 = vmatpush1.msra.mxu0 %v13629_v19  ;;  %1500 = vmatpush1.msra.mxu1 %v13630_v52 }
 0x177   :  { %1370 = vmatprep.subr.mxu0 %v13631_v51  ;;  %1502 = vmatprep.subr.mxu1 %v9730_v10 }
 0x178   :  { %1373 = vmatpush1.msra.mxu0 %v13632_v11  ;;  %1504 = vmatpush1.msra.mxu1 %v9732_v28 }
 0x179   :  { %1376 = vmatprep.subr.mxu0 %v13633_v13  ;;  %1506 = vmatprep.subr.mxu1 %v9739_v50 }
 0x17a   :  { %1379 = vmatpush1.msra.mxu0 %v13634_v54  ;;  %1508 = vmatpush1.msra.mxu1 %v13635_v32 }
 0x17b   :  { %1382 = vmatprep.subr.mxu0 %v13636_v41  ;;  %1545 = vmatmul.mubr.f32.vlgmr.msra.gmra.mxu1 %v1067_v1  ;;  %v13642_v1 = vld [vmem:[#allocation25_spill] sm:$0xff] }
 0x17c   :  { %1720 = vmatprep.subr.mxu1 %v13637_v17  ;;  %1385 = vmatpush1.msra.mxu0 %v13638_v12  ;;  %v13643_v17 = vld [vmem:[#allocation28_spill] sm:$0xff] }
 0x17d   :  { %1722 = vmatpush1.msra.mxu1 %v9472_v48  ;;  %1388 = vmatprep.subr.mxu0 %v13639_v23  ;;  %v13644_v48 = vld [vmem:[#allocation29_spill] sm:$0xff] }
 0x17e   :  { %1724 = vmatprep.subr.mxu1 %v9477_v27  ;;  %1391 = vmatpush1.msra.mxu0 %v13640_v14  ;;  %v9872_v27 = vand.u32 4294901760, %v1871_v40 }
 0x17f   :  { %1726 = vmatpush1.msra.mxu1 %v9483_v15  ;;  %1394 = vmatprep.subr.mxu0 %v13641_v2  ;;  %v1870_v15 = vld [vmem:[#allocation2 + $0x5c0] sm:$0xff] }
 0x180   :  { %1728 = vmatprep.subr.mxu1 %v9490_v3  ;;  %1397 = vmatpush1.msra.mxu0 %v13642_v1  ;;  %v13645_v3 = vld [vmem:[#allocation23_spill] sm:$0xff]  ;;  %v1868_v1 = vld [vmem:[#allocation2 + $0x568] sm:$0xff] }
 0x181   :  { %1730 = vmatpush1.msra.mxu1 %v9492_v9  ;;  %1400 = vmatprep.subr.mxu0 %v13643_v17  ;;  %v13646_v2 = vand.u32 4294901760, %v13645_v3  ;;  %v13647_v9 = vand.u32 4294901760, %v9481_v42  ;;  %v13651_v42 = vand.u32 4294901760, %v9509_v47  ;;  %v1864_v3 = vld [vmem:[#allocation2 + $0x500] sm:$0xff]  ;;  %v1862_v47 = vld [vmem:[#allocation2 + $0x4a8] sm:$0xff] }
 0x182   :  { %1732 = vmatprep.subr.mxu1 %v9499_v57  ;;  %1403 = vmatpush1.msra.mxu0 %v13644_v48  ;;  %v13648_v57 = vand.u32 4294901760, %v9488_v55  ;;  %v9886_v48 = vsub.f32 %v1871_v40, %v9872_v27  ;;  %v1865_v55 = vld [vmem:[#allocation2 + $0x508] sm:$0xff] }
 0x183   :  { %1436 = vmatprep.mubr.f32.mxu0 %v13540_v33  ;;  %1734 = vmatpush1.msra.mxu1 %v9501_v39  ;;  %v9888_v39 = vand.u32 4294901760, %v1870_v15 }
 0x184   :  { %1439 = vmatmul.mubr.f32.vlgmr.msra.gmra.mxu0 %v9797_v4  ;;  %1554 = vmatprep.subr.mxu0 %v13646_v2  ;;  %13649 = vst [vmem:[#allocation13_spill] sm:$0xff] %v9886_v48  ;;  %v1867_v4 = vld [vmem:[#allocation2 + $0x560] sm:$0xff]  ;;  %v13650_v2 = vand.u32 4294901760, %v9497_v7  ;;  %v13653_v7 = vand.u32 4294901760, %v9520_v30  ;;  %v13657_v30 = vand.u32 4294901760, %v9555_v53 }
 0x185   :  { %1736 = vmatprep.subr.mxu1 %v9544_v16  ;;  %1558 = vmatpush1.msra.mxu0 %v13647_v9  ;;  %v9893_v16 = vand.u32 4294901760, %v1868_v1  ;;  %v9901_v40 = vand.u32 4294901760, %v1867_v4  ;;  %v9916_v9 = vand.u32 4294901760, %v1865_v55 }
 0x186   :  { %1738 = vmatpush1.msra.mxu1 %v9552_v31  ;;  %1562 = vmatprep.subr.mxu0 %v13648_v57  ;;  %v13652_v31 = vand.u32 4294901760, %v9512_v34  ;;  %v9921_v57 = vand.u32 4294901760, %v1864_v3 }
 0x187   :  { %1740 = vmatprep.subr.mxu1 %v9557_v58  ;;  %1566 = vmatpush1.msra.mxu0 %v13650_v2  ;;  %v13226_v58 = vand.u32 4294901760, %v9886_v48  ;;  %v9914_v34 = vsub.f32 %v1868_v1, %v9893_v16  ;;  %v9929_v1 = vand.u32 4294901760, %v1862_v47  ;;  %v1858_v2 = vld [vmem:[#allocation2 + $0x440] sm:$0xff] }
 0x188   :  { %1742 = vmatpush1.msra.mxu1 %v9563_v63  ;;  %1570 = vmatprep.subr.mxu0 %v13651_v42  ;;  %v9908_v63 = vsub.f32 %v1870_v15, %v9888_v39  ;;  %v1859_v15 = vld [vmem:[#allocation2 + $0x448] sm:$0xff] }
 0x189   :  { %1744 = vmatprep.subr.mxu1 %v9570_v0  ;;  %1574 = vmatpush1.msra.mxu0 %v13652_v31  ;;  %v13655_v0 = vand.u32 4294901760, %v9523_v24  ;;  %13656 = vst [vmem:[#allocation10_spill] sm:$0xff] %v9914_v34  ;;  %v9927_v24 = vsub.f32 %v1867_v4, %v9901_v40  ;;  %v9937_v53 = vsub.f32 %v9886_v48, %v13226_v58  ;;  %v1856_v42 = vld [vmem:[#allocation2 + $0x3e8] sm:$0xff]  ;;  %v13661_v4 = vand.u32 4294901760, %v9577_v62 }
 0x18a   :  { %1746 = vmatpush1.msra.mxu1 %v9572_v37  ;;  %1578 = vmatprep.subr.mxu0 %v13653_v7  ;;  %13654 = vst [vmem:[#allocation9_spill] sm:$0xff] %v9908_v63  ;;  %v1861_v37 = vld [vmem:[#allocation2 + $0x4a0] sm:$0xff]  ;;  %v9949_v31 = vand.u32 4294901760, %v1859_v15  ;;  %v1853_v62 = vld [vmem:[#allocation2 + $0x388] sm:$0xff] }
 0x18b   :  { %1748 = vmatprep.subr.mxu1 %v9579_v21  ;;  %1582 = vmatpush1.msra.mxu0 %v13655_v0  ;;  %v13658_v21 = vand.u32 4294901760, %v9561_v56  ;;  %13659 = vst [vmem:[#allocation11_spill] sm:$0xff] %v9927_v24  ;;  %v9940_v56 = vand.u32 4294901760, %v1861_v37  ;;  %v1855_v7 = vld [vmem:[#allocation2 + $0x3e0] sm:$0xff]  ;;  %v13663_v0 = vand.u32 4294901760, %v9589_v29  ;;  %v1847_v58 = vld [vmem:[#allocation2 + $0x2c8] sm:$0xff] }
 0x18c   :  { %1750 = vmatpush1.msra.mxu1 %v9581_v38  ;;  %1586 = vmatprep.subr.mxu0 %v13657_v30  ;;  %v13660_v38 = vand.u32 4294901760, %v9568_v20  ;;  %v9947_v20 = vsub.f32 %v1865_v55, %v9916_v9  ;;  %v9955_v30 = vsub.f32 %v1864_v3, %v9921_v57  ;;  %v13228_v55 = vand.u32 4294901760, %v9927_v24  ;;  %v1852_v29 = vld [vmem:[#allocation2 + $0x380] sm:$0xff] }
 0x18d   :  { %1752 = vmatprep.subr.mxu1 %v9624_v8  ;;  %1590 = vmatpush1.msra.mxu0 %v13658_v21  ;;  %v13225_v8 = vand.u32 4294901760, %v9908_v63  ;;  %v13665_v21 = vand.u32 4294901760, %v9592_v26  ;;  %v13667_v3 = vand.u32 4294901760, %v9600_v46 }
 0x18e   :  { %1754 = vmatpush1.msra.mxu1 %v9632_v6  ;;  %1594 = vmatprep.subr.mxu0 %v13660_v38  ;;  %v13227_v6 = vand.u32 4294901760, %v9914_v34  ;;  %13662 = vst [vmem:[#allocation22_spill] sm:$0xff] %v9947_v20  ;;  %13664 = vst [vmem:[#allocation12_spill] sm:$0xff] %v9955_v30  ;;  %v9964_v38 = vsub.f32 %v1862_v47, %v9929_v1  ;;  %v9980_v47 = vand.u32 4294901760, %v1855_v7 }
 0x18f   :  { %1756 = vmatprep.subr.mxu1 %v9637_v18  ;;  %1598 = vmatpush1.msra.mxu0 %v13661_v4  ;;  %v9957_v18 = vand.u32 4294901760, %v1858_v2  ;;  %v1850_v4 = vld [vmem:[#allocation2 + $0x328] sm:$0xff]  ;;  %v9975_v26 = vsub.f32 %v9908_v63, %v13225_v8  ;;  %v9992_v8 = vsub.f32 %v1859_v15, %v9949_v31  ;;  %v13673_v15 = vand.u32 4294901760, %v13626_v36 }
 0x190   :  { %1758 = vmatpush1.msra.mxu1 %v9643_v5  ;;  %1602 = vmatprep.subr.mxu0 %v13663_v0  ;;  %13666 = vst [vmem:[#allocation26_spill] sm:$0xff] %v9964_v38  ;;  %v9966_v5 = vand.u32 4294901760, %v1856_v42  ;;  %v9988_v46 = vsub.f32 %v9914_v34, %v13227_v6  ;;  %v10003_v6 = vand.u32 4294901760, %v1852_v29  ;;  %v10005_v0 = vand.u32 4294901760, %v1850_v4 }
 0x191   :  { %1760 = vmatprep.subr.mxu1 %v9650_v44  ;;  %1606 = vmatpush1.msra.mxu0 %v13665_v21  ;;  %v9978_v44 = vsub.f32 %v1861_v37, %v9940_v56  ;;  %v1849_v21 = vld [vmem:[#allocation2 + $0x320] sm:$0xff]  ;;  %13670 = vst [vmem:[#allocation15_spill] sm:$0xff] %v9992_v8  ;;  %v9994_v37 = vand.u32 4294901760, %v1853_v62 }
 0x192   :  { %1762 = vmatpush1.msra.mxu1 %v9652_v59  ;;  %1610 = vmatprep.subr.mxu0 %v13667_v3  ;;  %v13669_v59 = vand.u32 4294901760, %v9603_v60  ;;  %v13229_v3 = vand.u32 4294901760, %v9947_v20  ;;  %v13675_v60 = vand.u32 4294901760, %v13627_v25  ;;  %v13231_v25 = vand.u32 4294901760, %v9992_v8 }
 0x193   :  { %13668 = vst [vmem:[#allocation14_spill] sm:$0xff] %v9978_v44  ;;  %1764 = vmatprep.subr.mxu1 %v9659_v35  ;;  %v13671_v35 = vand.u32 4294901760, %v13625_v45  ;;  %v13230_v36 = vand.u32 4294901760, %v9978_v44  ;;  %v1997_v45 = vand.u32 4294901760, %v9988_v46  ;;  %1815 = vmatprep.mubr.f32.mxu1 %v13540_v33 }
 0x194   :  { %1614 = vmatpush1.msra.mxu0 %v13669_v59  ;;  %1766 = vmatpush1.msra.mxu1 %v13624_v49  ;;  %v10001_v59 = vsub.f32 %v1858_v2, %v9957_v18  ;;  %v10013_v49 = vsub.f32 %v9927_v24, %v13228_v55  ;;  %v10019_v2 = vand.u32 4294901760, %v1849_v21  ;;  %v10029_v55 = vand.u32 4294901760, %v1847_v58 }
 0x195   :  { %1618 = vmatprep.subr.mxu0 %v13671_v35  ;;  %1768 = vmatprep.subr.mxu1 %v9704_v43  ;;  %v10017_v35 = vsub.f32 %v1856_v42, %v9966_v5  ;;  %v1991_v43 = vand.u32 4294901760, %v9975_v26  ;;  %v13677_v42 = vand.u32 4294901760, %v13629_v19  ;;  %v10042_v26 = vsub.f32 %v1853_v62, %v9994_v37  ;;  %v1844_v62 = vld [vmem:[#allocation2 + $0x268] sm:$0xff] }
 0x196   :  { %13672 = vst [vmem:[#allocation16_spill] sm:$0xff] %v10001_v59  ;;  %1622 = vmatpush1.msra.mxu0 %v13673_v15  ;;  %1770 = vmatpush1.msra.mxu1 %v9712_v61  ;;  %v10027_v15 = vsub.f32 %v1855_v7, %v9980_v47  ;;  %v10038_v61 = vsub.f32 %v9947_v20, %v13229_v3  ;;  %v1846_v7 = vld [vmem:[#allocation2 + $0x2c0] sm:$0xff]  ;;  %v13680_v19 = vand.u32 4294901760, %v9955_v30 }
 0x197   :  { %13674 = vst [vmem:[#allocation20_spill] sm:$0xff] %v10017_v35  ;;  %1626 = vmatprep.subr.mxu0 %v13675_v60  ;;  %1772 = vmatprep.subr.mxu1 %v13628_v22  ;;  %13678 = vst [vmem:[#allocation21_spill] sm:$0xff] %v10042_v26  ;;  %v13679_v22 = vand.u32 4294901760, %v13631_v51  ;;  %v10057_v3 = vsub.f32 %v1850_v4, %v10005_v0  ;;  %v2003_v51 = vand.u32 4294901760, %v10013_v49  ;;  %v13236_v60 = vand.u32 4294901760, %v10017_v35 }
 0x198   :  { %13676 = vst [vmem:[#allocation27_spill] sm:$0xff] %v10027_v15  ;;  %1630 = vmatpush1.msra.mxu0 %v13677_v42  ;;  %1774 = vmatpush1.msra.mxu1 %v13630_v52  ;;  %v10050_v46 = vsub.f32 %v9955_v30, %v13680_v19  ;;  %v10054_v42 = vsub.f32 %v1852_v29, %v10003_v6  ;;  %v13683_v52 = vand.u32 4294901760, %v13632_v11  ;;  %v13686_v4 = vand.u32 4294901760, %v13633_v13  ;;  %v13691_v11 = vld [vmem:[#allocation31_spill] sm:$0xff]  ;;  %v929_v30 = vpop.f32.mrf.mxu1 }
 0x199   :  { %1634 = vmatprep.subr.mxu0 %v13679_v22  ;;  %13682 = vst [vmem:[#allocation24_spill] sm:$0xff] %v10057_v3  ;;  %1776 = vmatprep.subr.mxu1 %v9730_v10  ;;  %v13684_v22 = vand.u32 4294901760, %v9964_v38  ;;  %v10070_v29 = vsub.f32 %v1849_v21, %v10019_v2  ;;  %v10078_v10 = vsub.f32 %v9978_v44, %v13230_v36  ;;  %v2009_v13 = vand.u32 4294901760, %v10038_v61  ;;  %v1840_v61 = vld [vmem:[#allocation2 + $0x200] sm:$0xff] }
 0x19a   :  { %13681 = vst [vmem:[#allocation8_spill] sm:$0xff] %v10054_v42  ;;  %1638 = vmatpush1.msra.mxu0 %v13683_v52  ;;  %1778 = vmatpush1.msra.mxu1 %v9732_v28  ;;  %v10082_v49 = vsub.f32 %v1847_v58, %v10029_v55  ;;  %v10084_v52 = vand.u32 4294901760, %v1846_v7  ;;  %v13688_v28 = vand.u32 4294901760, %v13634_v54  ;;  %v10093_v21 = vsub.f32 %v9992_v8, %v13231_v25  ;;  %v1841_v25 = vld [vmem:[#allocation2 + $0x208] sm:$0xff] }
 0x19b   :  { %v10066_v19 = vsub.f32 %v9964_v38, %v13684_v22  ;;  %13685 = vst [vmem:[#allocation17_spill] sm:$0xff] %v10070_v29  ;;  %1642 = vmatprep.subr.mxu0 %v13686_v4  ;;  %v1843_v22 = vld [vmem:[#allocation2 + $0x260] sm:$0xff]  ;;  %1780 = vmatprep.subr.mxu1 %v9739_v50  ;;  %v10096_v36 = vand.u32 4294901760, %v1844_v62  ;;  %v2015_v50 = vand.u32 4294901760, %v10050_v46  ;;  %v13689_v54 = vand.u32 4294901760, %v10001_v59 }
 0x19c   :  { %13687 = vst [vmem:[#allocation18_spill] sm:$0xff] %v10082_v49  ;;  %1646 = vmatpush1.msra.mxu0 %v13688_v28  ;;  %1782 = vmatpush1.msra.mxu1 %v13635_v32  ;;  %v13690_v4 = vand.u32 4294901760, %v13636_v41  ;;  %v10115_v46 = vsub.f32 %v10017_v35, %v13236_v60  ;;  %v13693_v28 = vand.u32 4294901760, %v9937_v53  ;;  %v13694_v41 = vand.u32 4294901760, %v13638_v12  ;;  %v1838_v35 = vld [vmem:[#allocation2 + $0x1a8] sm:$0xff]  ;;  %v1837_v60 = vld [vmem:[#allocation2 + $0x1a0] sm:$0xff] }
 0x19d   :  { %v10104_v58 = vsub.f32 %v10001_v59, %v13689_v54  ;;  %1817 = vmatmul.mubr.f32.vlgmr.msra.gmra.mxu1 %v13691_v11  ;;  %v2021_v32 = vand.u32 4294901760, %v10066_v19  ;;  %v10118_v59 = vand.u32 4294901760, %v1843_v22  ;;  %v13695_v19 = vand.u32 4294901760, %v10027_v15  ;;  %1711 = vmatprep.mubr.f32.mxu0 %v13540_v33 }
 0x19e   :  { %1650 = vmatprep.subr.mxu0 %v13690_v4  ;;  %1986 = vmatprep.subr.mxu1 %v13693_v28  ;;  %v2027_v4 = vand.u32 4294901760, %v10078_v10  ;;  %v10132_v54 = vsub.f32 %v1846_v7, %v10084_v52  ;;  %v13697_v53 = vand.u32 4294901760, %v13639_v23  ;;  %v2033_v12 = vand.u32 4294901760, %v10093_v21 }
 0x19f   :  { %13692 = vst [vmem:[#allocation28_spill] sm:$0xff] %v10118_v59  ;;  %1654 = vmatpush1.msra.mxu0 %v13694_v41  ;;  %v10128_v8 = vsub.f32 %v10027_v15, %v13695_v19  ;;  %1992 = vmatpush1.msra.mxu1 %v1991_v43  ;;  %v13698_v28 = vand.u32 4294901760, %v10042_v26  ;;  %v10143_v41 = vsub.f32 %v1844_v62, %v10096_v36  ;;  %v10145_v19 = vand.u32 4294901760, %v1841_v25 }
 0x1a0   :  { %13696 = vst [vmem:[#allocation23_spill] sm:$0xff] %v10132_v54  ;;  %1658 = vmatprep.subr.mxu0 %v13697_v53  ;;  %1998 = vmatprep.subr.mxu1 %v1997_v45  ;;  %v13699_v7 = vand.u32 4294901760, %v13640_v14  ;;  %v2039_v23 = vand.u32 4294901760, %v10104_v58  ;;  %v13700_v43 = vand.u32 4294901760, %v10054_v42  ;;  %v13701_v53 = vand.u32 4294901760, %v10057_v3  ;;  %v13702_v45 = vld [vmem:[#allocation19_spill] sm:$0xff] }
 0x1a1   :  { %v10140_v10 = vsub.f32 %v10042_v26, %v13698_v28  ;;  %v10160_v62 = vand.u32 4294901760, %v1840_v61  ;;  %v1835_v26 = vld [vmem:[#allocation2 + $0x148] sm:$0xff]  ;;  %2004 = vmatpush1.msra.mxu1 %v2003_v51  ;;  %v13703_v15 = vand.u32 4294901760, %v13702_v45  ;;  %v2045_v14 = vand.u32 4294901760, %v10115_v46  ;;  %2205 = vmatprep.mubr.f32.mxu1 %v13540_v33 }
 0x1a2   :  { %1662 = vmatpush1.msra.mxu0 %v13699_v7  ;;  %v10153_v21 = vsub.f32 %v10054_v42, %v13700_v43  ;;  %v10158_v28 = vsub.f32 %v10057_v3, %v13701_v53  ;;  %v13704_v58 = vand.u32 4294901760, %v10070_v29  ;;  %v10171_v43 = vsub.f32 %v1843_v22, %v10118_v59  ;;  %v1834_v53 = vld [vmem:[#allocation2 + $0x140] sm:$0xff]  ;;  %2010 = vmatprep.subr.mxu1 %v2009_v13  ;;  %v13707_v3 = vld [vmem:[#allocation25_spill] sm:$0xff] }
 0x1a3   :  { %1666 = vmatprep.subr.mxu0 %v13703_v15  ;;  %v10173_v42 = vand.u32 4294901760, %v1838_v35  ;;  %v13708_v44 = vand.u32 4294901760, %v13707_v3  ;;  %v2051_v51 = vand.u32 4294901760, %v10128_v8  ;;  %v13709_v15 = vand.u32 4294901760, %v10082_v49  ;;  %v1832_v22 = vld [vmem:[#allocation2 + $0xe8] sm:$0xff]  ;;  %2016 = vmatpush1.msra.mxu1 %v2015_v50 }
 0x1a4   :  { %v10168_v7 = vsub.f32 %v10070_v29, %v13704_v58  ;;  %13705 = vst [vmem:[#allocation31_spill] sm:$0xff] %v10171_v43  ;;  %v10184_v58 = vand.u32 4294901760, %v1837_v60  ;;  %v13710_v29 = vand.u32 4294901760, %v13643_v17  ;;  %v2057_v13 = vand.u32 4294901760, %v10140_v10  ;;  %2022 = vmatprep.subr.mxu1 %v2021_v32  ;;  %v1829_v10 = vld [vmem:[#allocation2 + $0x88] sm:$0xff] }
 0x1a5   :  { %13706 = vst [vmem:[#allocation19_spill] sm:$0xff] %v10173_v42  ;;  %1670 = vmatpush1.msra.mxu0 %v13708_v44  ;;  %v10181_v46 = vsub.f32 %v10082_v49, %v13709_v15  ;;  %v10191_v8 = vsub.f32 %v1841_v25, %v10145_v19  ;;  %v10193_v3 = vand.u32 4294901760, %v1835_v26  ;;  %v1831_v15 = vld [vmem:[#allocation2 + $0xe0] sm:$0xff]  ;;  %v13712_v49 = vld [vmem:[#allocation29_spill] sm:$0xff]  ;;  %v2063_v38 = vand.u32 4294901760, %v10153_v21  ;;  %v825_v44 = vpop.f32.mrf.mxu0  ;;  %2028 = vmatpush1.msra.mxu1 %v2027_v4 }
 0x1a6   :  { %1674 = vmatprep.subr.mxu0 %v13710_v29  ;;  %v13713_v45 = vand.u32 4294901760, %v13712_v49  ;;  %v2069_v50 = vand.u32 4294901760, %v10158_v28  ;;  %v10200_v17 = vsub.f32 %v1840_v61, %v10160_v62  ;;  %v10202_v29 = vand.u32 4294901760, %v1834_v53  ;;  %v1828_v28 = vld [vmem:[#allocation2 + $0x80] sm:$0xff]  ;;  %2034 = vmatprep.subr.mxu1 %v2033_v12 }
 0x1a7   :  { %13711 = vst [vmem:[#allocation25_spill] sm:$0xff] %v10191_v8  ;;  %v2075_v25 = vand.u32 4294901760, %v10168_v7  ;;  %v10208_v49 = vsub.f32 %v1838_v35, %v10173_v42  ;;  %v10210_v21 = vand.u32 4294901760, %v1832_v22  ;;  %v2081_v61 = vand.u32 4294901760, %v10181_v46  ;;  %v1826_v35 = vld [vmem:[#allocation2 + $0x28] sm:$0xff]  ;;  %2040 = vmatpush1.msra.mxu1 %v2039_v23 }
 0x1a8   :  { %1678 = vmatpush1.msra.mxu0 %v13713_v45  ;;  %v13714_v45 = vand.u32 4294901760, %v10132_v54  ;;  %v10219_v7 = vsub.f32 %v1837_v60, %v10184_v58  ;;  %v10221_v32 = vand.u32 4294901760, %v1831_v15  ;;  %v10229_v24 = vsub.f32 %v1835_v26, %v10193_v3  ;;  %v1825_v60 = vld [vmem:[#allocation2 + $0x20] sm:$0xff]  ;;  %2046 = vmatprep.subr.mxu1 %v2045_v14 }
 0x1a9   :  { %1713 = vmatmul.mubr.f32.vlgmr.msra.gmra.mxu0 %v13691_v11  ;;  %1874 = vmatprep.subr.mxu0 %v9872_v27  ;;  %v13715_v11 = vand.u32 4294901760, %v10143_v41  ;;  %v10237_v63 = vsub.f32 %v1834_v53, %v10202_v29  ;;  %v10239_v48 = vand.u32 4294901760, %v1828_v28  ;;  %v13718_v26 = vand.u32 4294901760, %v10171_v43 }
 0x1aa   :  { %v2086_v4 = vsub.f32 %v10132_v54, %v13714_v45  ;;  %1876 = vmatpush1.msra.mxu0 %v9888_v39  ;;  %13716 = vst [vmem:[#allocation29_spill] sm:$0xff] %v10229_v24  ;;  %v10231_v45 = vand.u32 4294901760, %v1829_v10  ;;  %v13717_v54 = vld [vmem:[#allocation30_spill] sm:$0xff]  ;;  %v10249_v23 = vand.u32 4294901760, %v1826_v35  ;;  %2052 = vmatpush1.msra.mxu1 %v2051_v51  ;;  %v10254_v14 = vsub.f32 %v1831_v15, %v10221_v32 }
 0x1ab   :  { %v2092_v20 = vsub.f32 %v10143_v41, %v13715_v11  ;;  %v826_v34 = vadd.f32 %v825_v44, %v13717_v54  ;;  %1878 = vmatprep.subr.mxu0 %v9893_v16  ;;  %v2098_v11 = vsub.f32 %v10171_v43, %v13718_v26  ;;  %v10247_v54 = vsub.f32 %v1832_v22, %v10210_v21 }
 0x1ac   :  { %1880 = vmatpush1.msra.mxu0 %v9901_v40  ;;  %v10256_v12 = vand.u32 4294901760, %v1825_v60  ;;  %2058 = vmatprep.subr.mxu1 %v2057_v13  ;;  %v2087_v26 = vand.u32 4294901760, %v2086_v4  ;;  %v13719_v22 = vand.u32 4294901760, %v10191_v8  ;;  %v13720_v15 = vand.u32 4294901760, %v10200_v17 }
 0x1ad   :  { %v930_v44 = vadd.f32 %v929_v30, %v826_v34  ;;  %1882 = vmatprep.subr.mxu0 %v9916_v9  ;;  %v10264_v30 = vsub.f32 %v1829_v10, %v10231_v45  ;;  %2064 = vmatpush1.msra.mxu1 %v2063_v38  ;;  %v2093_v51 = vand.u32 4294901760, %v2092_v20  ;;  %v10272_v4 = vsub.f32 %v1828_v28, %v10239_v48 }
 0x1ae   :  { %1884 = vmatpush1.msra.mxu0 %v9921_v57  ;;  %v2104_v46 = vsub.f32 %v10191_v8, %v13719_v22  ;;  %v2110_v13 = vsub.f32 %v10200_v17, %v13720_v15  ;;  %2070 = vmatprep.subr.mxu1 %v2069_v50  ;;  %v2099_v22 = vand.u32 4294901760, %v2098_v11  ;;  %v13721_v10 = vand.u32 4294901760, %v10208_v49 }
 0x1af   :  { %1886 = vmatprep.subr.mxu0 %v9929_v1  ;;  %v10280_v20 = vsub.f32 %v1826_v35, %v10249_v23  ;;  %v934_v8 = vmul.f32 0.01, %v930_v44  ;;  %2076 = vmatpush1.msra.mxu1 %v2075_v25  ;;  %v13722_v28 = vand.u32 4294901760, %v10219_v7  ;;  %v10288_v11 = vsub.f32 %v1825_v60, %v10256_v12 }
 0x1b0   :  { %1888 = vmatpush1.msra.mxu0 %v9940_v56  ;;  %v2116_v38 = vsub.f32 %v10208_v49, %v13721_v10  ;;  %2082 = vmatprep.subr.mxu1 %v2081_v61  ;;  %v2105_v10 = vand.u32 4294901760, %v2104_v46  ;;  %v13723_v35 = vand.u32 4294901760, %v10229_v24  ;;  %v2111_v53 = vand.u32 4294901760, %v2110_v13 }
 0x1b1   :  { %1890 = vmatprep.subr.mxu0 %v9949_v31  ;;  %v2122_v50 = vsub.f32 %v10219_v7, %v13722_v28  ;;  %2088 = vmatpush1.msra.mxu1 %v2087_v26  ;;  %v13724_v28 = vand.u32 4294901760, %v10237_v63  ;;  %v13725_v46 = vand.u32 4294901760, %v10247_v54  ;;  %v13274_v25 = vand.u32 4294901760, %v10280_v20 }
 0x1b2   :  { %1892 = vmatpush1.msra.mxu0 %v9957_v18  ;;  %v2128_v34 = vsub.f32 %v10229_v24, %v13723_v35  ;;  %2094 = vmatprep.subr.mxu1 %v2093_v51  ;;  %v2117_v61 = vand.u32 4294901760, %v2116_v38  ;;  %v935_v26 = vmax.f32 %v930_v44, %v934_v8  ;;  %v13726_v24 = vand.u32 4294901760, %v10254_v14 }
 0x1b3   :  { %1894 = vmatprep.subr.mxu0 %v9966_v5  ;;  %v2134_v15 = vsub.f32 %v10237_v63, %v13724_v28  ;;  %v2140_v35 = vsub.f32 %v10247_v54, %v13725_v46  ;;  %2100 = vmatpush1.msra.mxu1 %v2099_v22  ;;  %v2123_v13 = vand.u32 4294901760, %v2122_v50  ;;  %v13273_v51 = vand.u32 4294901760, %v10288_v11 }
 0x1b4   :  { %1896 = vmatpush1.msra.mxu0 %v9980_v47  ;;  %v2146_v28 = vsub.f32 %v10254_v14, %v13726_v24  ;;  %2106 = vmatprep.subr.mxu1 %v2105_v10  ;;  %v2129_v38 = vand.u32 4294901760, %v2128_v34  ;;  %v13727_v60 = vand.u32 4294901760, %v10264_v30  ;;  %v13728_v44 = vand.u32 4294901760, %v10272_v4 }
 0x1b5   :  { %1898 = vmatprep.subr.mxu0 %v9994_v37  ;;  %2112 = vmatpush1.msra.mxu1 %v2111_v53  ;;  %v2135_v8 = vand.u32 4294901760, %v2134_v15  ;;  %v2141_v24 = vand.u32 4294901760, %v2140_v35  ;;  %v2164_v34 = vsub.f32 %v10280_v20, %v13274_v25  ;;  %v10322_v50 = vand.u32 4294901760, %v935_v26  ;;  %v13745_v25 = vld [vmem:[#allocation24_spill] sm:$0xff] }
 0x1b6   :  { %1900 = vmatpush1.msra.mxu0 %v10003_v6  ;;  %v2152_v46 = vsub.f32 %v10264_v30, %v13727_v60  ;;  %v2158_v22 = vsub.f32 %v10272_v4, %v13728_v44  ;;  %2118 = vmatprep.subr.mxu1 %v2117_v61  ;;  %v2147_v53 = vand.u32 4294901760, %v2146_v28  ;;  %v2170_v15 = vsub.f32 %v10288_v11, %v13273_v51  ;;  %v13733_v44 = vld [vmem:[#allocation10_spill] sm:$0xff]  ;;  %v13744_v51 = vld [vmem:[#allocation8_spill] sm:$0xff] }
 0x1b7   :  { %1902 = vmatprep.subr.mxu0 %v10005_v0  ;;  %13729 = vst [vmem:[#allocation30_spill] sm:$0xff] %v10322_v50  ;;  %2124 = vmatpush1.msra.mxu1 %v2123_v13  ;;  %v2165_v61 = vand.u32 4294901760, %v2164_v34  ;;  %v10332_v35 = vsub.f32 %v935_v26, %v10322_v50  ;;  %v13736_v34 = vld [vmem:[#allocation12_spill] sm:$0xff] }
 0x1b8   :  { %1904 = vmatpush1.msra.mxu0 %v10019_v2  ;;  %2130 = vmatprep.subr.mxu1 %v2129_v38  ;;  %v2153_v10 = vand.u32 4294901760, %v2152_v46  ;;  %v2159_v60 = vand.u32 4294901760, %v2158_v22  ;;  %v2171_v13 = vand.u32 4294901760, %v2170_v15  ;;  %v13731_v46 = vld [vmem:[#allocation13_spill] sm:$0xff]  ;;  %v13734_v22 = vld [vmem:[#allocation11_spill] sm:$0xff]  ;;  %v13738_v15 = vld [vmem:[#allocation14_spill] sm:$0xff] }
 0x1b9   :  { %1906 = vmatprep.subr.mxu0 %v10029_v55  ;;  %2136 = vmatpush1.msra.mxu1 %v2135_v8  ;;  %v10340_v28 = vand.u32 4294901760, %v10332_v35  ;;  %v13732_v8 = vld [vmem:[#allocation9_spill] sm:$0xff] }
 0x1ba   :  { %1908 = vmatpush1.msra.mxu0 %v10084_v52  ;;  %2142 = vmatprep.subr.mxu1 %v2141_v24  ;;  %v13735_v24 = vld [vmem:[#allocation22_spill] sm:$0xff] }
 0x1bb   :  { %1910 = vmatprep.subr.mxu0 %v10096_v36  ;;  %2148 = vmatpush1.msra.mxu1 %v2147_v53  ;;  %v1973_v26 = vsub.f32 %v10332_v35, %v10340_v28  ;;  %v13737_v53 = vld [vmem:[#allocation26_spill] sm:$0xff] }
 0x1bc   :  { %1912 = vmatpush1.msra.mxu0 %v10118_v59  ;;  %2154 = vmatprep.subr.mxu1 %v2153_v10  ;;  %v13739_v10 = vld [vmem:[#allocation15_spill] sm:$0xff] }
 0x1bd   :  { %1914 = vmatprep.subr.mxu0 %v10145_v19  ;;  %2160 = vmatpush1.msra.mxu1 %v2159_v60  ;;  %v10360_v38 = vand.u32 4294901760, %v1973_v26  ;;  %v13740_v60 = vld [vmem:[#allocation16_spill] sm:$0xff]  ;;  %v13743_v26 = vld [vmem:[#allocation21_spill] sm:$0xff] }
 0x1be   :  { %1916 = vmatpush1.msra.mxu0 %v10160_v62  ;;  %2166 = vmatprep.subr.mxu1 %v2165_v61  ;;  %v13741_v61 = vld [vmem:[#allocation20_spill] sm:$0xff] }
 0x1bf   :  { %1918 = vmatprep.subr.mxu0 %v10173_v42  ;;  %2172 = vmatpush1.msra.mxu1 %v2171_v13  ;;  %13730 = vst [vmem:[#allocation32_spill] sm:$0xff] %v10360_v38  ;;  %v13742_v13 = vld [vmem:[#allocation27_spill] sm:$0xff] }
 0x1c0   :  { %1920 = vmatpush1.msra.mxu0 %v10184_v58  ;;  %2207 = vmatmul.mubr.f32.vlgmr.msra.gmra.mxu1 %v10322_v50  ;;  %v13747_v50 = vld [vmem:[#allocation18_spill] sm:$0xff] }
 0x1c1   :  { %1922 = vmatprep.subr.mxu0 %v10193_v3  ;;  %2351 = vmatprep.subr.mxu1 %v9872_v27 }
 0x1c2   :  { %1924 = vmatpush1.msra.mxu0 %v10202_v29  ;;  %2353 = vmatpush1.msra.mxu1 %v9888_v39 }
 0x1c3   :  { %1926 = vmatprep.subr.mxu0 %v10210_v21  ;;  %2355 = vmatprep.subr.mxu1 %v9893_v16 }
 0x1c4   :  { %1928 = vmatpush1.msra.mxu0 %v10221_v32  ;;  %2357 = vmatpush1.msra.mxu1 %v9901_v40 }
 0x1c5   :  { %1930 = vmatprep.subr.mxu0 %v10231_v45  ;;  %2359 = vmatprep.subr.mxu1 %v9916_v9 }
 0x1c6   :  { %1932 = vmatpush1.msra.mxu0 %v10239_v48  ;;  %2361 = vmatpush1.msra.mxu1 %v9921_v57 }
 0x1c7   :  { %1934 = vmatprep.subr.mxu0 %v10249_v23  ;;  %2363 = vmatprep.subr.mxu1 %v9929_v1 }
 0x1c8   :  { %1936 = vmatpush1.msra.mxu0 %v10256_v12  ;;  %1969 = vmatprep.mubr.f32.mxu0 %v13540_v33 }
 0x1c9   :  { %2365 = vmatpush1.msra.mxu1 %v9940_v56  ;;  %1975 = vmatmul.mubr.f32.vlgmr.msra.gmra.mxu0 %v10360_v38  ;;  %v13746_v38 = vld [vmem:[#allocation17_spill] sm:$0xff] }
 0x1ca   :  { %2215 = vmatprep.subr.mxu0 %v13731_v46  ;;  %2367 = vmatprep.subr.mxu1 %v9949_v31 }
 0x1cb   :  { %2218 = vmatpush1.msra.mxu0 %v13732_v8  ;;  %2369 = vmatpush1.msra.mxu1 %v9957_v18 }
 0x1cc   :  { %2221 = vmatprep.subr.mxu0 %v13733_v44  ;;  %2371 = vmatprep.subr.mxu1 %v9966_v5 }
 0x1cd   :  { %2224 = vmatpush1.msra.mxu0 %v13734_v22  ;;  %2373 = vmatpush1.msra.mxu1 %v9980_v47 }
 0x1ce   :  { %2227 = vmatprep.subr.mxu0 %v13735_v24  ;;  %2375 = vmatprep.subr.mxu1 %v9994_v37 }
 0x1cf   :  { %2230 = vmatpush1.msra.mxu0 %v13736_v34  ;;  %2377 = vmatpush1.msra.mxu1 %v10003_v6 }
 0x1d0   :  { %2233 = vmatprep.subr.mxu0 %v13737_v53  ;;  %2379 = vmatprep.subr.mxu1 %v10005_v0 }
 0x1d1   :  { %2236 = vmatpush1.msra.mxu0 %v13738_v15  ;;  %2381 = vmatpush1.msra.mxu1 %v10019_v2 }
 0x1d2   :  { %2239 = vmatprep.subr.mxu0 %v13739_v10  ;;  %2383 = vmatprep.subr.mxu1 %v10029_v55 }
 0x1d3   :  { %2242 = vmatpush1.msra.mxu0 %v13740_v60  ;;  %2385 = vmatpush1.msra.mxu1 %v10084_v52 }
 0x1d4   :  { %2245 = vmatprep.subr.mxu0 %v13741_v61  ;;  %2387 = vmatprep.subr.mxu1 %v10096_v36 }
 0x1d5   :  { %2248 = vmatpush1.msra.mxu0 %v13742_v13  ;;  %2389 = vmatpush1.msra.mxu1 %v10118_v59  ;;  %v13748_v59 = vld [vmem:[#allocation23_spill] sm:$0xff] }
 0x1d6   :  { %2251 = vmatprep.subr.mxu0 %v13743_v26  ;;  %2391 = vmatprep.subr.mxu1 %v10145_v19 }
 0x1d7   :  { %2254 = vmatpush1.msra.mxu0 %v13744_v51  ;;  %2393 = vmatpush1.msra.mxu1 %v10160_v62 }
 0x1d8   :  { %2257 = vmatprep.subr.mxu0 %v13745_v25  ;;  %2395 = vmatprep.subr.mxu1 %v10173_v42  ;;  %v13749_v42 = vld [vmem:[#allocation25_spill] sm:$0xff] }
 0x1d9   :  { %2260 = vmatpush1.msra.mxu0 %v13746_v38  ;;  %2397 = vmatpush1.msra.mxu1 %v10184_v58 }
 0x1da   :  { %2263 = vmatprep.subr.mxu0 %v13747_v50  ;;  %2399 = vmatprep.subr.mxu1 %v10193_v3 }
 0x1db   :  { %2266 = vmatpush1.msra.mxu0 %v13748_v59  ;;  %2401 = vmatpush1.msra.mxu1 %v10202_v29 }
 0x1dc   :  { %2269 = vmatprep.subr.mxu0 %v10143_v41  ;;  %2403 = vmatprep.subr.mxu1 %v10210_v21 }
 0x1dd   :  { %2272 = vmatpush1.msra.mxu0 %v10171_v43  ;;  %2405 = vmatpush1.msra.mxu1 %v10221_v32  ;;  %v13750_v43 = vld [vmem:[#allocation29_spill] sm:$0xff] }
 0x1de   :  { %2275 = vmatprep.subr.mxu0 %v13749_v42  ;;  %2407 = vmatprep.subr.mxu1 %v10231_v45 }
 0x1df   :  { %2278 = vmatpush1.msra.mxu0 %v10200_v17  ;;  %2409 = vmatpush1.msra.mxu1 %v10239_v48 }
 0x1e0   :  { %2281 = vmatprep.subr.mxu0 %v10208_v49  ;;  %2411 = vmatprep.subr.mxu1 %v10249_v23 }
 0x1e1   :  { %2284 = vmatpush1.msra.mxu0 %v10219_v7  ;;  %2413 = vmatpush1.msra.mxu1 %v10256_v12 }
 0x1e2   :  { %2446 = vmatprep.mubr.f32.mxu1 %v13540_v33  ;;  %2287 = vmatprep.subr.mxu0 %v13750_v43 }
 0x1e3   :  { %2450 = vmatmul.mubr.f32.vlgmr.msra.gmra.mxu1 %v10340_v28  ;;  %2625 = vmatprep.subr.mxu1 %v9872_v27  ;;  %v13751_v27 = vand.u32 4294901760, %v13731_v46 }
 0x1e4   :  { %2290 = vmatpush1.msra.mxu0 %v10237_v63  ;;  %2627 = vmatpush1.msra.mxu1 %v9888_v39  ;;  %v13752_v39 = vand.u32 4294901760, %v13732_v8  ;;  %v1863_v8 = vld [vmem:[#allocation2 + $0x4b0] sm:$0xff] }
 0x1e5   :  { %2293 = vmatprep.subr.mxu0 %v10247_v54  ;;  %2629 = vmatprep.subr.mxu1 %v9893_v16  ;;  %v13753_v16 = vand.u32 4294901760, %v13733_v44 }
 0x1e6   :  { %2296 = vmatpush1.msra.mxu0 %v10254_v14  ;;  %2631 = vmatpush1.msra.mxu1 %v9901_v40  ;;  %v13754_v40 = vand.u32 4294901760, %v13734_v22  ;;  %v13763_v22 = vld [vmem:[#allocation28_spill] sm:$0xff] }
 0x1e7   :  { %2299 = vmatprep.subr.mxu0 %v10264_v30  ;;  %2633 = vmatprep.subr.mxu1 %v9916_v9  ;;  %v13755_v9 = vand.u32 4294901760, %v13735_v24  ;;  %v13764_v24 = vand.u32 4294901760, %v13743_v26  ;;  %v13770_v26 = vand.u32 4294901760, %v13748_v59 }
 0x1e8   :  { %2302 = vmatpush1.msra.mxu0 %v10272_v4  ;;  %2635 = vmatpush1.msra.mxu1 %v9921_v57  ;;  %v1872_v57 = vld [vmem:[#allocation2 + $0x5d0] sm:$0xff] }
 0x1e9   :  { %2305 = vmatprep.subr.mxu0 %v10280_v20  ;;  %2637 = vmatprep.subr.mxu1 %v9929_v1  ;;  %v13756_v1 = vand.u32 4294901760, %v13736_v34  ;;  %v10486_v34 = vand.u32 4294901760, %v1863_v8 }
 0x1ea   :  { %2308 = vmatpush1.msra.mxu0 %v10288_v11  ;;  %2341 = vmatprep.mubr.f32.mxu0 %v13540_v33 }
 0x1eb   :  { %2639 = vmatpush1.msra.mxu1 %v9940_v56  ;;  %2344 = vmatmul.mubr.f32.vlgmr.msra.gmra.mxu0 %v10332_v35  ;;  %v13757_v56 = vand.u32 4294901760, %v13737_v53  ;;  %v1860_v53 = vld [vmem:[#allocation2 + $0x450] sm:$0xff] }
 0x1ec   :  { %2459 = vmatprep.subr.mxu0 %v13751_v27  ;;  %2641 = vmatprep.subr.mxu1 %v9949_v31  ;;  %v1869_v31 = vld [vmem:[#allocation2 + $0x570] sm:$0xff]  ;;  %v10508_v27 = vsub.f32 %v1863_v8, %v10486_v34 }
 0x1ed   :  { %2463 = vmatpush1.msra.mxu0 %v13752_v39  ;;  %2643 = vmatpush1.msra.mxu1 %v9957_v18  ;;  %v13758_v18 = vand.u32 4294901760, %v13738_v15  ;;  %v10464_v46 = vand.u32 4294901760, %v1869_v31  ;;  %v13766_v15 = vand.u32 4294901760, %v13745_v25  ;;  %v1854_v25 = vld [vmem:[#allocation2 + $0x390] sm:$0xff] }
 0x1ee   :  { %2467 = vmatprep.subr.mxu0 %v13753_v16  ;;  %2645 = vmatprep.subr.mxu1 %v9966_v5  ;;  %v10456_v5 = vand.u32 4294901760, %v1872_v57  ;;  %v1851_v39 = vld [vmem:[#allocation2 + $0x330] sm:$0xff]  ;;  %v13772_v16 = vld [vmem:[#allocation31_spill] sm:$0xff] }
 0x1ef   :  { %2471 = vmatpush1.msra.mxu0 %v13754_v40  ;;  %2647 = vmatpush1.msra.mxu1 %v9980_v47  ;;  %v13759_v47 = vand.u32 4294901760, %v13739_v10  ;;  %v13767_v10 = vld [vmem:[#allocation19_spill] sm:$0xff] }
 0x1f0   :  { %2475 = vmatprep.subr.mxu0 %v13755_v9  ;;  %2649 = vmatprep.subr.mxu1 %v9994_v37  ;;  %v1866_v37 = vld [vmem:[#allocation2 + $0x510] sm:$0xff]  ;;  %v10473_v44 = vsub.f32 %v1872_v57, %v10456_v5  ;;  %v10522_v9 = vand.u32 4294901760, %v1854_v25 }
 0x1f1   :  { %2479 = vmatpush1.msra.mxu0 %v13756_v1  ;;  %2651 = vmatpush1.msra.mxu1 %v10003_v6  ;;  %v13760_v6 = vand.u32 4294901760, %v13740_v60  ;;  %v13768_v60 = vand.u32 4294901760, %v13746_v38  ;;  %v2843_v1 = vand.u32 4294901760, %v10508_v27 }
 0x1f2   :  { %2483 = vmatprep.subr.mxu0 %v13757_v56  ;;  %2653 = vmatprep.subr.mxu1 %v10005_v0  ;;  %v13761_v0 = vand.u32 4294901760, %v13741_v61  ;;  %v1857_v61 = vld [vmem:[#allocation2 + $0x3f0] sm:$0xff]  ;;  %v10537_v56 = vand.u32 4294901760, %v1851_v39 }
 0x1f3   :  { %2487 = vmatpush1.msra.mxu0 %v13758_v18  ;;  %2655 = vmatpush1.msra.mxu1 %v10019_v2  ;;  %v13762_v2 = vand.u32 4294901760, %v13742_v13  ;;  %v13769_v13 = vand.u32 4294901760, %v13747_v50  ;;  %v10513_v50 = vand.u32 4294901760, %v1857_v61 }
 0x1f4   :  { %2491 = vmatprep.subr.mxu0 %v13759_v47  ;;  %2657 = vmatprep.subr.mxu1 %v10029_v55  ;;  %v10475_v55 = vand.u32 4294901760, %v1866_v37  ;;  %v10552_v47 = vsub.f32 %v1854_v25, %v10522_v9  ;;  %v10566_v8 = vsub.f32 %v1851_v39, %v10537_v56 }
 0x1f5   :  { %2495 = vmatpush1.msra.mxu0 %v13760_v6  ;;  %2659 = vmatpush1.msra.mxu1 %v10084_v52  ;;  %v13765_v52 = vand.u32 4294901760, %v13744_v51 }
 0x1f6   :  { %2499 = vmatprep.subr.mxu0 %v13761_v0  ;;  %2661 = vmatprep.subr.mxu1 %v10096_v36  ;;  %v10484_v36 = vsub.f32 %v1869_v31, %v10464_v46  ;;  %v10496_v51 = vsub.f32 %v1866_v37, %v10475_v55  ;;  %v10543_v31 = vsub.f32 %v1857_v61, %v10513_v50  ;;  %v2871_v25 = vand.u32 4294901760, %v10566_v8 }
 0x1f7   :  { %2503 = vmatpush1.msra.mxu0 %v13762_v2  ;;  %2663 = vmatpush1.msra.mxu1 %v13763_v22  ;;  %v2844_v0 = vsub.f32 %v10508_v27, %v2843_v1  ;;  %v13780_v2 = vand.u32 4294901760, %v10237_v63 }
 0x1f8   :  { %2507 = vmatprep.subr.mxu0 %v13764_v24  ;;  %2665 = vmatprep.subr.mxu1 %v10145_v19  ;;  %v2822_v19 = vand.u32 4294901760, %v10473_v44  ;;  %v2829_v38 = vand.u32 4294901760, %v10484_v36  ;;  %v2836_v40 = vand.u32 4294901760, %v10496_v51  ;;  %v2857_v22 = vand.u32 4294901760, %v10543_v31 }
 0x1f9   :  { %2511 = vmatpush1.msra.mxu0 %v13765_v52  ;;  %2667 = vmatpush1.msra.mxu1 %v10160_v62  ;;  %v10501_v62 = vand.u32 4294901760, %v1860_v53  ;;  %v13781_v24 = vand.u32 4294901760, %v10247_v54  ;;  %v13783_v54 = vand.u32 4294901760, %v10264_v30  ;;  %v13785_v30 = vand.u32 4294901760, %v10280_v20 }
 0x1fa   :  { %2515 = vmatprep.subr.mxu0 %v13766_v15  ;;  %2669 = vmatprep.subr.mxu1 %v13767_v10  ;;  %v2823_v59 = vsub.f32 %v10473_v44, %v2822_v19  ;;  %v2830_v57 = vsub.f32 %v10484_v36, %v2829_v38  ;;  %v2837_v18 = vsub.f32 %v10496_v51, %v2836_v40  ;;  %v1839_v15 = vld [vmem:[#allocation2 + $0x1b0] sm:$0xff]  ;;  %v13782_v10 = vand.u32 4294901760, %v10254_v14 }
 0x1fb   :  { %2519 = vmatpush1.msra.mxu0 %v13768_v60  ;;  %2671 = vmatpush1.msra.mxu1 %v10184_v58  ;;  %v13771_v58 = vand.u32 4294901760, %v10143_v41  ;;  %v13774_v41 = vand.u32 4294901760, %v13749_v42  ;;  %v13776_v42 = vand.u32 4294901760, %v10208_v49  ;;  %v13784_v14 = vand.u32 4294901760, %v10272_v4 }
 0x1fc   :  { %2523 = vmatprep.subr.mxu0 %v13769_v13  ;;  %2673 = vmatprep.subr.mxu1 %v10193_v3  ;;  %v13773_v3 = vand.u32 4294901760, %v13772_v16  ;;  %v2831_v6 = vand.u32 4294901760, %v2830_v57  ;;  %v2838_v52 = vand.u32 4294901760, %v2837_v18  ;;  %v2845_v13 = vand.u32 4294901760, %v2844_v0 }
 0x1fd   :  { %2527 = vmatpush1.msra.mxu0 %v13770_v26  ;;  %2675 = vmatpush1.msra.mxu1 %v10202_v29  ;;  %v10528_v29 = vsub.f32 %v1860_v53, %v10501_v62  ;;  %v2864_v53 = vand.u32 4294901760, %v10552_v47  ;;  %v1836_v26 = vld [vmem:[#allocation2 + $0x150] sm:$0xff]  ;;  %v10600_v16 = vand.u32 4294901760, %v1839_v15  ;;  %v13786_v4 = vand.u32 4294901760, %v10288_v11 }
 0x1fe   :  { %2531 = vmatprep.subr.mxu0 %v13771_v58  ;;  %2677 = vmatprep.subr.mxu1 %v10210_v21  ;;  %v13775_v21 = vand.u32 4294901760, %v10200_v17  ;;  %v13777_v17 = vand.u32 4294901760, %v10219_v7  ;;  %v13778_v7 = vand.u32 4294901760, %v13750_v43  ;;  %v2858_v58 = vsub.f32 %v10543_v31, %v2857_v22 }
 0x1ff   :  { %2535 = vmatpush1.msra.mxu0 %v13773_v3  ;;  %2679 = vmatpush1.msra.mxu1 %v10221_v32  ;;  %v1848_v32 = vld [vmem:[#allocation2 + $0x2d0] sm:$0xff]  ;;  %v2850_v49 = vand.u32 4294901760, %v10528_v29  ;;  %v2865_v3 = vsub.f32 %v10552_v47, %v2864_v53  ;;  %v2872_v20 = vsub.f32 %v10566_v8, %v2871_v25 }
 0x200   :  { %2539 = vmatprep.subr.mxu0 %v13774_v41  ;;  %2681 = vmatprep.subr.mxu1 %v10231_v45  ;;  %v2824_v45 = vand.u32 4294901760, %v2823_v59  ;;  %v10557_v37 = vand.u32 4294901760, %v1848_v32  ;;  %v1833_v59 = vld [vmem:[#allocation2 + $0xf0] sm:$0xff]  ;;  %v2859_v11 = vand.u32 4294901760, %v2858_v58 }
 0x201   :  { %2543 = vmatpush1.msra.mxu0 %v13775_v21  ;;  %2683 = vmatpush1.msra.mxu1 %v10239_v48  ;;  %v1845_v48 = vld [vmem:[#allocation2 + $0x270] sm:$0xff]  ;;  %v2851_v63 = vsub.f32 %v10528_v29, %v2850_v49  ;;  %v10626_v18 = vand.u32 4294901760, %v1833_v59 }
 0x202   :  { %2547 = vmatprep.subr.mxu0 %v13776_v42  ;;  %2685 = vmatprep.subr.mxu1 %v10249_v23  ;;  %v13779_v23 = vld [vmem:[#allocation30_spill] sm:$0xff]  ;;  %v10572_v43 = vand.u32 4294901760, %v1845_v48  ;;  %v10584_v60 = vsub.f32 %v1848_v32, %v10557_v37  ;;  %v10614_v32 = vand.u32 4294901760, %v1836_v26 }
 0x203   :  { %2551 = vmatpush1.msra.mxu0 %v13777_v17  ;;  %2687 = vmatpush1.msra.mxu1 %v10256_v12  ;;  %v1842_v12 = vld [vmem:[#allocation2 + $0x210] sm:$0xff]  ;;  %v2852_v41 = vand.u32 4294901760, %v2851_v63 }
 0x204   :  { %2720 = vmatprep.mubr.f32.mxu1 %v13540_v33  ;;  %2555 = vmatprep.subr.mxu0 %v13778_v7  ;;  %v10586_v61 = vand.u32 4294901760, %v1842_v12  ;;  %v10598_v39 = vsub.f32 %v1845_v48, %v10572_v43  ;;  %v2878_v21 = vand.u32 4294901760, %v10584_v60  ;;  %v1830_v42 = vld [vmem:[#allocation2 + $0x90] sm:$0xff]  ;;  %v2866_v48 = vand.u32 4294901760, %v2865_v3 }
 0x205   :  { %2722 = vmatmul.mubr.f32.vlgmr.msra.gmra.mxu1 %v13779_v23  ;;  %7969 = vmatprep.subr.mxu1 %v13540_v33  ;;  %v1827_v7 = vld [vmem:[#allocation2 + $0x30] sm:$0xff] }
 0x206   :  { %2559 = vmatpush1.msra.mxu0 %v13780_v2  ;;  %7970 = vmatpush3.msra.mxu1 %v2824_v45  ;;  %v10612_v57 = vsub.f32 %v1842_v12, %v10586_v61  ;;  %v2885_v17 = vand.u32 4294901760, %v10598_v39  ;;  %v10624_v45 = vsub.f32 %v1839_v15, %v10600_v16  ;;  %v10636_v12 = vsub.f32 %v1836_v26, %v10614_v32 }
 0x207   :  { %2563 = vmatprep.subr.mxu0 %v13781_v24  ;;  %7971 = vmatprep.subr.mxu1 %v13540_v33  ;;  %v10638_v2 = vand.u32 4294901760, %v1830_v42  ;;  %v2873_v24 = vand.u32 4294901760, %v2872_v20  ;;  %v10650_v63 = vand.u32 4294901760, %v1827_v7 }
 0x208   :  { %2567 = vmatpush1.msra.mxu0 %v13782_v10  ;;  %7972 = vmatpush3.msra.mxu1 %v2831_v6  ;;  %v2879_v6 = vsub.f32 %v10584_v60, %v2878_v21  ;;  %v2892_v0 = vand.u32 4294901760, %v10612_v57  ;;  %v13290_v15 = vand.u32 4294901760, %v10624_v45  ;;  %v10648_v10 = vsub.f32 %v1833_v59, %v10626_v18 }
 0x209   :  { %2571 = vmatprep.subr.mxu0 %v13783_v54  ;;  %7973 = vmatprep.subr.mxu1 %v13540_v33  ;;  %v13287_v26 = vand.u32 4294901760, %v10636_v12  ;;  %v10670_v59 = vsub.f32 %v1827_v7, %v10650_v63 }
 0x20a   :  { %2575 = vmatpush1.msra.mxu0 %v13784_v14  ;;  %7974 = vmatpush3.msra.mxu1 %v2838_v52  ;;  %v2886_v52 = vsub.f32 %v10598_v39, %v2885_v17  ;;  %v2880_v54 = vand.u32 4294901760, %v2879_v6  ;;  %v10660_v14 = vsub.f32 %v1830_v42, %v10638_v2  ;;  %v13286_v3 = vand.u32 4294901760, %v10648_v10 }
 0x20b   :  { %2579 = vmatprep.subr.mxu0 %v13785_v30  ;;  %7975 = vmatprep.subr.mxu1 %v13540_v33  ;;  %v2900_v30 = vsub.f32 %v10624_v45, %v13290_v15 }
 0x20c   :  { %2583 = vmatpush1.msra.mxu0 %v13786_v4  ;;  %2616 = vmatprep.mubr.f32.mxu0 %v13540_v33  ;;  %v2887_v58 = vand.u32 4294901760, %v2886_v52  ;;  %v13285_v20 = vand.u32 4294901760, %v10660_v14 }
 0x20d   :  { %7976 = vmatpush3.msra.mxu1 %v2845_v13  ;;  %2618 = vmatmul.mubr.f32.vlgmr.msra.gmra.mxu0 %v13779_v23  ;;  %v2893_v13 = vsub.f32 %v10612_v57, %v2892_v0  ;;  %v2901_v42 = vand.u32 4294901760, %v2900_v30  ;;  %v3402_v30 = vld [vmem:[#allocation2 + $0x5e0] sm:$0xff] }
 0x20e   :  { %7934 = vmatprep.subr.mxu0 %v13540_v33  ;;  %7977 = vmatprep.subr.mxu1 %v13540_v33  ;;  %v2921_v6 = vsub.f32 %v10660_v14, %v13285_v20 }
 0x20f   :  { %7935 = vmatpush3.msra.mxu0 %v10456_v5  ;;  %7978 = vmatpush3.msra.mxu1 %v2852_v41  ;;  %v2894_v4 = vand.u32 4294901760, %v2893_v13  ;;  %v2907_v41 = vsub.f32 %v10636_v12, %v13287_v26 }
 0x210   :  { %7936 = vmatprep.subr.mxu0 %v13540_v33  ;;  %7979 = vmatprep.subr.mxu1 %v13540_v33 }
 0x211   :  { %7937 = vmatpush3.msra.mxu0 %v10464_v46  ;;  %7980 = vmatpush3.msra.mxu1 %v2859_v11  ;;  %v2914_v11 = vsub.f32 %v10648_v10, %v13286_v3  ;;  %v2908_v7 = vand.u32 4294901760, %v2907_v41 }
 0x212   :  { %7938 = vmatprep.subr.mxu0 %v13540_v33  ;;  %7981 = vmatprep.subr.mxu1 %v13540_v33 }
 0x213   :  { %7939 = vmatpush3.msra.mxu0 %v10475_v55  ;;  %7982 = vmatpush3.msra.mxu1 %v2866_v48  ;;  %v13283_v48 = vand.u32 4294901760, %v10670_v59 }
 0x214   :  { %7940 = vmatprep.subr.mxu0 %v13540_v33  ;;  %7983 = vmatprep.subr.mxu1 %v13540_v33 }
 0x215   :  { %7941 = vmatpush3.msra.mxu0 %v10486_v34  ;;  %7984 = vmatpush3.msra.mxu1 %v2873_v24  ;;  %v2915_v24 = vand.u32 4294901760, %v2914_v11  ;;  %v2928_v52 = vsub.f32 %v10670_v59, %v13283_v48 }
 0x216   :  { %7942 = vmatprep.subr.mxu0 %v13540_v33  ;;  %7985 = vmatprep.subr.mxu1 %v13540_v33 }
 0x217   :  { %7943 = vmatpush3.msra.mxu0 %v10501_v62  ;;  %7986 = vmatpush3.msra.mxu1 %v2880_v54  ;;  %v2922_v54 = vand.u32 4294901760, %v2921_v6  ;;  %v2929_v13 = vand.u32 4294901760, %v2928_v52  ;;  %v3393_v6 = vld [vmem:[#allocation2 + $0x458] sm:$0xff] }
 0x218   :  { %7944 = vmatprep.subr.mxu0 %v13540_v33  ;;  %7987 = vmatprep.subr.mxu1 %v13540_v33 }
 0x219   :  { %7945 = vmatpush3.msra.mxu0 %v10513_v50  ;;  %7988 = vmatpush3.msra.mxu1 %v2887_v58  ;;  %v13787_v58 = vld [vmem:[#allocation32_spill] sm:$0xff] }
 0x21a   :  { %7946 = vmatprep.subr.mxu0 %v13540_v33  ;;  %7989 = vmatprep.subr.mxu1 %v13540_v33 }
 0x21b   :  { %7947 = vmatpush3.msra.mxu0 %v10522_v9  ;;  %7990 = vmatpush3.msra.mxu1 %v2894_v4  ;;  %v3400_v4 = vld [vmem:[#allocation2 + $0x580] sm:$0xff] }
 0x21c   :  { %7948 = vmatprep.subr.mxu0 %v13540_v33  ;;  %7991 = vmatprep.subr.mxu1 %v13540_v33  ;;  %v10812_v41 = vand.u32 4294901760, %v3400_v4 }
 0x21d   :  { %7949 = vmatpush3.msra.mxu0 %v10537_v56  ;;  %7992 = vmatpush3.msra.mxu1 %v2901_v42  ;;  %v3399_v42 = vld [vmem:[#allocation2 + $0x578] sm:$0xff] }
 0x21e   :  { %7950 = vmatprep.subr.mxu0 %v13540_v33  ;;  %7993 = vmatprep.subr.mxu1 %v13540_v33 }
 0x21f   :  { %7951 = vmatpush3.msra.mxu0 %v10557_v37  ;;  %7994 = vmatpush3.msra.mxu1 %v2908_v7  ;;  %v3394_v7 = vld [vmem:[#allocation2 + $0x460] sm:$0xff] }
 0x220   :  { %7952 = vmatprep.subr.mxu0 %v13540_v33  ;;  %7995 = vmatprep.subr.mxu1 %v13540_v33 }
 0x221   :  { %7953 = vmatpush3.msra.mxu0 %v10572_v43  ;;  %7996 = vmatpush3.msra.mxu1 %v2915_v24  ;;  %v3392_v24 = vld [vmem:[#allocation2 + $0x400] sm:$0xff] }
 0x222   :  { %7954 = vmatprep.subr.mxu0 %v13540_v33  ;;  %7997 = vmatprep.subr.mxu1 %v13540_v33 }
 0x223   :  { %7955 = vmatpush3.msra.mxu0 %v10586_v61  ;;  %7998 = vmatpush3.msra.mxu1 %v2922_v54 }
 0x224   :  { %7956 = vmatprep.subr.mxu0 %v13540_v33  ;;  %7999 = vmatprep.subr.mxu1 %v13540_v33 }
 0x225   :  { %7957 = vmatpush3.msra.mxu0 %v10600_v16  ;;  %8000 = vmatpush3.msra.mxu1 %v2929_v13  ;;  %v10874_v13 = vand.u32 4294901760, %v3394_v7 }
 0x226   :  { %8001 = vmatprep.mubr.msk.f32.mxu1 %vm8840_vm0, %v13540_v33  ;;  %7958 = vmatprep.subr.mxu0 %v13540_v33 }
 0x227   :  { %8002 = vmatmul.mubr.f32.vlgmr.msra.gmra.mxu1 %v13779_v23  ;;  %8039 = vmatprep.subr.mxu1 %v13540_v33 }
 0x228   :  { %7959 = vmatpush3.msra.mxu0 %v10614_v32  ;;  %8040 = vmatpush3.msra.mxu1 %v10456_v5 }
 0x229   :  { %7960 = vmatprep.subr.mxu0 %v13540_v33  ;;  %8041 = vmatprep.subr.mxu1 %v13540_v33 }
 0x22a   :  { %7961 = vmatpush3.msra.mxu0 %v10626_v18  ;;  %8042 = vmatpush3.msra.mxu1 %v10464_v46 }
 0x22b   :  { %7962 = vmatprep.subr.mxu0 %v13540_v33  ;;  %8043 = vmatprep.subr.mxu1 %v13540_v33 }
 0x22c   :  { %7963 = vmatpush3.msra.mxu0 %v10638_v2  ;;  %8044 = vmatpush3.msra.mxu1 %v10475_v55 }
 0x22d   :  { %7964 = vmatprep.subr.mxu0 %v13540_v33  ;;  %8045 = vmatprep.subr.mxu1 %v13540_v33 }
 0x22e   :  { %7965 = vmatpush3.msra.mxu0 %v10650_v63  ;;  %7966 = vmatprep.mubr.msk.f32.mxu0 %vm8840_vm0, %v13540_v33 }
 0x22f   :  { %8046 = vmatpush3.msra.mxu1 %v10486_v34  ;;  %7967 = vmatmul.mubr.f32.vlgmr.msra.gmra.mxu0 %v13787_v58  ;;  %v3389_v58 = vld [vmem:[#allocation2 + $0x398] sm:$0xff] }
 0x230   :  { %8004 = vmatprep.subr.mxu0 %v13540_v33  ;;  %8047 = vmatprep.subr.mxu1 %v13540_v33  ;;  %v10908_v48 = vand.u32 4294901760, %v3389_v58 }
 0x231   :  { %8005 = vmatpush3.msra.mxu0 %v10473_v44  ;;  %8048 = vmatpush3.msra.mxu1 %v10501_v62  ;;  %v3398_v44 = vld [vmem:[#allocation2 + $0x520] sm:$0xff] }
 0x232   :  { %8006 = vmatprep.subr.mxu0 %v13540_v33  ;;  %8049 = vmatprep.subr.mxu1 %v13540_v33 }
 0x233   :  { %8007 = vmatpush3.msra.mxu0 %v10484_v36  ;;  %8050 = vmatpush3.msra.mxu1 %v10513_v50  ;;  %v10831_v36 = vsub.f32 %v3400_v4, %v10812_v41  ;;  %v3388_v4 = vld [vmem:[#allocation2 + $0x340] sm:$0xff] }
 0x234   :  { %8008 = vmatprep.subr.mxu0 %v13540_v33  ;;  %8051 = vmatprep.subr.mxu1 %v13540_v33  ;;  %v10917_v20 = vand.u32 4294901760, %v3388_v4 }
 0x235   :  { %8009 = vmatpush3.msra.mxu0 %v10496_v51  ;;  %8052 = vmatpush3.msra.mxu1 %v10522_v9  ;;  %13792 = vst [vmem:[#allocation22_spill] sm:$0xff] %v10831_v36 }
 0x236   :  { %8010 = vmatprep.subr.mxu0 %v13540_v33  ;;  %8053 = vmatprep.subr.mxu1 %v13540_v33 }
 0x237   :  { %8011 = vmatpush3.msra.mxu0 %v10508_v27  ;;  %8054 = vmatpush3.msra.mxu1 %v10537_v56 }
 0x238   :  { %8012 = vmatprep.subr.mxu0 %v13540_v33  ;;  %8055 = vmatprep.subr.mxu1 %v13540_v33 }
 0x239   :  { %8013 = vmatpush3.msra.mxu0 %v10528_v29  ;;  %8056 = vmatpush3.msra.mxu1 %v10557_v37 }
 0x23a   :  { %8014 = vmatprep.subr.mxu0 %v13540_v33  ;;  %8057 = vmatprep.subr.mxu1 %v13540_v33 }
 0x23b   :  { %8015 = vmatpush3.msra.mxu0 %v10543_v31  ;;  %8058 = vmatpush3.msra.mxu1 %v10572_v43  ;;  %v10882_v31 = vand.u32 4294901760, %v3393_v6 }
 0x23c   :  { %8016 = vmatprep.subr.mxu0 %v13540_v33  ;;  %8059 = vmatprep.subr.mxu1 %v13540_v33 }
 0x23d   :  { %8017 = vmatpush3.msra.mxu0 %v10552_v47  ;;  %8060 = vmatpush3.msra.mxu1 %v10586_v61 }
 0x23e   :  { %8018 = vmatprep.subr.mxu0 %v13540_v33  ;;  %8061 = vmatprep.subr.mxu1 %v13540_v33 }
 0x23f   :  { %8019 = vmatpush3.msra.mxu0 %v10566_v8  ;;  %8062 = vmatpush3.msra.mxu1 %v10600_v16 }
 0x240   :  { %8020 = vmatprep.subr.mxu0 %v13540_v33  ;;  %8063 = vmatprep.subr.mxu1 %v13540_v33 }
 0x241   :  { %8021 = vmatpush3.msra.mxu0 %v10584_v60  ;;  %8064 = vmatpush3.msra.mxu1 %v10614_v32 }
 0x242   :  { %8022 = vmatprep.subr.mxu0 %v13540_v33  ;;  %8065 = vmatprep.subr.mxu1 %v13540_v33 }
 0x243   :  { %8023 = vmatpush3.msra.mxu0 %v10598_v39  ;;  %8066 = vmatpush3.msra.mxu1 %v10626_v18 }
 0x244   :  { %8024 = vmatprep.subr.mxu0 %v13540_v33  ;;  %8067 = vmatprep.subr.mxu1 %v13540_v33 }
 0x245   :  { %8025 = vmatpush3.msra.mxu0 %v10612_v57  ;;  %8068 = vmatpush3.msra.mxu1 %v10638_v2 }
 0x246   :  { %8026 = vmatprep.subr.mxu0 %v13540_v33  ;;  %8069 = vmatprep.subr.mxu1 %v13540_v33 }
 0x247   :  { %8027 = vmatpush3.msra.mxu0 %v10624_v45  ;;  %8070 = vmatpush3.msra.mxu1 %v10650_v63 }
 0x248   :  { %8071 = vmatprep.mubr.msk.f32.mxu1 %vm8840_vm0, %v13540_v33  ;;  %8028 = vmatprep.subr.mxu0 %v13540_v33 }
 0x249   :  { %8072 = vmatmul.mubr.f32.vlgmr.msra.gmra.mxu1 %v10340_v28  ;;  %8109 = vmatprep.subr.mxu1 %v13540_v33  ;;  %v3401_v28 = vld [vmem:[#allocation2 + $0x5d8] sm:$0xff] }
 0x24a   :  { %8029 = vmatpush3.msra.mxu0 %v10636_v12  ;;  %8110 = vmatpush3.msra.mxu1 %v10456_v5  ;;  %v10795_v5 = vand.u32 4294901760, %v3402_v30 }
 0x24b   :  { %8030 = vmatprep.subr.mxu0 %v13540_v33  ;;  %8111 = vmatprep.subr.mxu1 %v13540_v33 }
 0x24c   :  { %8031 = vmatpush3.msra.mxu0 %v10648_v10  ;;  %8112 = vmatpush3.msra.mxu1 %v10464_v46  ;;  %13788 = vst [vmem:[#allocation13_spill] sm:$0xff] %v10795_v5  ;;  %v10802_v46 = vand.u32 4294901760, %v3401_v28 }
 0x24d   :  { %8032 = vmatprep.subr.mxu0 %v13540_v33  ;;  %8113 = vmatprep.subr.mxu1 %v13540_v33 }
 0x24e   :  { %8033 = vmatpush3.msra.mxu0 %v10660_v14  ;;  %8114 = vmatpush3.msra.mxu1 %v10475_v55  ;;  %13789 = vst [vmem:[#allocation9_spill] sm:$0xff] %v10802_v46  ;;  %v10810_v55 = vsub.f32 %v3402_v30, %v10795_v5 }
 0x24f   :  { %8034 = vmatprep.subr.mxu0 %v13540_v33  ;;  %8115 = vmatprep.subr.mxu1 %v13540_v33 }
 0x250   :  { %8035 = vmatpush3.msra.mxu0 %v10670_v59  ;;  %8036 = vmatprep.mubr.msk.f32.mxu0 %vm8840_vm0, %v13540_v33  ;;  %13790 = vst [vmem:[#allocation10_spill] sm:$0xff] %v10810_v55 }
 0x251   :  { %8116 = vmatpush3.msra.mxu1 %v10486_v34  ;;  %8037 = vmatmul.mubr.f32.vlgmr.msra.gmra.mxu0 %v10332_v35  ;;  %v10820_v35 = vsub.f32 %v3401_v28, %v10802_v46  ;;  %v10824_v34 = vand.u32 4294901760, %v3399_v42 }
 0x252   :  { %8074 = vmatprep.subr.mxu0 %v13540_v33  ;;  %8117 = vmatprep.subr.mxu1 %v13540_v33 }
 0x253   :  { %8075 = vmatpush3.msra.mxu0 %v2822_v19  ;;  %8118 = vmatpush3.msra.mxu1 %v10501_v62  ;;  %13791 = vst [vmem:[#allocation11_spill] sm:$0xff] %v10820_v35  ;;  %v13282_v19 = vand.u32 4294901760, %v10810_v55  ;;  %v3397_v62 = vld [vmem:[#allocation2 + $0x518] sm:$0xff]  ;;  %v13281_v51 = vand.u32 4294901760, %v10820_v35  ;;  %v10844_v11 = vsub.f32 %v3399_v42, %v10824_v34 }
 0x254   :  { %8076 = vmatprep.subr.mxu0 %v13540_v33  ;;  %8119 = vmatprep.subr.mxu1 %v13540_v33  ;;  %v3387_v42 = vld [vmem:[#allocation2 + $0x338] sm:$0xff] }
 0x255   :  { %8077 = vmatpush3.msra.mxu0 %v2829_v38  ;;  %8120 = vmatpush3.msra.mxu1 %v10513_v50  ;;  %v10835_v38 = vand.u32 4294901760, %v3398_v44  ;;  %v3396_v50 = vld [vmem:[#allocation2 + $0x4c0] sm:$0xff]  ;;  %13793 = vst [vmem:[#allocation12_spill] sm:$0xff] %v10844_v11  ;;  %v10854_v27 = vsub.f32 %v10810_v55, %v13282_v19  ;;  %v10872_v54 = vsub.f32 %v10820_v35, %v13281_v51  ;;  %v13288_v30 = vand.u32 4294901760, %v10844_v11 }
 0x256   :  { %8078 = vmatprep.subr.mxu0 %v13540_v33  ;;  %8121 = vmatprep.subr.mxu1 %v13540_v33  ;;  %v10919_v3 = vand.u32 4294901760, %v3387_v42  ;;  %v13834_v35 = vand.u32 4294901760, %v10670_v59 }
 0x257   :  { %8079 = vmatpush3.msra.mxu0 %v2836_v40  ;;  %8122 = vmatpush3.msra.mxu1 %v10522_v9  ;;  %v3395_v40 = vld [vmem:[#allocation2 + $0x4b8] sm:$0xff]  ;;  %v10846_v9 = vand.u32 4294901760, %v3397_v62  ;;  %v10862_v52 = vsub.f32 %v3398_v44, %v10835_v38 }
 0x258   :  { %8080 = vmatprep.subr.mxu0 %v13540_v33  ;;  %8123 = vmatprep.subr.mxu1 %v13540_v33  ;;  %v10864_v29 = vand.u32 4294901760, %v3395_v40 }
 0x259   :  { %8081 = vmatpush3.msra.mxu0 %v2843_v1  ;;  %8124 = vmatpush3.msra.mxu1 %v10537_v56  ;;  %13794 = vst [vmem:[#allocation26_spill] sm:$0xff] %v10846_v9  ;;  %v13284_v1 = vand.u32 4294901760, %v10831_v36  ;;  %v10857_v56 = vand.u32 4294901760, %v3396_v50  ;;  %13795 = vst [vmem:[#allocation14_spill] sm:$0xff] %v10862_v52  ;;  %v10880_v28 = vsub.f32 %v3397_v62, %v10846_v9  ;;  %v13289_v19 = vand.u32 4294901760, %v10862_v52 }
 0x25a   :  { %8082 = vmatprep.subr.mxu0 %v13540_v33  ;;  %8125 = vmatprep.subr.mxu1 %v13540_v33  ;;  %v10904_v47 = vsub.f32 %v3395_v40, %v10864_v29  ;;  %v10926_v40 = vsub.f32 %v10844_v11, %v13288_v30 }
 0x25b   :  { %8083 = vmatpush3.msra.mxu0 %v2850_v49  ;;  %8126 = vmatpush3.msra.mxu1 %v10557_v37  ;;  %v3391_v49 = vld [vmem:[#allocation2 + $0x3f8] sm:$0xff]  ;;  %v3390_v37 = vld [vmem:[#allocation2 + $0x3a0] sm:$0xff]  ;;  %13796 = vst [vmem:[#allocation15_spill] sm:$0xff] %v10880_v28  ;;  %v10893_v44 = vsub.f32 %v10831_v36, %v13284_v1  ;;  %v10896_v62 = vsub.f32 %v3396_v50, %v10857_v56  ;;  %v13291_v8 = vand.u32 4294901760, %v10880_v28 }
 0x25c   :  { %8084 = vmatprep.subr.mxu0 %v13540_v33  ;;  %8127 = vmatprep.subr.mxu1 %v13540_v33  ;;  %v10898_v51 = vand.u32 4294901760, %v3391_v49  ;;  %13798 = vst [vmem:[#allocation20_spill] sm:$0xff] %v10904_v47  ;;  %v3386_v1 = vld [vmem:[#allocation2 + $0x2e0] sm:$0xff]  ;;  %v3385_v50 = vld [vmem:[#allocation2 + $0x2d8] sm:$0xff]  ;;  %v13293_v60 = vand.u32 4294901760, %v10904_v47 }
 0x25d   :  { %8085 = vmatpush3.msra.mxu0 %v2857_v22  ;;  %8128 = vmatpush3.msra.mxu1 %v10572_v43  ;;  %v10884_v22 = vand.u32 4294901760, %v3392_v24  ;;  %13797 = vst [vmem:[#allocation16_spill] sm:$0xff] %v10896_v62  ;;  %v13292_v26 = vand.u32 4294901760, %v10896_v62  ;;  %v10943_v43 = vand.u32 4294901760, %v3386_v1  ;;  %v10969_v15 = vand.u32 4294901760, %v3385_v50 }
 0x25e   :  { %8086 = vmatprep.subr.mxu0 %v13540_v33  ;;  %8129 = vmatprep.subr.mxu1 %v13540_v33  ;;  %v10941_v30 = vsub.f32 %v3391_v49, %v10898_v51  ;;  %v3384_v49 = vld [vmem:[#allocation2 + $0x280] sm:$0xff]  ;;  %v10977_v39 = vsub.f32 %v10880_v28, %v13291_v8 }
 0x25f   :  { %8087 = vmatpush3.msra.mxu0 %v2864_v53  ;;  %8130 = vmatpush3.msra.mxu1 %v10586_v61  ;;  %v10906_v53 = vand.u32 4294901760, %v3390_v37  ;;  %v10915_v61 = vsub.f32 %v3394_v7, %v10874_v13  ;;  %v10933_v7 = vsub.f32 %v3392_v24, %v10884_v22  ;;  %v10957_v24 = vsub.f32 %v3389_v58, %v10908_v48  ;;  %v3383_v58 = vld [vmem:[#allocation2 + $0x278] sm:$0xff] }
 0x260   :  { %8088 = vmatprep.subr.mxu0 %v13540_v33  ;;  %8131 = vmatprep.subr.mxu1 %v13540_v33  ;;  %13802 = vst [vmem:[#allocation24_spill] sm:$0xff] %v10941_v30  ;;  %13807 = vst [vmem:[#allocation29_spill] sm:$0xff] %v10969_v15  ;;  %v10995_v8 = vand.u32 4294901760, %v3384_v49 }
 0x261   :  { %8089 = vmatpush3.msra.mxu0 %v2871_v25  ;;  %13799 = vst [vmem:[#allocation27_spill] sm:$0xff] %v10915_v61  ;;  %8132 = vmatpush3.msra.mxu1 %v10600_v16  ;;  %v10930_v25 = vsub.f32 %v3393_v6, %v10882_v31  ;;  %13801 = vst [vmem:[#allocation8_spill] sm:$0xff] %v10933_v7  ;;  %v10950_v6 = vsub.f32 %v10862_v52, %v13289_v19  ;;  %v3379_v52 = vld [vmem:[#allocation2 + $0x1b8] sm:$0xff] }
 0x262   :  { %8090 = vmatprep.subr.mxu0 %v13540_v33  ;;  %8133 = vmatprep.subr.mxu1 %v13540_v33  ;;  %13804 = vst [vmem:[#allocation18_spill] sm:$0xff] %v10957_v24  ;;  %v10964_v16 = vsub.f32 %v3388_v4, %v10917_v20  ;;  %v10967_v19 = vsub.f32 %v3387_v42, %v10919_v3  ;;  %v10981_v4 = vpop.f32.mrf.mxu0  ;;  %13809 = vst [vmem:[#allocation19_spill] sm:$0xff] %v10995_v8 }
 0x263   :  { %13800 = vst [vmem:[#allocation21_spill] sm:$0xff] %v10930_v25  ;;  %8091 = vmatpush3.msra.mxu0 %v2878_v21  ;;  %8134 = vmatpush3.msra.mxu1 %v10614_v32  ;;  %v10954_v21 = vsub.f32 %v3390_v37, %v10906_v53  ;;  %v13294_v32 = vand.u32 4294901760, %v10915_v61  ;;  %v3544_v37 = vand.u32 4294901760, %v10926_v40  ;;  %v10993_v40 = vsub.f32 %v3386_v1, %v10943_v43 }
 0x264   :  { %8092 = vmatprep.subr.mxu0 %v13540_v33  ;;  %8135 = vmatprep.subr.mxu1 %v13540_v33  ;;  %13805 = vst [vmem:[#allocation23_spill] sm:$0xff] %v10964_v16  ;;  %13806 = vst [vmem:[#allocation25_spill] sm:$0xff] %v10967_v19  ;;  %v3550_v57 = vand.u32 4294901760, %v10950_v6  ;;  %v13810_v1 = vand.u32 4294901760, %v10624_v45  ;;  %v3556_v45 = vand.u32 4294901760, %v10977_v39  ;;  %v13813_v6 = vand.u32 4294901760, %v10933_v7  ;;  %v1073_v42 = vpop.f32.mrf.mxu0 }
 0x265   :  { %13803 = vst [vmem:[#allocation17_spill] sm:$0xff] %v10954_v21  ;;  %8093 = vmatpush3.msra.mxu0 %v2885_v17  ;;  %8136 = vmatpush3.msra.mxu1 %v10626_v18  ;;  %v10989_v18 = vsub.f32 %v10896_v62, %v13292_v26  ;;  %13808 = vst [vmem:[#allocation28_spill] sm:$0xff] %v10993_v40  ;;  %v3382_v26 = vld [vmem:[#allocation2 + $0x220] sm:$0xff]  ;;  %v13815_v39 = vand.u32 4294901760, %v10941_v30 }
 0x266   :  { %8094 = vmatprep.subr.mxu0 %v13540_v33  ;;  %8137 = vmatprep.subr.mxu1 %v13540_v33  ;;  %v11032_v17 = vsub.f32 %v10933_v7, %v13813_v6  ;;  %v3381_v6 = vld [vmem:[#allocation2 + $0x218] sm:$0xff]  ;;  %v13817_v7 = vand.u32 4294901760, %v10854_v27  ;;  %v1303_v27 = vpop.f32.mrf.mxu1 }
 0x267   :  { %8095 = vmatpush3.msra.mxu0 %v2892_v0  ;;  %8138 = vmatpush3.msra.mxu1 %v10638_v2  ;;  %v11003_v0 = vsub.f32 %v10904_v47, %v13293_v60  ;;  %v11013_v2 = vsub.f32 %v10915_v61, %v13294_v32  ;;  %v11018_v60 = vsub.f32 %v3385_v50, %v10969_v15  ;;  %v11034_v50 = vand.u32 4294901760, %v3383_v58 }
 0x268   :  { %8096 = vmatprep.subr.mxu0 %v13540_v33  ;;  %8139 = vmatprep.subr.mxu1 %v13540_v33  ;;  %v11042_v61 = vsub.f32 %v10941_v30, %v13815_v39  ;;  %v13818_v47 = vand.u32 4294901760, %v10636_v12  ;;  %v13820_v39 = vand.u32 4294901760, %v10957_v24  ;;  %v3380_v30 = vld [vmem:[#allocation2 + $0x1c0] sm:$0xff]  ;;  %v13822_v12 = vand.u32 4294901760, %v10872_v54 }
 0x269   :  { %8097 = vmatpush3.msra.mxu0 %v13810_v1  ;;  %13811 = vst [vmem:[#allocation31_spill] sm:$0xff] %v11018_v60  ;;  %8140 = vmatpush3.msra.mxu1 %v10650_v63  ;;  %v13812_v1 = vand.u32 4294901760, %v10930_v25  ;;  %13814 = vst [vmem:[#allocation30_spill] sm:$0xff] %v11034_v50  ;;  %v3562_v63 = vand.u32 4294901760, %v10989_v18  ;;  %v3568_v62 = vand.u32 4294901760, %v11003_v0  ;;  %v13819_v18 = vand.u32 4294901760, %v10954_v21 }
 0x26a   :  { %8141 = vmatprep.mubr.msk.f32.mxu1 %vm8840_vm0, %v13540_v33  ;;  %8098 = vmatprep.subr.mxu0 %v13540_v33  ;;  %v13823_v0 = vand.u32 4294901760, %v10964_v16  ;;  %v13825_v54 = vand.u32 4294901760, %v10893_v44  ;;  %v13829_v44 = vand.u32 4294901760, %v10993_v40 }
 0x26b   :  { %v11027_v32 = vsub.f32 %v10930_v25, %v13812_v1  ;;  %8142 = vmatmul.mubr.f32.vlgmr.msra.gmra.mxu1 %v13779_v23  ;;  %v11046_v25 = vsub.f32 %v3384_v49, %v10995_v8  ;;  %3527 = vmatprep.subr.mxu1 %v13817_v7  ;;  %v11056_v28 = vsub.f32 %v10954_v21, %v13819_v18  ;;  %v11063_v49 = vand.u32 4294901760, %v3382_v26  ;;  %v11065_v7 = vpop.f32.mrf.mxu0 }
 0x26c   :  { %8099 = vmatpush3.msra.mxu0 %v13818_v47  ;;  %v11061_v1 = vsub.f32 %v10957_v24, %v13820_v39  ;;  %3533 = vmatpush1.msra.mxu1 %v13822_v12  ;;  %v3574_v47 = vand.u32 4294901760, %v11013_v2  ;;  %v11074_v18 = vsub.f32 %v10964_v16, %v13823_v0  ;;  %v13824_v39 = vand.u32 4294901760, %v10967_v19 }
 0x26d   :  { %13816 = vst [vmem:[#allocation32_spill] sm:$0xff] %v11046_v25  ;;  %13821 = vst [vmem:[#allocation33_spill] sm:$0xff] %v11063_v49  ;;  %8100 = vmatprep.subr.mxu0 %v13540_v33  ;;  %3539 = vmatprep.subr.mxu1 %v13825_v54  ;;  %v13826_v12 = vand.u32 4294901760, %v10648_v10  ;;  %v3580_v2 = vand.u32 4294901760, %v11027_v32  ;;  %v11089_v0 = vsub.f32 %v3383_v58, %v11034_v50  ;;  %v11091_v16 = vand.u32 4294901760, %v3381_v6  ;;  %v1442_v36 = vpop.f32.mrf.mxu0 }
 0x26e   :  { %v11079_v24 = vsub.f32 %v10967_v19, %v13824_v39  ;;  %v3378_v39 = vld [vmem:[#allocation2 + $0x160] sm:$0xff]  ;;  %3545 = vmatpush1.msra.mxu1 %v3544_v37  ;;  %v11098_v10 = vsub.f32 %v10993_v40, %v13829_v44  ;;  %v11101_v54 = vand.u32 4294901760, %v3380_v30  ;;  %v13830_v58 = vand.u32 4294901760, %v10660_v14  ;;  %v1305_v40 = vpop.f32.mrf.mxu1  ;;  %8106 = vmatprep.mubr.msk.f32.mxu0 %vm8840_vm0, %v13540_v33 }
 0x26f   :  { %8101 = vmatpush3.msra.mxu0 %v13826_v12  ;;  %13827 = vst [vmem:[#allocation34_spill] sm:$0xff] %v11089_v0  ;;  %13828 = vst [vmem:[#allocation35_spill] sm:$0xff] %v11091_v16  ;;  %v3377_v12 = vld [vmem:[#allocation2 + $0x158] sm:$0xff]  ;;  %3551 = vmatprep.subr.mxu1 %v3550_v57  ;;  %v11108_v21 = vsub.f32 %v3382_v26, %v11063_v49  ;;  %v11110_v19 = vand.u32 4294901760, %v3379_v52  ;;  %v3376_v44 = vld [vmem:[#allocation2 + $0x100] sm:$0xff]  ;;  %v11120_v11 = vand.u32 4294901760, %v3378_v39 }
 0x270   :  { %8102 = vmatprep.subr.mxu0 %v13540_v33  ;;  %3557 = vmatpush1.msra.mxu1 %v3556_v45  ;;  %v3375_v26 = vld [vmem:[#allocation2 + $0xf8] sm:$0xff]  ;;  %v1306_v32 = vadd.f32 %v1305_v40, %v1073_v42  ;;  %v11126_v55 = vsub.f32 %v3381_v6, %v11091_v16  ;;  %v11128_v57 = vand.u32 4294901760, %v3377_v12  ;;  %v3374_v14 = vld [vmem:[#allocation2 + $0xa0] sm:$0xff]  ;;  %v1546_v49 = vpop.f32.mrf.mxu1  ;;  %v13836_v59 = vand.u32 4294901760, %v11046_v25 }
 0x271   :  { %8103 = vmatpush3.msra.mxu0 %v13830_v58  ;;  %13831 = vst [vmem:[#allocation36_spill] sm:$0xff] %v11108_v21  ;;  %13832 = vst [vmem:[#allocation37_spill] sm:$0xff] %v11110_v19  ;;  %v13833_v58 = vand.u32 4294901760, %v11018_v60  ;;  %3563 = vmatprep.subr.mxu1 %v3562_v63  ;;  %v11141_v40 = vsub.f32 %v3380_v30, %v11101_v54  ;;  %v11143_v63 = vand.u32 4294901760, %v3376_v44  ;;  %v3373_v6 = vld [vmem:[#allocation2 + $0x98] sm:$0xff] }
 0x272   :  { %8104 = vmatprep.subr.mxu0 %v13540_v33  ;;  %13835 = vst [vmem:[#allocation38_spill] sm:$0xff] %v11126_v55  ;;  %3569 = vmatpush1.msra.mxu1 %v3568_v62  ;;  %v1443_v45 = vadd.f32 %v1442_v36, %v1306_v32  ;;  %v11149_v42 = vsub.f32 %v3379_v52, %v11110_v19  ;;  %v3371_v32 = vld [vmem:[#allocation2 + $0x38] sm:$0xff]  ;;  %v13838_v52 = vand.u32 4294901760, %v11089_v0 }
 0x273   :  { %v11118_v37 = vsub.f32 %v11018_v60, %v13833_v58  ;;  %8105 = vmatpush3.msra.mxu0 %v13834_v35  ;;  %v11132_v58 = vpop.f32.mrf.mxu0  ;;  %v11138_v35 = vsub.f32 %v11046_v25, %v13836_v59  ;;  %v11151_v60 = vand.u32 4294901760, %v3375_v26  ;;  %v3372_v59 = vld [vmem:[#allocation2 + $0x40] sm:$0xff]  ;;  %v1304_v25 = vadd.f32 %v1303_v27, %v10981_v4  ;;  %3575 = vmatprep.subr.mxu1 %v3574_v47 }
 0x274   :  { %8107 = vmatmul.mubr.f32.vlgmr.msra.gmra.mxu0 %v13779_v23  ;;  %3404 = vmatprep.subr.mxu0 %v10795_v5  ;;  %v11157_v36 = vsub.f32 %v3378_v39, %v11120_v11  ;;  %v11159_v23 = vand.u32 4294901760, %v3374_v14  ;;  %v3639_v62 = vsub.f32 %v11089_v0, %v13838_v52  ;;  %v11167_v27 = vsub.f32 %v3377_v12, %v11128_v57 }
 0x275   :  { %13837 = vst [vmem:[#allocation39_spill] sm:$0xff] %v11151_v60  ;;  %3406 = vmatpush1.msra.mxu0 %v10802_v46  ;;  %v3628_v30 = vand.u32 4294901760, %v11118_v37  ;;  %3581 = vmatpush1.msra.mxu1 %v3580_v2  ;;  %v11169_v47 = vand.u32 4294901760, %v3373_v6  ;;  %v1548_v37 = vpop.f32.mrf.mxu1  ;;  %v1441_v39 = vadd.f32 %v11065_v7, %v1304_v25  ;;  %v1716_v46 = vpop.f32.mrf.mxu0  ;;  %v13839_v5 = vand.u32 4294901760, %v11032_v17 }
 0x276   :  { %3408 = vmatprep.subr.mxu0 %v10812_v41  ;;  %v11177_v52 = vsub.f32 %v3376_v44, %v11143_v63  ;;  %v11179_v4 = vand.u32 4294901760, %v3372_v59  ;;  %v1549_v12 = vadd.f32 %v1548_v37, %v1443_v45  ;;  %v13840_v0 = vand.u32 4294901760, %v11042_v61  ;;  %3746 = vmatprep.mubr.f32.mxu1 %v13540_v33 }
 0x277   :  { %3587 = vmatprep.subr.mxu1 %v13839_v5  ;;  %3410 = vmatpush1.msra.mxu0 %v10824_v34  ;;  %v11186_v17 = vsub.f32 %v3375_v26, %v11151_v60  ;;  %v11188_v5 = vand.u32 4294901760, %v3371_v32  ;;  %v1818_v7 = vpop.f32.mrf.mxu1  ;;  %v13841_v2 = vand.u32 4294901760, %v11056_v28  ;;  %v3634_v44 = vand.u32 4294901760, %v11138_v35 }
 0x278   :  { %3593 = vmatpush1.msra.mxu1 %v13840_v0  ;;  %3412 = vmatprep.subr.mxu0 %v10835_v38  ;;  %v13842_v61 = vand.u32 4294901760, %v11108_v21  ;;  %v11199_v37 = vsub.f32 %v3374_v14, %v11159_v23  ;;  %v1717_v26 = vadd.f32 %v1716_v46, %v1549_v12  ;;  %v13843_v25 = vand.u32 4294901760, %v11061_v1 }
 0x279   :  { %3599 = vmatprep.subr.mxu1 %v13841_v2  ;;  %3414 = vmatpush1.msra.mxu0 %v10846_v9  ;;  %v13844_v28 = vand.u32 4294901760, %v11126_v55  ;;  %v13348_v35 = vand.u32 4294901760, %v11167_v27  ;;  %v11209_v9 = vsub.f32 %v3373_v6, %v11169_v47  ;;  %v13845_v45 = vand.u32 4294901760, %v11074_v18 }
 0x27a   :  { %v3645_v0 = vsub.f32 %v11108_v21, %v13842_v61  ;;  %3605 = vmatpush1.msra.mxu1 %v13843_v25  ;;  %3416 = vmatprep.subr.mxu0 %v10857_v56  ;;  %v1547_v61 = vadd.f32 %v1546_v49, %v1441_v39  ;;  %v13846_v46 = vand.u32 4294901760, %v11141_v40  ;;  %v11219_v12 = vsub.f32 %v3372_v59, %v11179_v4 }
 0x27b   :  { %v3651_v2 = vsub.f32 %v11126_v55, %v13844_v28  ;;  %3611 = vmatprep.subr.mxu1 %v13845_v45  ;;  %3418 = vmatpush1.msra.mxu0 %v10864_v29  ;;  %v13847_v25 = vand.u32 4294901760, %v11079_v24  ;;  %v3640_v49 = vand.u32 4294901760, %v3639_v62  ;;  %v13848_v18 = vand.u32 4294901760, %v11149_v42  ;;  %v1820_v28 = vpop.f32.mrf.mxu1 }
 0x27c   :  { %v3657_v1 = vsub.f32 %v11141_v40, %v13846_v46  ;;  %3420 = vmatprep.subr.mxu0 %v10874_v13  ;;  %v13347_v39 = vand.u32 4294901760, %v11186_v17  ;;  %v11229_v45 = vsub.f32 %v3371_v32, %v11188_v5  ;;  %v1715_v46 = vadd.f32 %v11132_v58, %v1547_v61  ;;  %3499 = vmatprep.mubr.f32.mxu0 %v13540_v33 }
 0x27d   :  { %3617 = vmatpush1.msra.mxu1 %v13847_v25  ;;  %v3663_v6 = vsub.f32 %v11149_v42, %v13848_v18  ;;  %v13849_v59 = vand.u32 4294901760, %v11098_v10  ;;  %3422 = vmatpush1.msra.mxu0 %v10882_v31  ;;  %v3646_v24 = vand.u32 4294901760, %v3645_v0  ;;  %v13850_v62 = vand.u32 4294901760, %v11157_v36 }
 0x27e   :  { %v13346_v18 = vand.u32 4294901760, %v11199_v37  ;;  %v1821_v14 = vadd.f32 %v1820_v28, %v1717_v26  ;;  %3424 = vmatprep.subr.mxu0 %v10884_v22  ;;  %v3652_v32 = vand.u32 4294901760, %v3651_v2  ;;  %v3675_v58 = vsub.f32 %v11167_v27, %v13348_v35  ;;  %v13868_v35 = vld [vmem:[#allocation8_spill] sm:$0xff] }
 0x27f   :  { %3623 = vmatprep.subr.mxu1 %v13849_v59  ;;  %v3669_v25 = vsub.f32 %v11157_v36, %v13850_v62  ;;  %v13345_v10 = vand.u32 4294901760, %v11209_v9  ;;  %3426 = vmatpush1.msra.mxu0 %v10898_v51  ;;  %v3658_v0 = vand.u32 4294901760, %v3657_v1  ;;  %v13851_v61 = vand.u32 4294901760, %v11177_v52 }
 0x280   :  { %3629 = vmatpush1.msra.mxu1 %v3628_v30  ;;  %v13343_v26 = vand.u32 4294901760, %v11219_v12  ;;  %3428 = vmatprep.subr.mxu0 %v10906_v53  ;;  %v3664_v30 = vand.u32 4294901760, %v3663_v6  ;;  %v3687_v2 = vsub.f32 %v11186_v17, %v13347_v39  ;;  %v13344_v28 = vand.u32 4294901760, %v11229_v45  ;;  %v13865_v39 = vld [vmem:[#allocation20_spill] sm:$0xff] }
 0x281   :  { %3635 = vmatprep.subr.mxu1 %v3634_v44  ;;  %v3681_v59 = vsub.f32 %v11177_v52, %v13851_v61  ;;  %v1819_v44 = vadd.f32 %v1818_v7, %v1715_v46  ;;  %3430 = vmatpush1.msra.mxu0 %v10908_v48  ;;  %v3670_v1 = vand.u32 4294901760, %v3669_v25  ;;  %v3693_v62 = vsub.f32 %v11199_v37, %v13346_v18  ;;  %v13864_v18 = vld [vmem:[#allocation16_spill] sm:$0xff] }
 0x282   :  { %3641 = vmatpush1.msra.mxu1 %v3640_v49  ;;  %v1823_v61 = vmul.f32 0.01, %v1821_v14  ;;  %3432 = vmatprep.subr.mxu0 %v10917_v20  ;;  %v3676_v49 = vand.u32 4294901760, %v3675_v58  ;;  %v3699_v6 = vsub.f32 %v11209_v9, %v13345_v10  ;;  %v3705_v46 = vsub.f32 %v11219_v12, %v13343_v26 }
 0x283   :  { %3647 = vmatprep.subr.mxu1 %v3646_v24  ;;  %3434 = vmatpush1.msra.mxu0 %v10919_v3  ;;  %v3682_v7 = vand.u32 4294901760, %v3681_v59  ;;  %v3688_v24 = vand.u32 4294901760, %v3687_v2  ;;  %v3711_v25 = vsub.f32 %v11229_v45, %v13344_v28  ;;  %v3694_v58 = vand.u32 4294901760, %v3693_v62  ;;  %v13853_v2 = vld [vmem:[#allocation33_spill] sm:$0xff]  ;;  %v2208_v28 = vpop.f32.mrf.mxu1 }
 0x284   :  { %3653 = vmatpush1.msra.mxu1 %v3652_v32  ;;  %3436 = vmatprep.subr.mxu0 %v10943_v43  ;;  %v11270_v32 = vand.u32 4294901760, %v1819_v44  ;;  %v3700_v59 = vand.u32 4294901760, %v3699_v6 }
 0x285   :  { %3659 = vmatprep.subr.mxu1 %v3658_v0  ;;  %3438 = vmatpush1.msra.mxu0 %v10969_v15  ;;  %v1824_v0 = vmax.f32 %v1821_v14, %v1823_v61  ;;  %v3712_v26 = vand.u32 4294901760, %v3711_v25  ;;  %v2210_v61 = vpop.f32.mrf.mxu1  ;;  %v13857_v25 = vld [vmem:[#allocation26_spill] sm:$0xff] }
 0x286   :  { %3665 = vmatpush1.msra.mxu1 %v3664_v30  ;;  %13852 = vst [vmem:[#allocation40_spill] sm:$0xff] %v11270_v32  ;;  %3440 = vmatprep.subr.mxu0 %v10995_v8  ;;  %v3706_v30 = vand.u32 4294901760, %v3705_v46  ;;  %v11277_v10 = vsub.f32 %v1819_v44, %v11270_v32  ;;  %v13855_v46 = vld [vmem:[#allocation13_spill] sm:$0xff] }
 0x287   :  { %3671 = vmatprep.subr.mxu1 %v3670_v1  ;;  %3442 = vmatpush1.msra.mxu0 %v11034_v50  ;;  %v11280_v14 = vand.u32 4294901760, %v1824_v0 }
 0x288   :  { %3677 = vmatpush1.msra.mxu1 %v3676_v49  ;;  %3444 = vmatprep.subr.mxu0 %v13853_v2  ;;  %v13350_v49 = vand.u32 4294901760, %v11277_v10 }
 0x289   :  { %3683 = vmatprep.subr.mxu1 %v3682_v7  ;;  %3446 = vmatpush1.msra.mxu0 %v11091_v16  ;;  %13854 = vst [vmem:[#allocation41_spill] sm:$0xff] %v11280_v14  ;;  %v1976_v1 = vpop.f32.mrf.mxu0  ;;  %v11293_v7 = vsub.f32 %v1824_v0, %v11280_v14 }
 0x28a   :  { %3689 = vmatpush1.msra.mxu1 %v3688_v24  ;;  %3448 = vmatprep.subr.mxu0 %v11101_v54  ;;  %v11284_v62 = vadd.f32 %v2208_v28, %v1976_v1  ;;  %v3503_v28 = vsub.f32 %v11277_v10, %v13350_v49  ;;  %v13860_v1 = vld [vmem:[#allocation22_spill] sm:$0xff]  ;;  %v13870_v49 = vld [vmem:[#allocation17_spill] sm:$0xff] }
 0x28b   :  { %3695 = vmatprep.subr.mxu1 %v3694_v58  ;;  %3450 = vmatpush1.msra.mxu0 %v11110_v19  ;;  %v1978_v44 = vpop.f32.mrf.mxu0  ;;  %v13349_v24 = vand.u32 4294901760, %v11293_v7 }
 0x28c   :  { %3701 = vmatpush1.msra.mxu1 %v3700_v59  ;;  %3452 = vmatprep.subr.mxu0 %v11120_v11  ;;  %v11290_v6 = vadd.f32 %v2210_v61, %v1978_v44  ;;  %v3504_v58 = vand.u32 4294901760, %v3503_v28  ;;  %v13858_v59 = vld [vmem:[#allocation10_spill] sm:$0xff]  ;;  %v13861_v44 = vld [vmem:[#allocation12_spill] sm:$0xff] }
 0x28d   :  { %3707 = vmatprep.subr.mxu1 %v3706_v30  ;;  %3454 = vmatpush1.msra.mxu0 %v11128_v57  ;;  %v3514_v0 = vsub.f32 %v11293_v7, %v13349_v24  ;;  %v13859_v30 = vld [vmem:[#allocation11_spill] sm:$0xff]  ;;  %v13862_v28 = vld [vmem:[#allocation14_spill] sm:$0xff]  ;;  %v13869_v24 = vld [vmem:[#allocation24_spill] sm:$0xff] }
 0x28e   :  { %3713 = vmatpush1.msra.mxu1 %v3712_v26  ;;  %v13856_v26 = vld [vmem:[#allocation9_spill] sm:$0xff]  ;;  %3456 = vmatprep.subr.mxu0 %v11143_v63 }
 0x28f   :  { %3748 = vmatmul.mubr.f32.vlgmr.msra.gmra.mxu1 %v11270_v32  ;;  %3907 = vmatprep.subr.mxu1 %v13855_v46  ;;  %v3515_v61 = vand.u32 4294901760, %v3514_v0  ;;  %v13866_v0 = vld [vmem:[#allocation27_spill] sm:$0xff] }
 0x290   :  { %3909 = vmatpush1.msra.mxu1 %v13856_v26  ;;  %3458 = vmatpush1.msra.mxu0 %v11151_v60  ;;  %v13872_v32 = vld [vmem:[#allocation23_spill] sm:$0xff] }
 0x291   :  { %3911 = vmatprep.subr.mxu1 %v10812_v41  ;;  %3753 = vmatprep.mubr.f32.mxu1 %v13540_v33 }
 0x292   :  { %3913 = vmatpush1.msra.mxu1 %v10824_v34  ;;  %3460 = vmatprep.subr.mxu0 %v11159_v23 }
 0x293   :  { %3755 = vmatmul.mubr.f32.gmra.mxu1 %v11280_v14  ;;  %3915 = vmatprep.subr.mxu1 %v10835_v38  ;;  %v13871_v14 = vld [vmem:[#allocation18_spill] sm:$0xff] }
 0x294   :  { %3462 = vmatpush1.msra.mxu0 %v11169_v47  ;;  %3917 = vmatpush1.msra.mxu1 %v13857_v25 }
 0x295   :  { %3464 = vmatprep.subr.mxu0 %v11179_v4  ;;  %3919 = vmatprep.subr.mxu1 %v10857_v56 }
 0x296   :  { %3466 = vmatpush1.msra.mxu0 %v11188_v5  ;;  %3921 = vmatpush1.msra.mxu1 %v10864_v29 }
 0x297   :  { %3505 = vmatmul.mubr.f32.vlgmr.msra.gmra.mxu0 %v3504_v58  ;;  %3763 = vmatprep.subr.mxu0 %v13858_v59  ;;  %v13863_v58 = vld [vmem:[#allocation15_spill] sm:$0xff] }
 0x298   :  { %3923 = vmatprep.subr.mxu1 %v10874_v13  ;;  %3766 = vmatpush1.msra.mxu0 %v13859_v30 }
 0x299   :  { %3925 = vmatpush1.msra.mxu1 %v10882_v31  ;;  %3769 = vmatprep.subr.mxu0 %v13860_v1 }
 0x29a   :  { %3927 = vmatprep.subr.mxu1 %v10884_v22  ;;  %3510 = vmatprep.mubr.f32.mxu0 %v13540_v33 }
 0x29b   :  { %3772 = vmatpush1.msra.mxu0 %v13861_v44  ;;  %3929 = vmatpush1.msra.mxu1 %v10898_v51 }
 0x29c   :  { %3516 = vmatmul.mubr.f32.gmra.mxu0 %v3515_v61  ;;  %3775 = vmatprep.subr.mxu0 %v13862_v28  ;;  %v13867_v61 = vld [vmem:[#allocation21_spill] sm:$0xff] }
 0x29d   :  { %3931 = vmatprep.subr.mxu1 %v10906_v53  ;;  %3778 = vmatpush1.msra.mxu0 %v13863_v58 }
 0x29e   :  { %3933 = vmatpush1.msra.mxu1 %v10908_v48  ;;  %3781 = vmatprep.subr.mxu0 %v13864_v18 }
 0x29f   :  { %3935 = vmatprep.subr.mxu1 %v10917_v20  ;;  %3784 = vmatpush1.msra.mxu0 %v13865_v39 }
 0x2a0   :  { %3937 = vmatpush1.msra.mxu1 %v10919_v3  ;;  %3787 = vmatprep.subr.mxu0 %v13866_v0 }
 0x2a1   :  { %3939 = vmatprep.subr.mxu1 %v10943_v43  ;;  %3790 = vmatpush1.msra.mxu0 %v13867_v61 }
 0x2a2   :  { %3941 = vmatpush1.msra.mxu1 %v10969_v15  ;;  %3793 = vmatprep.subr.mxu0 %v13868_v35  ;;  %v13873_v15 = vld [vmem:[#allocation25_spill] sm:$0xff] }
 0x2a3   :  { %3943 = vmatprep.subr.mxu1 %v10995_v8  ;;  %3796 = vmatpush1.msra.mxu0 %v13869_v24  ;;  %v13874_v8 = vld [vmem:[#allocation28_spill] sm:$0xff] }
 0x2a4   :  { %3945 = vmatpush1.msra.mxu1 %v11034_v50  ;;  %3799 = vmatprep.subr.mxu0 %v13870_v49  ;;  %v13875_v50 = vld [vmem:[#allocation31_spill] sm:$0xff] }
 0x2a5   :  { %3947 = vmatprep.subr.mxu1 %v13853_v2  ;;  %3802 = vmatpush1.msra.mxu0 %v13871_v14  ;;  %v13876_v2 = vld [vmem:[#allocation32_spill] sm:$0xff] }
 0x2a6   :  { %3949 = vmatpush1.msra.mxu1 %v11091_v16  ;;  %3805 = vmatprep.subr.mxu0 %v13872_v32  ;;  %v13877_v16 = vld [vmem:[#allocation34_spill] sm:$0xff] }
 0x2a7   :  { %3951 = vmatprep.subr.mxu1 %v11101_v54  ;;  %3808 = vmatpush1.msra.mxu0 %v13873_v15  ;;  %v2451_v15 = vpop.f32.mrf.mxu1 }
 0x2a8   :  { %3953 = vmatpush1.msra.mxu1 %v11110_v19  ;;  %3811 = vmatprep.subr.mxu0 %v13874_v8 }
 0x2a9   :  { %3955 = vmatprep.subr.mxu1 %v11120_v11  ;;  %3814 = vmatpush1.msra.mxu0 %v13875_v50 }
 0x2aa   :  { %3957 = vmatpush1.msra.mxu1 %v11128_v57  ;;  %3817 = vmatprep.subr.mxu0 %v13876_v2 }
 0x2ab   :  { %3959 = vmatprep.subr.mxu1 %v11143_v63  ;;  %3820 = vmatpush1.msra.mxu0 %v13877_v16  ;;  %v2345_v19 = vpop.f32.mrf.mxu0 }
 0x2ac   :  { %3961 = vmatpush1.msra.mxu1 %v11151_v60  ;;  %3823 = vmatprep.subr.mxu0 %v11108_v21  ;;  %v2346_v50 = vadd.f32 %v2345_v19, %v11284_v62  ;;  %v13878_v19 = vand.u32 4294901760, %v11277_v10 }
 0x2ad   :  { %3963 = vmatprep.subr.mxu1 %v11159_v23  ;;  %3826 = vmatpush1.msra.mxu0 %v11126_v55  ;;  %v2347_v2 = vpop.f32.mrf.mxu0  ;;  %v2453_v55 = vpop.f32.mrf.mxu1 }
 0x2ae   :  { %3965 = vmatpush1.msra.mxu1 %v11169_v47  ;;  %3829 = vmatprep.subr.mxu0 %v11141_v40  ;;  %v2348_v60 = vadd.f32 %v2347_v2, %v11290_v6  ;;  %v11370_v21 = vadd.f32 %v2451_v15, %v2346_v50  ;;  %v13879_v15 = vand.u32 4294901760, %v11293_v7  ;;  %v13894_v50 = vld [vmem:[#allocation30_spill] sm:$0xff]  ;;  %v13902_v6 = vld [vmem:[#allocation37_spill] sm:$0xff] }
 0x2af   :  { %3967 = vmatprep.subr.mxu1 %v11179_v4  ;;  %3832 = vmatpush1.msra.mxu0 %v11149_v42 }
 0x2b0   :  { %3969 = vmatpush1.msra.mxu1 %v11188_v5  ;;  %4002 = vmatprep.mubr.f32.mxu1 %v13540_v33  ;;  %v11377_v62 = vadd.f32 %v2453_v55, %v2348_v60  ;;  %v13880_v55 = vand.u32 4294901760, %v13858_v59  ;;  %v13892_v60 = vld [vmem:[#allocation19_spill] sm:$0xff] }
 0x2b1   :  { %3835 = vmatprep.subr.mxu0 %v11157_v36  ;;  %4006 = vmatmul.mubr.f32.vlgmr.msra.gmra.mxu1 %v13878_v19 }
 0x2b2   :  { %4197 = vmatprep.subr.mxu1 %v13855_v46  ;;  %3838 = vmatpush1.msra.mxu0 %v11167_v27  ;;  %v13906_v46 = vld [vmem:[#allocation32_spill] sm:$0xff] }
 0x2b3   :  { %4199 = vmatpush1.msra.mxu1 %v13856_v26  ;;  %3841 = vmatprep.subr.mxu0 %v11177_v52 }
 0x2b4   :  { %4201 = vmatprep.subr.mxu1 %v10812_v41  ;;  %3844 = vmatpush1.msra.mxu0 %v11186_v17  ;;  %v13881_v41 = vand.u32 4294901760, %v13859_v30 }
 0x2b5   :  { %4011 = vmatprep.mubr.f32.mxu1 %v13540_v33  ;;  %4203 = vmatpush1.msra.mxu1 %v10824_v34  ;;  %v13882_v34 = vand.u32 4294901760, %v13860_v1 }
 0x2b6   :  { %3847 = vmatprep.subr.mxu0 %v11199_v37  ;;  %4015 = vmatmul.mubr.f32.gmra.mxu1 %v13879_v15 }
 0x2b7   :  { %4205 = vmatprep.subr.mxu1 %v10835_v38  ;;  %3850 = vmatpush1.msra.mxu0 %v11209_v9  ;;  %v13883_v38 = vand.u32 4294901760, %v13861_v44 }
 0x2b8   :  { %4207 = vmatpush1.msra.mxu1 %v13857_v25  ;;  %3853 = vmatprep.subr.mxu0 %v11219_v12  ;;  %v13909_v25 = vld [vmem:[#allocation39_spill] sm:$0xff] }
 0x2b9   :  { %4209 = vmatprep.subr.mxu1 %v10857_v56  ;;  %3856 = vmatpush1.msra.mxu0 %v11229_v45  ;;  %v13884_v56 = vand.u32 4294901760, %v13862_v28  ;;  %v13915_v28 = vand.u32 4294901760, %v11149_v42  ;;  %v13921_v42 = vand.u32 4294901760, %v11186_v17 }
 0x2ba   :  { %3889 = vmatprep.mubr.f32.mxu0 %v13540_v33  ;;  %4211 = vmatpush1.msra.mxu1 %v10864_v29  ;;  %v13885_v29 = vand.u32 4294901760, %v13863_v58 }
 0x2bb   :  { %3892 = vmatmul.mubr.f32.vlgmr.msra.gmra.mxu0 %v11277_v10  ;;  %4024 = vmatprep.subr.mxu0 %v13880_v55  ;;  %v13900_v10 = vld [vmem:[#allocation25_spill] sm:$0xff] }
 0x2bc   :  { %4213 = vmatprep.subr.mxu1 %v10874_v13  ;;  %4028 = vmatpush1.msra.mxu0 %v13881_v41  ;;  %v13886_v13 = vand.u32 4294901760, %v13864_v18  ;;  %v13898_v18 = vld [vmem:[#allocation35_spill] sm:$0xff]  ;;  %v13901_v2 = vand.u32 4294901760, %v13900_v10  ;;  %v4322_v41 = vld [vmem:[#allocation2 + $0x528] sm:$0xff] }
 0x2bd   :  { %4215 = vmatpush1.msra.mxu1 %v10882_v31  ;;  %4032 = vmatprep.subr.mxu0 %v13882_v34  ;;  %v13887_v31 = vand.u32 4294901760, %v13865_v39  ;;  %v13896_v39 = vld [vmem:[#allocation33_spill] sm:$0xff] }
 0x2be   :  { %4217 = vmatprep.subr.mxu1 %v10884_v22  ;;  %3897 = vmatprep.mubr.f32.mxu0 %v13540_v33  ;;  %v13889_v22 = vand.u32 4294901760, %v13867_v61  ;;  %v13926_v61 = vand.u32 4294901760, %v11229_v45 }
 0x2bf   :  { %4036 = vmatpush1.msra.mxu0 %v13883_v38  ;;  %4219 = vmatpush1.msra.mxu1 %v10898_v51  ;;  %v13888_v51 = vand.u32 4294901760, %v13866_v0  ;;  %v13918_v0 = vld [vmem:[#allocation40_spill] sm:$0xff] }
 0x2c0   :  { %3900 = vmatmul.mubr.f32.gmra.mxu0 %v11293_v7  ;;  %4040 = vmatprep.subr.mxu0 %v13884_v56  ;;  %v13904_v7 = vld [vmem:[#allocation31_spill] sm:$0xff]  ;;  %v11520_v56 = vand.u32 4294901760, %v4322_v41 }
 0x2c1   :  { %4221 = vmatprep.subr.mxu1 %v10906_v53  ;;  %4044 = vmatpush1.msra.mxu0 %v13885_v29  ;;  %v13890_v53 = vld [vmem:[#allocation29_spill] sm:$0xff] }
 0x2c2   :  { %4223 = vmatpush1.msra.mxu1 %v10908_v48  ;;  %4048 = vmatprep.subr.mxu0 %v13886_v13  ;;  %v13891_v48 = vand.u32 4294901760, %v13868_v35  ;;  %v13899_v35 = vand.u32 4294901760, %v13872_v32  ;;  %v13907_v32 = vand.u32 4294901760, %v13906_v46  ;;  %v4321_v29 = vld [vmem:[#allocation2 + $0x4c8] sm:$0xff] }
 0x2c3   :  { %4225 = vmatprep.subr.mxu1 %v10917_v20  ;;  %4052 = vmatpush1.msra.mxu0 %v13887_v31  ;;  %v13893_v20 = vand.u32 4294901760, %v13869_v24  ;;  %v13908_v24 = vand.u32 4294901760, %v13877_v16  ;;  %v13914_v16 = vand.u32 4294901760, %v11141_v40  ;;  %v13919_v40 = vand.u32 4294901760, %v11167_v27 }
 0x2c4   :  { %4227 = vmatpush1.msra.mxu1 %v10919_v3  ;;  %4056 = vmatprep.subr.mxu0 %v13888_v51  ;;  %v13895_v3 = vand.u32 4294901760, %v13870_v49  ;;  %v13903_v49 = vand.u32 4294901760, %v13874_v8  ;;  %v13925_v27 = vand.u32 4294901760, %v11219_v12  ;;  %v4323_v12 = vld [vmem:[#allocation2 + $0x588] sm:$0xff]  ;;  %v11530_v51 = vsub.f32 %v4322_v41, %v11520_v56 }
 0x2c5   :  { %4229 = vmatprep.subr.mxu1 %v10943_v43  ;;  %4060 = vmatpush1.msra.mxu0 %v13889_v22  ;;  %v13897_v43 = vand.u32 4294901760, %v13871_v14  ;;  %v13905_v14 = vand.u32 4294901760, %v13904_v7  ;;  %v2723_v26 = vpop.f32.mrf.mxu1  ;;  %v11510_v45 = vand.u32 4294901760, %v4323_v12  ;;  %v11532_v22 = vand.u32 4294901760, %v4321_v29 }
 0x2c6   :  { %4231 = vmatpush1.msra.mxu1 %v13890_v53  ;;  %4064 = vmatprep.subr.mxu0 %v13891_v48  ;;  %v4320_v53 = vld [vmem:[#allocation2 + $0x468] sm:$0xff] }
 0x2c7   :  { %4233 = vmatprep.subr.mxu1 %v13892_v60  ;;  %4068 = vmatpush1.msra.mxu0 %v13893_v20  ;;  %v11518_v38 = vsub.f32 %v4323_v12, %v11510_v45  ;;  %v4319_v48 = vld [vmem:[#allocation2 + $0x408] sm:$0xff]  ;;  %v11535_v20 = vand.u32 4294901760, %v4320_v53 }
 0x2c8   :  { %4235 = vmatpush1.msra.mxu1 %v13894_v50  ;;  %4072 = vmatprep.subr.mxu0 %v13895_v3  ;;  %v4318_v60 = vld [vmem:[#allocation2 + $0x3a8] sm:$0xff]  ;;  %v11537_v50 = vand.u32 4294901760, %v4319_v48 }
 0x2c9   :  { %4237 = vmatprep.subr.mxu1 %v13896_v39  ;;  %4076 = vmatpush1.msra.mxu0 %v13897_v43  ;;  %v11527_v31 = vand.u32 4294901760, %v11518_v38  ;;  %v11539_v3 = vand.u32 4294901760, %v4318_v60  ;;  %v11552_v10 = vsub.f32 %v4320_v53, %v11535_v20 }
 0x2ca   :  { %4239 = vmatpush1.msra.mxu1 %v13898_v18  ;;  %4080 = vmatprep.subr.mxu0 %v13899_v35  ;;  %v11545_v18 = vand.u32 4294901760, %v11530_v51  ;;  %v11548_v35 = vsub.f32 %v4321_v29, %v11532_v22 }
 0x2cb   :  { %4241 = vmatprep.subr.mxu1 %v11101_v54  ;;  %4084 = vmatpush1.msra.mxu0 %v13901_v2  ;;  %13927 = vst [vmem:[#allocation9_spill] sm:$0xff] %v11527_v31  ;;  %v4437_v43 = vsub.f32 %v11518_v38, %v11527_v31  ;;  %v11555_v2 = vsub.f32 %v4319_v48, %v11537_v50  ;;  %v11568_v46 = vand.u32 4294901760, %v11552_v10 }
 0x2cc   :  { %4243 = vmatpush1.msra.mxu1 %v13902_v6  ;;  %4088 = vmatprep.subr.mxu0 %v13903_v49  ;;  %13928 = vst [vmem:[#allocation26_spill] sm:$0xff] %v11545_v18  ;;  %v11558_v6 = vsub.f32 %v4318_v60, %v11539_v3  ;;  %v4444_v7 = vsub.f32 %v11530_v51, %v11545_v18  ;;  %v4312_v60 = vld [vmem:[#allocation2 + $0x168] sm:$0xff] }
 0x2cd   :  { %4245 = vmatprep.subr.mxu1 %v11120_v11  ;;  %4092 = vmatpush1.msra.mxu0 %v13905_v14  ;;  %v2619_v54 = vpop.f32.mrf.mxu0  ;;  %v13910_v11 = vld [vmem:[#allocation36_spill] sm:$0xff]  ;;  %v4438_v49 = vand.u32 4294901760, %v4437_v43  ;;  %v11564_v14 = vand.u32 4294901760, %v11548_v35  ;;  %13930 = vst [vmem:[#allocation11_spill] sm:$0xff] %v11568_v46 }
 0x2ce   :  { %4247 = vmatpush1.msra.mxu1 %v11128_v57  ;;  %4096 = vmatprep.subr.mxu0 %v13907_v32  ;;  %v2620_v8 = vadd.f32 %v2619_v54, %v11370_v21  ;;  %v13911_v59 = vand.u32 4294901760, %v13910_v11  ;;  %v13912_v57 = vld [vmem:[#allocation38_spill] sm:$0xff]  ;;  %v2725_v21 = vpop.f32.mrf.mxu1  ;;  %v11571_v32 = vand.u32 4294901760, %v11555_v2 }
 0x2cf   :  { %4249 = vmatprep.subr.mxu1 %v11143_v63  ;;  %4100 = vmatpush1.msra.mxu0 %v13908_v24  ;;  %v2621_v30 = vpop.f32.mrf.mxu0  ;;  %v13913_v1 = vand.u32 4294901760, %v13912_v57  ;;  %13929 = vst [vmem:[#allocation10_spill] sm:$0xff] %v11564_v14  ;;  %v4445_v24 = vand.u32 4294901760, %v4444_v7 }
 0x2d0   :  { %4251 = vmatpush1.msra.mxu1 %v13909_v25  ;;  %4104 = vmatprep.subr.mxu0 %v13911_v59  ;;  %v11467_v44 = vadd.f32 %v2723_v26, %v2620_v8  ;;  %v2622_v63 = vadd.f32 %v2621_v30, %v11377_v62  ;;  %13931 = vst [vmem:[#allocation22_spill] sm:$0xff] %v11571_v32  ;;  %v11574_v26 = vand.u32 4294901760, %v11558_v6  ;;  %v4317_v59 = vld [vmem:[#allocation2 + $0x348] sm:$0xff] }
 0x2d1   :  { %4253 = vmatprep.subr.mxu1 %v11159_v23  ;;  %4108 = vmatpush1.msra.mxu0 %v13913_v1  ;;  %v13917_v23 = vand.u32 4294901760, %v11157_v36  ;;  %v13923_v36 = vld [vmem:[#allocation41_spill] sm:$0xff]  ;;  %v4451_v8 = vsub.f32 %v11548_v35, %v11564_v14  ;;  %v4458_v25 = vsub.f32 %v11552_v10, %v11568_v46  ;;  %v4465_v11 = vsub.f32 %v11555_v2, %v11571_v32 }
 0x2d2   :  { %4255 = vmatpush1.msra.mxu1 %v11169_v47  ;;  %4112 = vmatprep.subr.mxu0 %v13914_v16  ;;  %v11476_v58 = vadd.f32 %v2725_v21, %v2622_v63  ;;  %v13922_v47 = vand.u32 4294901760, %v11199_v37  ;;  %13932 = vst [vmem:[#allocation12_spill] sm:$0xff] %v11574_v26  ;;  %v4472_v1 = vsub.f32 %v11558_v6, %v11574_v26  ;;  %v11587_v63 = vand.u32 4294901760, %v4317_v59  ;;  %v4316_v21 = vld [vmem:[#allocation2 + $0x2e8] sm:$0xff] }
 0x2d3   :  { %4257 = vmatprep.subr.mxu1 %v11179_v4  ;;  %4116 = vmatpush1.msra.mxu0 %v13915_v28  ;;  %v13920_v4 = vand.u32 4294901760, %v11177_v52  ;;  %v4452_v57 = vand.u32 4294901760, %v4451_v8  ;;  %v4459_v16 = vand.u32 4294901760, %v4458_v25  ;;  %v4466_v28 = vand.u32 4294901760, %v4465_v11  ;;  %v4311_v8 = vld [vmem:[#allocation2 + $0x108] sm:$0xff] }
 0x2d4   :  { %13916 = vst [vmem:[#allocation13_spill] sm:$0xff] %v11476_v58  ;;  %4259 = vmatpush1.msra.mxu1 %v11188_v5  ;;  %4292 = vmatprep.mubr.f32.mxu1 %v13540_v33  ;;  %v13924_v5 = vand.u32 4294901760, %v11209_v9  ;;  %v4324_v9 = vld [vmem:[#allocation2 + $0x5e8] sm:$0xff]  ;;  %v11649_v11 = vand.u32 4294901760, %v4311_v8 }
 0x2d5   :  { %4120 = vmatprep.subr.mxu0 %v13917_v23  ;;  %4294 = vmatmul.mubr.f32.vlgmr.msra.gmra.mxu1 %v13918_v0  ;;  %v11505_v15 = vand.u32 4294901760, %v4324_v9  ;;  %v11592_v23 = vsub.f32 %v4317_v59, %v11587_v63 }
 0x2d6   :  { %4124 = vmatpush1.msra.mxu0 %v13919_v40  ;;  %4299 = vmatprep.mubr.f32.mxu1 %v13540_v33  ;;  %v4315_v40 = vld [vmem:[#allocation2 + $0x288] sm:$0xff] }
 0x2d7   :  { %4128 = vmatprep.subr.mxu0 %v13920_v4  ;;  %4181 = vmatprep.mubr.f32.mxu0 %v13540_v33  ;;  %v11508_v55 = vsub.f32 %v4324_v9, %v11505_v15  ;;  %v4473_v4 = vand.u32 4294901760, %v4472_v1 }
 0x2d8   :  { %4132 = vmatpush1.msra.mxu0 %v13921_v42  ;;  %v11599_v42 = vand.u32 4294901760, %v11592_v23 }
 0x2d9   :  { %4136 = vmatprep.subr.mxu0 %v13922_v47  ;;  %4301 = vmatmul.mubr.f32.gmra.mxu1 %v13923_v36  ;;  %v11515_v34 = vand.u32 4294901760, %v11508_v55 }
 0x2da   :  { %4140 = vmatpush1.msra.mxu0 %v13924_v5  ;;  %13933 = vst [vmem:[#allocation14_spill] sm:$0xff] %v11599_v42  ;;  %v4314_v5 = vld [vmem:[#allocation2 + $0x228] sm:$0xff] }
 0x2db   :  { %4144 = vmatprep.subr.mxu0 %v13925_v27  ;;  %v4430_v13 = vsub.f32 %v11508_v55, %v11515_v34  ;;  %v4479_v27 = vsub.f32 %v11592_v23, %v11599_v42 }
 0x2dc   :  { %4148 = vmatpush1.msra.mxu0 %v13926_v61 }
 0x2dd   :  { %4183 = vmatmul.mubr.f32.vlgmr.msra.gmra.mxu0 %v13918_v0  ;;  %8144 = vmatprep.subr.mxu0 %v11505_v15  ;;  %v4431_v39 = vand.u32 4294901760, %v4430_v13  ;;  %v11594_v0 = vand.u32 4294901760, %v4316_v21  ;;  %v4480_v12 = vand.u32 4294901760, %v4479_v27 }
 0x2de   :  { %4188 = vmatprep.mubr.f32.mxu0 %v13540_v33  ;;  %8145 = vmatpush3.msra.mxu0 %v11505_v15 }
 0x2df   :  { %8146 = vmatprep.subr.mxu0 %v11510_v45  ;;  %8179 = vmatprep.subr.mxu1 %v4431_v39  ;;  %v11602_v47 = vsub.f32 %v4316_v21, %v11594_v0 }
 0x2e0   :  { %8147 = vmatpush3.msra.mxu0 %v11510_v45  ;;  %8180 = vmatpush3.msra.mxu1 %v4431_v39 }
 0x2e1   :  { %4190 = vmatmul.mubr.f32.gmra.mxu0 %v13923_v36  ;;  %8148 = vmatprep.subr.mxu0 %v11520_v56  ;;  %v11604_v36 = vand.u32 4294901760, %v4315_v40  ;;  %v11611_v61 = vand.u32 4294901760, %v11602_v47 }
 0x2e2   :  { %8149 = vmatpush3.msra.mxu0 %v11520_v56  ;;  %8181 = vmatprep.subr.mxu1 %v4438_v49 }
 0x2e3   :  { %8150 = vmatprep.subr.mxu0 %v11532_v22  ;;  %8182 = vmatpush3.msra.mxu1 %v4438_v49  ;;  %13934 = vst [vmem:[#allocation15_spill] sm:$0xff] %v11611_v61  ;;  %v4486_v41 = vsub.f32 %v11602_v47, %v11611_v61  ;;  %v11637_v49 = vand.u32 4294901760, %v4312_v60 }
 0x2e4   :  { %8151 = vmatpush3.msra.mxu0 %v11532_v22  ;;  %8183 = vmatprep.subr.mxu1 %v4445_v24 }
 0x2e5   :  { %8152 = vmatprep.subr.mxu0 %v11535_v20  ;;  %8184 = vmatpush3.msra.mxu1 %v4445_v24  ;;  %v4487_v39 = vand.u32 4294901760, %v4486_v41  ;;  %v11647_v25 = vsub.f32 %v4312_v60, %v11637_v49 }
 0x2e6   :  { %8153 = vmatpush3.msra.mxu0 %v11535_v20  ;;  %8185 = vmatprep.subr.mxu1 %v4452_v57 }
 0x2e7   :  { %v2966_v52 = vpop.f32.mrf.mxu1  ;;  %8154 = vmatprep.subr.mxu0 %v11537_v50  ;;  %8186 = vmatpush3.msra.mxu1 %v4452_v57  ;;  %v4310_v57 = vld [vmem:[#allocation2 + $0xa8] sm:$0xff]  ;;  %v11659_v1 = vand.u32 4294901760, %v11647_v25 }
 0x2e8   :  { %8155 = vmatpush3.msra.mxu0 %v11537_v50  ;;  %8187 = vmatprep.subr.mxu1 %v4459_v16  ;;  %v11664_v21 = vand.u32 4294901760, %v4310_v57 }
 0x2e9   :  { %v8003_v17 = vpop.f32.mrf.mxu1  ;;  %8156 = vmatprep.subr.mxu0 %v11539_v3  ;;  %8188 = vmatpush3.msra.mxu1 %v4459_v16  ;;  %13938 = vst [vmem:[#allocation21_spill] sm:$0xff] %v11659_v1  ;;  %v11662_v16 = vsub.f32 %v4311_v8, %v11649_v11 }
 0x2ea   :  { %8157 = vmatpush3.msra.mxu0 %v11539_v3  ;;  %8189 = vmatprep.subr.mxu1 %v4466_v28  ;;  %v11616_v17 = vand.u32 4294901760, %v4314_v5 }
 0x2eb   :  { %8158 = vmatprep.subr.mxu0 %v11587_v63  ;;  %8190 = vmatpush3.msra.mxu1 %v4466_v28  ;;  %v11673_v27 = vand.u32 4294901760, %v11662_v16 }
 0x2ec   :  { %8159 = vmatpush3.msra.mxu0 %v11587_v63  ;;  %8191 = vmatprep.subr.mxu1 %v4473_v4  ;;  %v11628_v53 = vsub.f32 %v4314_v5, %v11616_v17  ;;  %v4514_v5 = vsub.f32 %v11647_v25, %v11659_v1 }
 0x2ed   :  { %8160 = vmatprep.subr.mxu0 %v11594_v0  ;;  %8192 = vmatpush3.msra.mxu1 %v4473_v4  ;;  %v4309_v4 = vld [vmem:[#allocation2 + $0x48] sm:$0xff]  ;;  %13939 = vst [vmem:[#allocation8_spill] sm:$0xff] %v11673_v27  ;;  %v4521_v41 = vsub.f32 %v11662_v16, %v11673_v27 }
 0x2ee   :  { %8161 = vmatpush3.msra.mxu0 %v11594_v0  ;;  %8193 = vmatprep.subr.mxu1 %v4480_v12  ;;  %v11640_v7 = vand.u32 4294901760, %v11628_v53 }
 0x2ef   :  { %v2815_v37 = vpop.f32.mrf.mxu0  ;;  %8162 = vmatprep.subr.mxu0 %v11604_v36  ;;  %8194 = vmatpush3.msra.mxu1 %v4480_v12  ;;  %v4515_v12 = vand.u32 4294901760, %v4514_v5 }
 0x2f0   :  { %v11503_v19 = vadd.f32 %v2966_v52, %v2815_v37  ;;  %v11614_v52 = vsub.f32 %v4315_v40, %v11604_v36  ;;  %8163 = vmatpush3.msra.mxu0 %v11604_v36  ;;  %13936 = vst [vmem:[#allocation20_spill] sm:$0xff] %v11640_v7  ;;  %8195 = vmatprep.subr.mxu1 %v4487_v39 }
 0x2f1   :  { %v7968_v62 = vpop.f32.mrf.mxu0  ;;  %8164 = vmatprep.subr.mxu0 %v11616_v17  ;;  %8196 = vmatpush3.msra.mxu1 %v4487_v39  ;;  %v4500_v59 = vsub.f32 %v11628_v53, %v11640_v7  ;;  %v4522_v39 = vand.u32 4294901760, %v4521_v41 }
 0x2f2   :  { %v4313_v62 = vld [vmem:[#allocation2 + $0x1c8] sm:$0xff]  ;;  %v11624_v29 = vand.u32 4294901760, %v11614_v52  ;;  %8165 = vmatpush3.msra.mxu0 %v11616_v17 }
 0x2f3   :  { %v11630_v48 = vand.u32 4294901760, %v4313_v62  ;;  %v4501_v28 = vand.u32 4294901760, %v4500_v59 }
 0x2f4   :  { %13935 = vst [vmem:[#allocation16_spill] sm:$0xff] %v11624_v29  ;;  %v4493_v43 = vsub.f32 %v11614_v52, %v11624_v29 }
 0x2f5   :  { %v11643_v24 = vsub.f32 %v4313_v62, %v11630_v48  ;;  %8166 = vmatprep.subr.mxu0 %v11630_v48  ;;  %v11678_v62 = vand.u32 4294901760, %v4309_v4 }
 0x2f6   :  { %8167 = vmatpush3.msra.mxu0 %v11630_v48 }
 0x2f7   :  { %8168 = vmatprep.subr.mxu0 %v11637_v49  ;;  %v11688_v60 = vsub.f32 %v4309_v4, %v11678_v62 }
 0x2f8   :  { %8169 = vmatpush3.msra.mxu0 %v11637_v49 }
 0x2f9   :  { %8170 = vmatprep.subr.mxu0 %v11649_v11  ;;  %v11695_v8 = vand.u32 4294901760, %v11688_v60 }
 0x2fa   :  { %8171 = vmatpush3.msra.mxu0 %v11649_v11 }
 0x2fb   :  { %8172 = vmatprep.subr.mxu0 %v11664_v21  ;;  %13941 = vst [vmem:[#allocation17_spill] sm:$0xff] %v11695_v8  ;;  %v4535_v59 = vsub.f32 %v11688_v60, %v11695_v8 }
 0x2fc   :  { %8173 = vmatpush3.msra.mxu0 %v11664_v21 }
 0x2fd   :  { %8174 = vmatprep.subr.mxu0 %v11678_v62 }
 0x2fe   :  { %8175 = vmatpush3.msra.mxu0 %v11678_v62 }
 0x2ff   :  { %8214 = vmatprep.subr.mxu0 %v11508_v55 }
 0x309   :  { %v3159_v54 = vpop.f32.mrf.mxu1 }
 0x30b   :  { %v8073_v30 = vpop.f32.mrf.mxu1 }
 0x30c   :  { %v11655_v30 = vand.u32 4294901760, %v11643_v24 }
 0x30e   :  { %13937 = vst [vmem:[#allocation27_spill] sm:$0xff] %v11655_v30  ;;  %v4507_v40 = vsub.f32 %v11643_v24, %v11655_v30 }
 0x311   :  { %v3070_v37 = vpop.f32.mrf.mxu0 }
 0x312   :  { %v3071_v9 = vadd.f32 %v3070_v37, %v11503_v19  ;;  %v11676_v37 = vsub.f32 %v4310_v57, %v11664_v21  ;;  %v4536_v57 = vand.u32 4294901760, %v4535_v59 }
 0x313   :  { %v8038_v13 = vpop.f32.mrf.mxu0 }
 0x314   :  { %v11633_v19 = vadd.f32 %v3159_v54, %v3071_v9  ;;  %v4494_v54 = vand.u32 4294901760, %v4493_v43  ;;  %v4508_v9 = vand.u32 4294901760, %v4507_v40  ;;  %v11685_v13 = vand.u32 4294901760, %v11676_v37 }
 0x316   :  { %8197 = vmatprep.subr.mxu1 %v4494_v54  ;;  %13940 = vst [vmem:[#allocation24_spill] sm:$0xff] %v11685_v13  ;;  %v4528_v43 = vsub.f32 %v11676_v37, %v11685_v13 }
 0x317   :  { %8198 = vmatpush3.msra.mxu1 %v4494_v54 }
 0x318   :  { %8199 = vmatprep.subr.mxu1 %v4501_v28  ;;  %v4529_v54 = vand.u32 4294901760, %v4528_v43 }
 0x319   :  { %8200 = vmatpush3.msra.mxu1 %v4501_v28 }
 0x31a   :  { %8201 = vmatprep.subr.mxu1 %v4508_v9 }
 0x31b   :  { %8202 = vmatpush3.msra.mxu1 %v4508_v9 }
 0x31c   :  { %8203 = vmatprep.subr.mxu1 %v4515_v12 }
 0x31d   :  { %8204 = vmatpush3.msra.mxu1 %v4515_v12 }
 0x31e   :  { %8205 = vmatprep.subr.mxu1 %v4522_v39 }
 0x31f   :  { %8206 = vmatpush3.msra.mxu1 %v4522_v39 }
 0x320   :  { %8207 = vmatprep.subr.mxu1 %v4529_v54 }
 0x321   :  { %8208 = vmatpush3.msra.mxu1 %v4529_v54 }
 0x322   :  { %8209 = vmatprep.subr.mxu1 %v4536_v57 }
 0x323   :  { %8210 = vmatpush3.msra.mxu1 %v4536_v57 }
 0x324   :  { %8249 = vmatprep.subr.mxu1 %v11505_v15 }
 0x32b   :  { %v3365_v28 = vpop.f32.mrf.mxu1 }
 0x32d   :  { %v8143_v40 = vpop.f32.mrf.mxu1 }
 0x334   :  { %v3278_v4 = vpop.f32.mrf.mxu0 }
 0x335   :  { %v3279_v5 = vadd.f32 %v3278_v4, %v11633_v19 }
 0x336   :  { %v8108_v9 = vpop.f32.mrf.mxu0 }
 0x337   :  { %v11703_v12 = vadd.f32 %v3365_v28, %v3279_v5 }
 0x339   :  { %13942 = vst [vmem:[#allocation18_spill] sm:$0xff] %v11703_v12 }
 0x34f   :  { %v3749_v41 = vpop.f32.mrf.mxu1 }
 0x351   :  { %v3751_v43 = vpop.f32.mrf.mxu1 }
 0x353   :  { %v3756_v39 = vpop.f32.mrf.mxu1 }
 0x355   :  { %v3758_v54 = vpop.f32.mrf.mxu1 }
 0x357   :  { %v3506_v58 = vpop.f32.mrf.mxu0 }
 0x358   :  { %v3750_v61 = vadd.f32 %v3749_v41, %v3506_v58 }
 0x359   :  { %v3508_v8 = vpop.f32.mrf.mxu0 }
 0x35a   :  { %v3752_v42 = vadd.f32 %v3751_v43, %v3508_v8 }
 0x35c   :  { %v3517_v59 = vpop.f32.mrf.mxu0 }
 0x35d   :  { %v3757_v13 = vadd.f32 %v3756_v39, %v3517_v59 }
 0x35e   :  { %v3519_v33 = vpop.f32.mrf.mxu0 }
 0x35f   :  { %v3759_v57 = vadd.f32 %v3758_v54, %v3519_v33 }
 0x371   :  { %v4007_v27 = vpop.f32.mrf.mxu1 }
 0x373   :  { %v4009_v30 = vpop.f32.mrf.mxu1 }
 0x376   :  { %v4016_v7 = vpop.f32.mrf.mxu1 }
 0x378   :  { %v4018_v9 = vpop.f32.mrf.mxu1 }
 0x37b   :  { %v3893_v1 = vpop.f32.mrf.mxu0 }
 0x37c   :  { %v3894_v39 = vadd.f32 %v3893_v1, %v3750_v61  ;;  %v5037_v1 = vld [vmem:[#allocation2 + $0x470] sm:$0xff] }
 0x37d   :  { %v3895_v40 = vpop.f32.mrf.mxu0 }
 0x37e   :  { %v3896_v59 = vadd.f32 %v3895_v40, %v3752_v42  ;;  %v4008_v26 = vadd.f32 %v4007_v27, %v3894_v39  ;;  %v5040_v42 = vld [vmem:[#allocation2 + $0x590] sm:$0xff] }
 0x380   :  { %v3901_v29 = vpop.f32.mrf.mxu0  ;;  %v4010_v46 = vadd.f32 %v4009_v30, %v3896_v59 }
 0x381   :  { %v3902_v19 = vadd.f32 %v3901_v29, %v3757_v13 }
 0x382   :  { %v3903_v4 = vpop.f32.mrf.mxu0 }
 0x383   :  { %v3904_v28 = vadd.f32 %v3903_v4, %v3759_v57  ;;  %v11705_v5 = vadd.f32 %v4016_v7, %v3902_v19 }
 0x385   :  { %v11707_v12 = vadd.f32 %v4018_v9, %v3904_v28  ;;  %v5035_v28 = vld [vmem:[#allocation2 + $0x3b0] sm:$0xff] }
 0x395   :  { %v4295_v33 = vpop.f32.mrf.mxu1 }
 0x397   :  { %v4297_v29 = vpop.f32.mrf.mxu1 }
 0x39d   :  { %v4184_v54 = vpop.f32.mrf.mxu0 }
 0x39e   :  { %v4185_v32 = vadd.f32 %v4184_v54, %v4008_v26 }
 0x39f   :  { %v4186_v14 = vpop.f32.mrf.mxu0 }
 0x3a0   :  { %v4296_v18 = vadd.f32 %v4295_v33, %v4185_v32  ;;  %v4187_v31 = vadd.f32 %v4186_v14, %v4010_v46  ;;  %v11916_v33 = vand.u32 4294901760, %v5035_v28 }
 0x3a2   :  { %v4307_v13 = vmul.f32 %v4296_v18, %v11467_v44  ;;  %v4298_v7 = vadd.f32 %v4297_v29, %v4187_v31  ;;  %v5034_v29 = vld [vmem:[#allocation2 + $0x350] sm:$0xff] }
 0x3a4   :  { %v11710_v57 = vand.u32 4294901760, %v4307_v13  ;;  %v4308_v19 = vmul.f32 %v4298_v7, %v11467_v44 }
 0x3a6   :  { %v4407_v58 = vsub.f32 %v4307_v13, %v11710_v57  ;;  %v11714_v61 = vand.u32 4294901760, %v4308_v19  ;;  %8211 = vmatprep.mubr.f32.mxu1 %v11710_v57 }
 0x3a8   :  { %v11718_v26 = vsub.f32 %v4308_v19, %v11714_v61  ;;  %8212 = vmatmul.mubr.f32.vlgmr.msra.gmra.mxu1 %v11714_v61  ;;  %v4408_v14 = vand.u32 4294901760, %v4407_v58  ;;  %v11926_v19 = vand.u32 4294901760, %v5034_v29 }
 0x3a9   :  { %8250 = vmatpush3.msra.mxu1 %v11505_v15 }
 0x3aa   :  { %v4418_v31 = vand.u32 4294901760, %v11718_v26  ;;  %8251 = vmatprep.subr.mxu1 %v11510_v45  ;;  %8281 = vmatprep.mubr.f32.mxu1 %v4408_v14  ;;  %v4409_v44 = vsub.f32 %v4407_v58, %v4408_v14 }
 0x3ab   :  { %8252 = vmatpush3.msra.mxu1 %v11510_v45 }
 0x3ac   :  { %v4419_v18 = vsub.f32 %v11718_v26, %v4418_v31  ;;  %8253 = vmatprep.subr.mxu1 %v11520_v56  ;;  %v4410_v46 = vand.u32 4294901760, %v4409_v44 }
 0x3ad   :  { %8254 = vmatpush3.msra.mxu1 %v11520_v56 }
 0x3ae   :  { %v4420_v32 = vand.u32 4294901760, %v4419_v18  ;;  %8255 = vmatprep.subr.mxu1 %v11532_v22  ;;  %8176 = vmatprep.mubr.f32.mxu0 %v4410_v46  ;;  %v5032_v46 = vld [vmem:[#allocation2 + $0x290] sm:$0xff] }
 0x3af   :  { %8256 = vmatpush3.msra.mxu1 %v11532_v22 }
 0x3b0   :  { %8257 = vmatprep.subr.mxu1 %v11535_v20  ;;  %8177 = vmatmul.mubr.f32.vlgmr.msra.gmra.mxu0 %v4420_v32 }
 0x3b1   :  { %8215 = vmatpush3.msra.mxu0 %v11508_v55  ;;  %8258 = vmatpush3.msra.mxu1 %v11535_v20  ;;  %v13944_v55 = vld [vmem:[#allocation26_spill] sm:$0xff] }
 0x3b2   :  { %8216 = vmatprep.subr.mxu0 %v11518_v38  ;;  %8246 = vmatprep.mubr.f32.mxu0 %v4407_v58 }
 0x3b3   :  { %8259 = vmatprep.subr.mxu1 %v11537_v50  ;;  %8217 = vmatpush3.msra.mxu0 %v11518_v38  ;;  %v13947_v38 = vld [vmem:[#allocation22_spill] sm:$0xff] }
 0x3b4   :  { %8260 = vmatpush3.msra.mxu1 %v11537_v50  ;;  %8218 = vmatprep.subr.mxu0 %v11530_v51 }
 0x3b5   :  { %8261 = vmatprep.subr.mxu1 %v11539_v3  ;;  %8219 = vmatpush3.msra.mxu0 %v11530_v51  ;;  %v13949_v51 = vld [vmem:[#allocation14_spill] sm:$0xff] }
 0x3b6   :  { %8262 = vmatpush3.msra.mxu1 %v11539_v3  ;;  %8220 = vmatprep.subr.mxu0 %v11548_v35 }
 0x3b7   :  { %8263 = vmatprep.subr.mxu1 %v11587_v63  ;;  %8221 = vmatpush3.msra.mxu0 %v11548_v35  ;;  %v13954_v35 = vld [vmem:[#allocation21_spill] sm:$0xff] }
 0x3b8   :  { %8264 = vmatpush3.msra.mxu1 %v11587_v63  ;;  %8222 = vmatprep.subr.mxu0 %v11552_v10 }
 0x3b9   :  { %8265 = vmatprep.subr.mxu1 %v11594_v0  ;;  %8223 = vmatpush3.msra.mxu0 %v11552_v10  ;;  %v13955_v10 = vld [vmem:[#allocation8_spill] sm:$0xff] }
 0x3ba   :  { %8266 = vmatpush3.msra.mxu1 %v11594_v0  ;;  %8224 = vmatprep.subr.mxu0 %v11555_v2 }
 0x3bb   :  { %8267 = vmatprep.subr.mxu1 %v11604_v36  ;;  %8225 = vmatpush3.msra.mxu0 %v11555_v2  ;;  %v13956_v2 = vmov 0.0  }
 0x3bc   :  { %8268 = vmatpush3.msra.mxu1 %v11604_v36  ;;  %8226 = vmatprep.subr.mxu0 %v11558_v6 }
 0x3bd   :  { %8269 = vmatprep.subr.mxu1 %v11616_v17  ;;  %8227 = vmatpush3.msra.mxu0 %v11558_v6  ;;  %v13957_v6 = vld [vmem:[#allocation24_spill] sm:$0xff] }
 0x3be   :  { %8270 = vmatpush3.msra.mxu1 %v11616_v17  ;;  %8228 = vmatprep.subr.mxu0 %v11592_v23 }
 0x3bf   :  { %8271 = vmatprep.subr.mxu1 %v11630_v48  ;;  %8229 = vmatpush3.msra.mxu0 %v11592_v23  ;;  %v5041_v23 = vld [vmem:[#allocation2 + $0x5f0] sm:$0xff] }
 0x3c0   :  { %8272 = vmatpush3.msra.mxu1 %v11630_v48  ;;  %8230 = vmatprep.subr.mxu0 %v11602_v47 }
 0x3c1   :  { %8273 = vmatprep.subr.mxu1 %v11637_v49  ;;  %8231 = vmatpush3.msra.mxu0 %v11602_v47 }
 0x3c2   :  { %8274 = vmatpush3.msra.mxu1 %v11637_v49  ;;  %8232 = vmatprep.subr.mxu0 %v11614_v52 }
 0x3c3   :  { %8275 = vmatprep.subr.mxu1 %v11649_v11  ;;  %8233 = vmatpush3.msra.mxu0 %v11614_v52  ;;  %v5039_v52 = vld [vmem:[#allocation2 + $0x530] sm:$0xff] }
 0x3c4   :  { %8276 = vmatpush3.msra.mxu1 %v11649_v11  ;;  %8234 = vmatprep.subr.mxu0 %v11628_v53 }
 0x3c5   :  { %8277 = vmatprep.subr.mxu1 %v11664_v21  ;;  %8235 = vmatpush3.msra.mxu0 %v11628_v53 }
 0x3c6   :  { %8278 = vmatpush3.msra.mxu1 %v11664_v21  ;;  %8236 = vmatprep.subr.mxu0 %v11643_v24 }
 0x3c7   :  { %8279 = vmatprep.subr.mxu1 %v11678_v62  ;;  %8237 = vmatpush3.msra.mxu0 %v11643_v24 }
 0x3c8   :  { %8280 = vmatpush3.msra.mxu1 %v11678_v62  ;;  %8238 = vmatprep.subr.mxu0 %v11647_v25 }
 0x3c9   :  { %8282 = vmatmul.mubr.f32.vlgmr.msra.gmra.mxu1 %v4418_v31  ;;  %8319 = vmatprep.subr.mxu1 %v11505_v15  ;;  %v11939_v31 = vsub.f32 %v5034_v29, %v11926_v19 }
 0x3ca   :  { %8239 = vmatpush3.msra.mxu0 %v11647_v25  ;;  %8320 = vmatpush3.msra.mxu1 %v11505_v15  ;;  %v13943_v15 = vld [vmem:[#allocation9_spill] sm:$0xff] }
 0x3cb   :  { %8351 = vmatprep.mubr.f32.mxu1 %v11710_v57  ;;  %8240 = vmatprep.subr.mxu0 %v11662_v16 }
 0x3cc   :  { %8321 = vmatprep.subr.mxu1 %v11510_v45  ;;  %8241 = vmatpush3.msra.mxu0 %v11662_v16 }
 0x3cd   :  { %8322 = vmatpush3.msra.mxu1 %v11510_v45  ;;  %8242 = vmatprep.subr.mxu0 %v11676_v37  ;;  %v13945_v45 = vld [vmem:[#allocation10_spill] sm:$0xff] }
 0x3ce   :  { %8323 = vmatprep.subr.mxu1 %v11520_v56  ;;  %8243 = vmatpush3.msra.mxu0 %v11676_v37 }
 0x3cf   :  { %8324 = vmatpush3.msra.mxu1 %v11520_v56  ;;  %8244 = vmatprep.subr.mxu0 %v11688_v60  ;;  %v13948_v56 = vld [vmem:[#allocation12_spill] sm:$0xff] }
 0x3d0   :  { %8325 = vmatprep.subr.mxu1 %v11532_v22  ;;  %8245 = vmatpush3.msra.mxu0 %v11688_v60  ;;  %v5036_v60 = vld [vmem:[#allocation2 + $0x410] sm:$0xff] }
 0x3d1   :  { %8326 = vmatpush3.msra.mxu1 %v11532_v22  ;;  %8247 = vmatmul.mubr.f32.vlgmr.msra.gmra.mxu0 %v11718_v26  ;;  %v13950_v22 = vld [vmem:[#allocation15_spill] sm:$0xff]  ;;  %v11903_v40 = vand.u32 4294901760, %v5036_v60 }
 0x3d2   :  { %8284 = vmatprep.subr.mxu0 %v11515_v34  ;;  %8327 = vmatprep.subr.mxu1 %v11535_v20 }
 0x3d3   :  { %8285 = vmatpush3.msra.mxu0 %v11515_v34  ;;  %8316 = vmatprep.mubr.f32.mxu0 %v11710_v57  ;;  %v13946_v34 = vld [vmem:[#allocation11_spill] sm:$0xff]  ;;  %v11914_v59 = vsub.f32 %v5036_v60, %v11903_v40  ;;  %v11924_v57 = vsub.f32 %v5035_v28, %v11916_v33 }
 0x3d4   :  { %8328 = vmatpush3.msra.mxu1 %v11535_v20  ;;  %8286 = vmatprep.subr.mxu0 %v13943_v15  ;;  %v13951_v20 = vld [vmem:[#allocation16_spill] sm:$0xff] }
 0x3d5   :  { %8329 = vmatprep.subr.mxu1 %v11537_v50  ;;  %8287 = vmatpush3.msra.mxu0 %v13943_v15  ;;  %v13406_v7 = vand.u32 4294901760, %v11914_v59  ;;  %v13405_v14 = vand.u32 4294901760, %v11924_v57 }
 0x3d6   :  { %8330 = vmatpush3.msra.mxu1 %v11537_v50  ;;  %8288 = vmatprep.subr.mxu0 %v13944_v55  ;;  %v13952_v50 = vld [vmem:[#allocation20_spill] sm:$0xff] }
 0x3d7   :  { %8331 = vmatprep.subr.mxu1 %v11539_v3  ;;  %8289 = vmatpush3.msra.mxu0 %v13944_v55  ;;  %v5172_v26 = vsub.f32 %v11914_v59, %v13406_v7  ;;  %v5179_v15 = vsub.f32 %v11924_v57, %v13405_v14  ;;  %v13404_v55 = vand.u32 4294901760, %v11939_v31 }
 0x3d8   :  { %8332 = vmatpush3.msra.mxu1 %v11539_v3  ;;  %8290 = vmatprep.subr.mxu0 %v13945_v45  ;;  %v13953_v3 = vld [vmem:[#allocation27_spill] sm:$0xff] }
 0x3d9   :  { %8333 = vmatprep.subr.mxu1 %v11587_v63  ;;  %8291 = vmatpush3.msra.mxu0 %v13945_v45  ;;  %v5173_v32 = vand.u32 4294901760, %v5172_v26 }
 0x3da   :  { %8334 = vmatpush3.msra.mxu1 %v11587_v63  ;;  %8292 = vmatprep.subr.mxu0 %v13946_v34  ;;  %v13958_v63 = vld [vmem:[#allocation17_spill] sm:$0xff] }
 0x3db   :  { %8335 = vmatprep.subr.mxu1 %v11594_v0  ;;  %8293 = vmatpush3.msra.mxu0 %v13946_v34  ;;  %v11954_v34 = vand.u32 4294901760, %v5032_v46 }
 0x3dc   :  { %8336 = vmatpush3.msra.mxu1 %v11594_v0  ;;  %8294 = vmatprep.subr.mxu0 %v13947_v38  ;;  %v11860_v0 = vand.u32 4294901760, %v5041_v23 }
 0x3dd   :  { %8337 = vmatprep.subr.mxu1 %v11604_v36  ;;  %8295 = vmatpush3.msra.mxu0 %v13947_v38  ;;  %v5031_v38 = vld [vmem:[#allocation2 + $0x230] sm:$0xff] }
 0x3de   :  { %8338 = vmatpush3.msra.mxu1 %v11604_v36  ;;  %8296 = vmatprep.subr.mxu0 %v13948_v56  ;;  %v11863_v47 = vsub.f32 %v5041_v23, %v11860_v0  ;;  %v11865_v36 = vand.u32 4294901760, %v5040_v42 }
 0x3df   :  { %8339 = vmatprep.subr.mxu1 %v11616_v17  ;;  %8297 = vmatpush3.msra.mxu0 %v13948_v56  ;;  %v5180_v56 = vand.u32 4294901760, %v5179_v15 }
 0x3e0   :  { %8340 = vmatpush3.msra.mxu1 %v11616_v17  ;;  %8298 = vmatprep.subr.mxu0 %v13949_v51  ;;  %v13411_v17 = vand.u32 4294901760, %v11863_v47  ;;  %v11871_v53 = vsub.f32 %v5040_v42, %v11865_v36  ;;  %v5027_v42 = vld [vmem:[#allocation2 + $0xb0] sm:$0xff] }
 0x3e1   :  { %8341 = vmatprep.subr.mxu1 %v11630_v48  ;;  %8299 = vmatpush3.msra.mxu0 %v13949_v51  ;;  %v5186_v51 = vsub.f32 %v11939_v31, %v13404_v55 }
 0x3e2   :  { %8342 = vmatpush3.msra.mxu1 %v11630_v48  ;;  %8300 = vmatprep.subr.mxu0 %v13950_v22  ;;  %v11873_v48 = vand.u32 4294901760, %v5039_v52  ;;  %v5137_v24 = vsub.f32 %v11863_v47, %v13411_v17  ;;  %v13410_v25 = vand.u32 4294901760, %v11871_v53 }
 0x3e3   :  { %8343 = vmatprep.subr.mxu1 %v11637_v49  ;;  %8301 = vmatpush3.msra.mxu0 %v13950_v22 }
 0x3e4   :  { %8344 = vmatpush3.msra.mxu1 %v11637_v49  ;;  %8302 = vmatprep.subr.mxu0 %v13951_v20  ;;  %v5038_v49 = vld [vmem:[#allocation2 + $0x4d0] sm:$0xff]  ;;  %v5138_v16 = vand.u32 4294901760, %v5137_v24 }
 0x3e5   :  { %8345 = vmatprep.subr.mxu1 %v11649_v11  ;;  %8303 = vmatpush3.msra.mxu0 %v13951_v20  ;;  %v11884_v30 = vand.u32 4294901760, %v5038_v49  ;;  %v11962_v20 = vand.u32 4294901760, %v5031_v38 }
 0x3e6   :  { %8346 = vmatpush3.msra.mxu1 %v11649_v11  ;;  %8304 = vmatprep.subr.mxu0 %v13952_v50  ;;  %v11882_v11 = vsub.f32 %v5039_v52, %v11873_v48  ;;  %v5026_v52 = vld [vmem:[#allocation2 + $0x50] sm:$0xff] }
 0x3e7   :  { %8347 = vmatprep.subr.mxu1 %v11664_v21  ;;  %8305 = vmatpush3.msra.mxu0 %v13952_v50  ;;  %v11893_v37 = vsub.f32 %v5038_v49, %v11884_v30  ;;  %v5030_v50 = vld [vmem:[#allocation2 + $0x1d0] sm:$0xff]  ;;  %v5187_v49 = vand.u32 4294901760, %v5186_v51  ;;  %v12002_v29 = vand.u32 4294901760, %v5026_v52 }
 0x3e8   :  { %8348 = vmatpush3.msra.mxu1 %v11664_v21  ;;  %8306 = vmatprep.subr.mxu0 %v13953_v3  ;;  %v5144_v21 = vsub.f32 %v11871_v53, %v13410_v25  ;;  %v13409_v27 = vand.u32 4294901760, %v11882_v11 }
 0x3e9   :  { %8349 = vmatprep.subr.mxu1 %v11678_v62  ;;  %8307 = vmatpush3.msra.mxu0 %v13953_v3  ;;  %v13408_v43 = vand.u32 4294901760, %v11893_v37  ;;  %v5029_v3 = vld [vmem:[#allocation2 + $0x170] sm:$0xff] }
 0x3ea   :  { %8350 = vmatpush3.msra.mxu1 %v11678_v62  ;;  %8308 = vmatprep.subr.mxu0 %v13954_v35  ;;  %v11896_v62 = vand.u32 4294901760, %v5037_v1  ;;  %v5145_v8 = vand.u32 4294901760, %v5144_v21  ;;  %v5151_v41 = vsub.f32 %v11882_v11, %v13409_v27 }
 0x3eb   :  { %8352 = vmatmul.mubr.f32.vlgmr.msra.gmra.mxu1 %v11714_v61  ;;  %8309 = vmatpush3.msra.mxu0 %v13954_v35  ;;  %v5158_v39 = vsub.f32 %v11893_v37, %v13408_v43  ;;  %v5028_v35 = vld [vmem:[#allocation2 + $0x110] sm:$0xff] }
 0x3ec   :  { %8310 = vmatprep.subr.mxu0 %v13955_v10  ;;  %8389 = vmatprep.subr.mxu1 %v13956_v2  ;;  %v11907_v4 = vsub.f32 %v5037_v1, %v11896_v62  ;;  %v5152_v9 = vand.u32 4294901760, %v5151_v41  ;;  %v11973_v23 = vand.u32 4294901760, %v5028_v35  ;;  %v11980_v1 = vsub.f32 %v5031_v38, %v11962_v20 }
 0x3ed   :  { %8311 = vmatpush3.msra.mxu0 %v13955_v10  ;;  %8421 = vmatprep.mubr.msk.f32.mxu1 %vm8840_vm0, %v13956_v2  ;;  %v5159_v13 = vand.u32 4294901760, %v5158_v39  ;;  %v11966_v10 = vsub.f32 %v5032_v46, %v11954_v34  ;;  %v12016_v46 = vsub.f32 %v5026_v52, %v12002_v29 }
 0x3ee   :  { %8312 = vmatprep.subr.mxu0 %v13957_v6  ;;  %8390 = vmatpush3.msra.mxu1 %v5138_v16  ;;  %v13407_v54 = vand.u32 4294901760, %v11907_v4  ;;  %v11983_v16 = vand.u32 4294901760, %v5027_v42  ;;  %v11993_v41 = vsub.f32 %v5028_v35, %v11973_v23 }
 0x3ef   :  { %8313 = vmatpush3.msra.mxu0 %v13957_v6  ;;  %8391 = vmatprep.subr.mxu1 %v13956_v2  ;;  %v11968_v6 = vand.u32 4294901760, %v5030_v50  ;;  %v13402_v21 = vand.u32 4294901760, %v11966_v10  ;;  %13959 = vst [vmem:[#allocation23_spill] sm:$0xff] %v12016_v46  ;;  %v13396_v35 = vand.u32 4294901760, %v12016_v46 }
 0x3f0   :  { %8314 = vmatprep.subr.mxu0 %v13958_v63  ;;  %8392 = vmatpush3.msra.mxu1 %v5145_v8  ;;  %v5165_v58 = vsub.f32 %v11907_v4, %v13407_v54  ;;  %v11999_v39 = vsub.f32 %v5027_v42, %v11983_v16  ;;  %v13398_v26 = vand.u32 4294901760, %v11993_v41 }
 0x3f1   :  { %8315 = vmatpush3.msra.mxu0 %v13958_v63  ;;  %8393 = vmatprep.subr.mxu1 %v13956_v2  ;;  %v11970_v63 = vand.u32 4294901760, %v5029_v3  ;;  %v11987_v60 = vsub.f32 %v5030_v50, %v11968_v6 }
 0x3f2   :  { %8317 = vmatmul.mubr.f32.vlgmr.msra.gmra.mxu0 %v11714_v61  ;;  %8354 = vmatprep.subr.mxu0 %v13956_v2  ;;  %v5033_v61 = vld [vmem:[#allocation2 + $0x2f0] sm:$0xff]  ;;  %v5166_v18 = vand.u32 4294901760, %v5165_v58 }
 0x3f3   :  { %8386 = vmatprep.mubr.msk.f32.mxu0 %vm8840_vm0, %v13956_v2  ;;  %8355 = vmatpush3.msra.mxu0 %v11860_v0  ;;  %v11941_v44 = vand.u32 4294901760, %v5033_v61  ;;  %v11990_v8 = vsub.f32 %v5029_v3, %v11970_v63  ;;  %v13400_v58 = vand.u32 4294901760, %v11987_v60  ;;  %v5228_v3 = vsub.f32 %v11993_v41, %v13398_v26 }
 0x3f4   :  { %8356 = vmatprep.subr.mxu0 %v13956_v2  ;;  %8394 = vmatpush3.msra.mxu1 %v5152_v9  ;;  %v13401_v9 = vand.u32 4294901760, %v11980_v1 }
 0x3f5   :  { %8357 = vmatpush3.msra.mxu0 %v11865_v36  ;;  %8395 = vmatprep.subr.mxu1 %v13956_v2  ;;  %v11951_v45 = vsub.f32 %v5033_v61, %v11941_v44  ;;  %v13399_v61 = vand.u32 4294901760, %v11990_v8  ;;  %v5214_v15 = vsub.f32 %v11987_v60, %v13400_v58 }
 0x3f6   :  { %8358 = vmatprep.subr.mxu0 %v13956_v2  ;;  %8396 = vmatpush3.msra.mxu1 %v5159_v13  ;;  %v5200_v13 = vsub.f32 %v11966_v10, %v13402_v21 }
 0x3f7   :  { %8359 = vmatpush3.msra.mxu0 %v11873_v48  ;;  %8397 = vmatprep.subr.mxu1 %v13956_v2  ;;  %v13403_v22 = vand.u32 4294901760, %v11951_v45  ;;  %v5221_v38 = vsub.f32 %v11990_v8, %v13399_v61  ;;  %v5215_v50 = vand.u32 4294901760, %v5214_v15 }
 0x3f8   :  { %8360 = vmatprep.subr.mxu0 %v13956_v2  ;;  %8398 = vmatpush3.msra.mxu1 %v5166_v18  ;;  %v5207_v18 = vsub.f32 %v11980_v1, %v13401_v9 }
 0x3f9   :  { %8361 = vmatpush3.msra.mxu0 %v11884_v30  ;;  %8399 = vmatprep.subr.mxu1 %v13956_v2  ;;  %v5193_v24 = vsub.f32 %v11951_v45, %v13403_v22  ;;  %v5222_v42 = vand.u32 4294901760, %v5221_v38 }
 0x3fa   :  { %8362 = vmatprep.subr.mxu0 %v13956_v2  ;;  %8400 = vmatpush3.msra.mxu1 %v5173_v32  ;;  %v5201_v32 = vand.u32 4294901760, %v5200_v13  ;;  %v5208_v51 = vand.u32 4294901760, %v5207_v18  ;;  %v4191_v18 = vpop.f32.mrf.mxu0 }
 0x3fb   :  { %8363 = vmatpush3.msra.mxu0 %v11896_v62  ;;  %8401 = vmatprep.subr.mxu1 %v13956_v2  ;;  %v5194_v28 = vand.u32 4294901760, %v5193_v24  ;;  %v5242_v24 = vsub.f32 %v12016_v46, %v13396_v35 }
 0x3fc   :  { %8364 = vmatprep.subr.mxu0 %v13956_v2  ;;  %8402 = vmatpush3.msra.mxu1 %v5180_v56  ;;  %v13397_v56 = vand.u32 4294901760, %v11999_v39  ;;  %v4193_v15 = vpop.f32.mrf.mxu0 }
 0x3fd   :  { %8365 = vmatpush3.msra.mxu0 %v11903_v40  ;;  %8403 = vmatprep.subr.mxu1 %v13956_v2  ;;  %v5243_v13 = vand.u32 4294901760, %v5242_v24 }
 0x3fe   :  { %8366 = vmatprep.subr.mxu0 %v13956_v2  ;;  %8404 = vmatpush3.msra.mxu1 %v5187_v49  ;;  %v5235_v52 = vsub.f32 %v11999_v39, %v13397_v56  ;;  %v5229_v49 = vand.u32 4294901760, %v5228_v3 }
 0x3ff   :  { %8367 = vmatpush3.msra.mxu0 %v11916_v33  ;;  %8405 = vmatprep.subr.mxu1 %v13956_v2 }
 0x400   :  { %8368 = vmatprep.subr.mxu0 %v13956_v2  ;;  %8406 = vmatpush3.msra.mxu1 %v5194_v28  ;;  %v5236_v28 = vand.u32 4294901760, %v5235_v52 }
 0x401   :  { %8369 = vmatpush3.msra.mxu0 %v11926_v19  ;;  %8407 = vmatprep.subr.mxu1 %v13956_v2 }
 0x402   :  { %8370 = vmatprep.subr.mxu0 %v13956_v2  ;;  %8408 = vmatpush3.msra.mxu1 %v5201_v32  ;;  %v4302_v32 = vpop.f32.mrf.mxu1 }
 0x403   :  { %8371 = vmatpush3.msra.mxu0 %v11941_v44  ;;  %8409 = vmatprep.subr.mxu1 %v13956_v2 }
 0x404   :  { %8372 = vmatprep.subr.mxu0 %v13956_v2  ;;  %8410 = vmatpush3.msra.mxu1 %v5208_v51  ;;  %v4304_v51 = vpop.f32.mrf.mxu1 }
 0x405   :  { %8373 = vmatpush3.msra.mxu0 %v11954_v34  ;;  %8411 = vmatprep.subr.mxu1 %v13956_v2 }
 0x406   :  { %8374 = vmatprep.subr.mxu0 %v13956_v2  ;;  %8412 = vmatpush3.msra.mxu1 %v5215_v50 }
 0x407   :  { %8375 = vmatpush3.msra.mxu0 %v11962_v20  ;;  %8413 = vmatprep.subr.mxu1 %v13956_v2 }
 0x408   :  { %8376 = vmatprep.subr.mxu0 %v13956_v2  ;;  %8414 = vmatpush3.msra.mxu1 %v5222_v42 }
 0x409   :  { %8377 = vmatpush3.msra.mxu0 %v11968_v6  ;;  %8415 = vmatprep.subr.mxu1 %v13956_v2 }
 0x40a   :  { %8378 = vmatprep.subr.mxu0 %v13956_v2  ;;  %8416 = vmatpush3.msra.mxu1 %v5229_v49 }
 0x40b   :  { %8379 = vmatpush3.msra.mxu0 %v11970_v63  ;;  %8417 = vmatprep.subr.mxu1 %v13956_v2 }
 0x40c   :  { %8380 = vmatprep.subr.mxu0 %v13956_v2  ;;  %8418 = vmatpush3.msra.mxu1 %v5236_v28 }
 0x40d   :  { %8381 = vmatpush3.msra.mxu0 %v11973_v23  ;;  %8419 = vmatprep.subr.mxu1 %v13956_v2 }
 0x40e   :  { %8382 = vmatprep.subr.mxu0 %v13956_v2  ;;  %8420 = vmatpush3.msra.mxu1 %v5243_v13 }
 0x40f   :  { %8383 = vmatpush3.msra.mxu0 %v11983_v16  ;;  %8459 = vmatprep.subr.mxu1 %v13956_v2 }
 0x410   :  { %8384 = vmatprep.subr.mxu0 %v13956_v2 }
 0x411   :  { %8385 = vmatpush3.msra.mxu0 %v12002_v29 }
 0x412   :  { %8424 = vmatprep.subr.mxu0 %v13956_v2 }
 0x468   :  { %v8213_v50 = vpop.f32.mrf.mxu1 }
 0x46a   :  { %v4573_v52 = vpop.f32.mrf.mxu1 }
 0x470   :  { %v8178_v38 = vpop.f32.mrf.mxu0 }
 0x471   :  { %v4580_v35 = vadd.f32 %v8213_v50, %v8178_v38 }
 0x472   :  { %v4412_v3 = vpop.f32.mrf.mxu0 }
 0x473   :  { %v4574_v56 = vadd.f32 %v4573_v52, %v4412_v3  ;;  %v5699_v52 = vld [vmem:[#allocation4 + $0x68] sm:$0xff] }
 0x489   :  { %v8283_v49 = vpop.f32.mrf.mxu1 }
 0x48b   :  { %v4779_v61 = vpop.f32.mrf.mxu1 }
 0x491   :  { %v8248_v42 = vpop.f32.mrf.mxu0 }
 0x492   :  { %v4691_v26 = vadd.f32 %v8248_v42, %v4580_v35 }
 0x493   :  { %v4683_v24 = vpop.f32.mrf.mxu0 }
 0x494   :  { %v4684_v28 = vadd.f32 %v4683_v24, %v4574_v56  ;;  %v4788_v58 = vadd.f32 %v8283_v49, %v4691_v26  ;;  %v12245_v24 = vand.u32 4294901760, %v5699_v52 }
 0x496   :  { %v4780_v22 = vadd.f32 %v4779_v61, %v4684_v28  ;;  %v5714_v28 = vld [vmem:[#allocation4 + $0xe0] sm:$0xff] }
 0x4ab   :  { %v8353_v13 = vpop.f32.mrf.mxu1 }
 0x4ad   :  { %v4999_v54 = vpop.f32.mrf.mxu1 }
 0x4b2   :  { %v8318_v9 = vpop.f32.mrf.mxu0 }
 0x4b3   :  { %v4913_v21 = vadd.f32 %v8318_v9, %v4788_v58 }
 0x4b4   :  { %v4906_v55 = vpop.f32.mrf.mxu0 }
 0x4b5   :  { %v5006_v14 = vadd.f32 %v8353_v13, %v4913_v21  ;;  %v4907_v7 = vadd.f32 %v4906_v55, %v4780_v22  ;;  %v4192_v55 = vadd.f32 %v4191_v18, %v11705_v5  ;;  %v5698_v13 = vld [vmem:[#allocation4 + $0x60] sm:$0xff] }
 0x4b7   :  { %v5000_v43 = vadd.f32 %v4999_v54, %v4907_v7  ;;  %v5010_v27 = vmul.f32 0.35355338, %v5006_v14  ;;  %v6582_v25 = vmul.f32 %v5006_v14, %v5006_v14  ;;  %v4194_v54 = vadd.f32 %v4193_v15, %v11707_v12 }
 0x4b8   :  { %v4303_v14 = vadd.f32 %v4302_v32, %v4192_v55 }
 0x4b9   :  { %v5009_v17 = vmul.f32 0.35355338, %v5000_v43  ;;  %v6581_v38 = vmul.f32 %v5000_v43, %v5000_v43  ;;  %v4305_v43 = vadd.f32 %v4304_v51, %v4194_v54  ;;  %v5715_v51 = vld [vmem:[#allocation4 + $0xe8] sm:$0xff] }
 0x4ba   :  { %v12243_v49 = vand.u32 4294901760, %v5715_v51 }
 0x4bb   :  { %v5011_v50 = vmax.f32 %v5009_v17, %v5010_v27  ;;  %v12052_v46 = vadd.f32 %v6582_v25, %v6581_v38 }
 0x4bd   :  { %13960 = vst [vmem:[#allocation28_spill] sm:$0xff] %v12052_v46  ;;  %v5012_v35 = vsub.f32 %v5009_v17, %v5011_v50  ;;  %v5015_v56 = vsub.f32 %v5010_v27, %v5011_v50 }
 0x4bf   :  { %v5013_v3 = vmul.f32 1.442695, %v5012_v35  ;;  %v5016_v26 = vmul.f32 1.442695, %v5015_v56  ;;  %v12256_v56 = vand.u32 4294901760, %v5714_v28 }
 0x4c1   :  { %8782 = vpow2.f32 %v5013_v3 }
 0x4c2   :  { %8784 = vpow2.f32 %v5016_v26  ;;  %v12263_v26 = vsub.f32 %v5715_v51, %v12243_v49  ;;  %v5710_v51 = vld [vmem:[#allocation4 + $0xc0] sm:$0xff] }
 0x4ce   :  { %v8783_v9 = vpop.eup %8782 }
 0x4cf   :  { %v8785_v58 = vpop.eup %8784 }
 0x4d0   :  { %v5018_v61 = vadd.f32 %v8785_v58, %v8783_v9 }
 0x4d2   :  { %8786 = vrcp.f32 %v5018_v61 }
 0x4df   :  { %v8787_v7 = vpop.eup %8786 }
 0x4e0   :  { %v5021_v22 = vmul.f32 %v8787_v7, %v8783_v9  ;;  %v5022_v25 = vmul.f32 %v8787_v7, %v8785_v58  ;;  %v12266_v9 = vsub.f32 %v5699_v52, %v12245_v24  ;;  %v12268_v58 = vand.u32 4294901760, %v5698_v13 }
 0x4e1   :  { %v12275_v7 = vsub.f32 %v5714_v28, %v12256_v56 }
 0x4e2   :  { %v5023_v21 = vmul.f32 %v5021_v22, %v4303_v14  ;;  %v5024_v17 = vmul.f32 %v5022_v25, %v4305_v43  ;;  %7290 = vst [vmem:[%s13087_s3] sm:$0xff] %v5021_v22  ;;  %7291 = vst [vmem:[%s13087_s3 + $0x8] sm:$0xff] %v5022_v25  ;;  %v13425_v43 = vand.u32 4294901760, %v12263_v26  ;;  %v13422_v22 = vand.u32 4294901760, %v12266_v9 }
 0x4e3   :  { %v12282_v25 = vsub.f32 %v5698_v13, %v12268_v58 }
 0x4e4   :  { %v5025_v27 = vadd.f32 %v5024_v17, %v5023_v21 }
 0x4e6   :  { %v12062_v42 = vand.u32 4294901760, %v5025_v27 }
 0x4e8   :  { %v12065_v12 = vsub.f32 %v5025_v27, %v12062_v42  ;;  %8422 = vmatmul.mubr.f32.vlgmr.msra.gmra.mxu1 %v12062_v42 }
 0x4e9   :  { %8460 = vmatpush3.msra.mxu1 %v11860_v0  ;;  %8491 = vmatprep.mubr.msk.f32.mxu1 %vm8840_vm0, %v13956_v2 }
 0x4ea   :  { %8461 = vmatprep.subr.mxu1 %v13956_v2  ;;  %v5125_v5 = vand.u32 4294901760, %v12065_v12 }
 0x4eb   :  { %8462 = vmatpush3.msra.mxu1 %v11865_v36 }
 0x4ec   :  { %8463 = vmatprep.subr.mxu1 %v13956_v2  ;;  %v5126_v18 = vsub.f32 %v12065_v12, %v5125_v5 }
 0x4ed   :  { %8464 = vmatpush3.msra.mxu1 %v11873_v48 }
 0x4ee   :  { %8465 = vmatprep.subr.mxu1 %v13956_v2  ;;  %v5127_v32 = vand.u32 4294901760, %v5126_v18  ;;  %v5848_v18 = vsub.f32 %v12266_v9, %v13422_v22  ;;  %v5706_v22 = vld [vmem:[#allocation4 + $0xa0] sm:$0xff] }
 0x4ef   :  { %8466 = vmatpush3.msra.mxu1 %v11884_v30 }
 0x4f0   :  { %8467 = vmatprep.subr.mxu1 %v13956_v2  ;;  %8387 = vmatmul.mubr.f32.vlgmr.msra.gmra.mxu0 %v5127_v32  ;;  %v13420_v32 = vand.u32 4294901760, %v12282_v25 }
 0x4f1   :  { %8425 = vmatpush3.msra.mxu0 %v11863_v47  ;;  %8468 = vmatpush3.msra.mxu1 %v11896_v62 }
 0x4f2   :  { %8426 = vmatprep.subr.mxu0 %v13956_v2  ;;  %8469 = vmatprep.subr.mxu1 %v13956_v2 }
 0x4f3   :  { %8427 = vmatpush3.msra.mxu0 %v11871_v53  ;;  %8470 = vmatpush3.msra.mxu1 %v11903_v40 }
 0x4f4   :  { %8428 = vmatprep.subr.mxu0 %v13956_v2  ;;  %8471 = vmatprep.subr.mxu1 %v13956_v2 }
 0x4f5   :  { %8429 = vmatpush3.msra.mxu0 %v11882_v11  ;;  %8472 = vmatpush3.msra.mxu1 %v11916_v33 }
 0x4f6   :  { %8430 = vmatprep.subr.mxu0 %v13956_v2  ;;  %8473 = vmatprep.subr.mxu1 %v13956_v2 }
 0x4f7   :  { %8431 = vmatpush3.msra.mxu0 %v11893_v37  ;;  %8474 = vmatpush3.msra.mxu1 %v11926_v19 }
 0x4f8   :  { %8432 = vmatprep.subr.mxu0 %v13956_v2  ;;  %8475 = vmatprep.subr.mxu1 %v13956_v2 }
 0x4f9   :  { %8433 = vmatpush3.msra.mxu0 %v11907_v4  ;;  %8476 = vmatpush3.msra.mxu1 %v11941_v44 }
 0x4fa   :  { %8434 = vmatprep.subr.mxu0 %v13956_v2  ;;  %8477 = vmatprep.subr.mxu1 %v13956_v2 }
 0x4fb   :  { %8435 = vmatpush3.msra.mxu0 %v11914_v59  ;;  %8478 = vmatpush3.msra.mxu1 %v11954_v34 }
 0x4fc   :  { %8436 = vmatprep.subr.mxu0 %v13956_v2  ;;  %8479 = vmatprep.subr.mxu1 %v13956_v2 }
 0x4fd   :  { %8437 = vmatpush3.msra.mxu0 %v11924_v57  ;;  %8480 = vmatpush3.msra.mxu1 %v11962_v20 }
 0x4fe   :  { %8438 = vmatprep.subr.mxu0 %v13956_v2  ;;  %8481 = vmatprep.subr.mxu1 %v13956_v2 }
 0x4ff   :  { %8439 = vmatpush3.msra.mxu0 %v11939_v31  ;;  %8482 = vmatpush3.msra.mxu1 %v11968_v6 }
 0x500   :  { %8440 = vmatprep.subr.mxu0 %v13956_v2  ;;  %8483 = vmatprep.subr.mxu1 %v13956_v2 }
 0x501   :  { %8441 = vmatpush3.msra.mxu0 %v11951_v45  ;;  %8484 = vmatpush3.msra.mxu1 %v11970_v63 }
 0x502   :  { %8442 = vmatprep.subr.mxu0 %v13956_v2  ;;  %8485 = vmatprep.subr.mxu1 %v13956_v2 }
 0x503   :  { %8443 = vmatpush3.msra.mxu0 %v11966_v10  ;;  %8486 = vmatpush3.msra.mxu1 %v11973_v23 }
 0x504   :  { %8444 = vmatprep.subr.mxu0 %v13956_v2  ;;  %8487 = vmatprep.subr.mxu1 %v13956_v2 }
 0x505   :  { %8445 = vmatpush3.msra.mxu0 %v11980_v1  ;;  %8488 = vmatpush3.msra.mxu1 %v11983_v16 }
 0x506   :  { %8446 = vmatprep.subr.mxu0 %v13956_v2  ;;  %8489 = vmatprep.subr.mxu1 %v13956_v2 }
 0x507   :  { %8447 = vmatpush3.msra.mxu0 %v11987_v60  ;;  %8490 = vmatpush3.msra.mxu1 %v12002_v29 }
 0x508   :  { %8448 = vmatprep.subr.mxu0 %v13956_v2  ;;  %8492 = vmatmul.mubr.f32.vlgmr.msra.gmra.mxu1 %v5125_v5  ;;  %v5960_v5 = vsub.f32 %v12263_v26, %v13425_v43 }
 0x509   :  { %8529 = vmatprep.subr.mxu1 %v13956_v2  ;;  %8449 = vmatpush3.msra.mxu0 %v11990_v8 }
 0x50a   :  { %8530 = vmatpush3.msra.mxu1 %v11860_v0  ;;  %8450 = vmatprep.subr.mxu0 %v13956_v2  ;;  %v13961_v0 = vld [vmem:[#allocation23_spill] sm:$0xff] }
 0x50b   :  { %8531 = vmatprep.subr.mxu1 %v13956_v2  ;;  %8451 = vmatpush3.msra.mxu0 %v11993_v41 }
 0x50c   :  { %8532 = vmatpush3.msra.mxu1 %v11865_v36  ;;  %8452 = vmatprep.subr.mxu0 %v13956_v2  ;;  %v13962_v36 = vand.u32 4294901760, %v11863_v47  ;;  %v13965_v47 = vand.u32 4294901760, %v11893_v37  ;;  %v13968_v37 = vand.u32 4294901760, %v11914_v59  ;;  %v13970_v59 = vand.u32 4294901760, %v11939_v31 }
 0x50d   :  { %8533 = vmatprep.subr.mxu1 %v13956_v2  ;;  %8453 = vmatpush3.msra.mxu0 %v11999_v39 }
 0x50e   :  { %8534 = vmatpush3.msra.mxu1 %v11873_v48  ;;  %8454 = vmatprep.subr.mxu0 %v13956_v2  ;;  %v13963_v48 = vand.u32 4294901760, %v11871_v53  ;;  %v13966_v53 = vld [vmem:[#allocation18_spill] sm:$0xff] }
 0x50f   :  { %8535 = vmatprep.subr.mxu1 %v13956_v2  ;;  %8455 = vmatpush3.msra.mxu0 %v13961_v0 }
 0x510   :  { %8456 = vmatprep.mubr.msk.f32.mxu0 %vm8840_vm0, %v13956_v2  ;;  %8536 = vmatpush3.msra.mxu1 %v11884_v30  ;;  %v13964_v30 = vand.u32 4294901760, %v11882_v11  ;;  %v13967_v11 = vand.u32 4294901760, %v11907_v4  ;;  %v13969_v4 = vand.u32 4294901760, %v11924_v57  ;;  %v13972_v57 = vand.u32 4294901760, %v11951_v45 }
 0x511   :  { %8457 = vmatmul.mubr.f32.vlgmr.msra.gmra.mxu0 %v12065_v12  ;;  %8494 = vmatprep.subr.mxu0 %v13956_v2  ;;  %v13975_v45 = vand.u32 4294901760, %v11987_v60  ;;  %v5701_v60 = vld [vmem:[#allocation4 + $0x78] sm:$0xff] }
 0x512   :  { %8537 = vmatprep.subr.mxu1 %v13956_v2  ;;  %8495 = vmatpush3.msra.mxu0 %v13962_v36  ;;  %v5697_v36 = vld [vmem:[#allocation4 + $0x58] sm:$0xff] }
 0x513   :  { %8538 = vmatpush3.msra.mxu1 %v11896_v62  ;;  %8496 = vmatprep.subr.mxu0 %v13956_v2  ;;  %v3369_v62 = vmul.f32 0.01, %v13966_v53 }
 0x514   :  { %8539 = vmatprep.subr.mxu1 %v13956_v2  ;;  %8497 = vmatpush3.msra.mxu0 %v13963_v48  ;;  %v5712_v48 = vld [vmem:[#allocation4 + $0xd0] sm:$0xff] }
 0x515   :  { %8540 = vmatpush3.msra.mxu1 %v11903_v40  ;;  %8498 = vmatprep.subr.mxu0 %v13956_v2  ;;  %v3370_v40 = vmax.f32 %v13966_v53, %v3369_v62 }
 0x516   :  { %8541 = vmatprep.subr.mxu1 %v13956_v2  ;;  %8499 = vmatpush3.msra.mxu0 %v13964_v30 }
 0x517   :  { %8542 = vmatpush3.msra.mxu1 %v11916_v33  ;;  %8500 = vmatprep.subr.mxu0 %v13956_v2  ;;  %v12186_v33 = vand.u32 4294901760, %v3370_v40 }
 0x518   :  { %8543 = vmatprep.subr.mxu1 %v13956_v2  ;;  %8501 = vmatpush3.msra.mxu0 %v13965_v47 }
 0x519   :  { %8544 = vmatpush3.msra.mxu1 %v11926_v19  ;;  %8502 = vmatprep.subr.mxu0 %v13956_v2  ;;  %13971 = vst [vmem:[#allocation34_spill] sm:$0xff] %v12186_v33  ;;  %v13973_v19 = vand.u32 4294901760, %v11966_v10  ;;  %v12199_v31 = vsub.f32 %v3370_v40, %v12186_v33  ;;  %v13977_v10 = vand.u32 4294901760, %v11993_v41  ;;  %v5855_v40 = vsub.f32 %v12282_v25, %v13420_v32 }
 0x51a   :  { %8545 = vmatprep.subr.mxu1 %v13956_v2  ;;  %8503 = vmatpush3.msra.mxu0 %v13967_v11  ;;  %v5696_v11 = vld [vmem:[#allocation4 + $0x50] sm:$0xff] }
 0x51b   :  { %8546 = vmatpush3.msra.mxu1 %v11941_v44  ;;  %8504 = vmatprep.subr.mxu0 %v13956_v2  ;;  %v13974_v44 = vand.u32 4294901760, %v11980_v1 }
 0x51c   :  { %8547 = vmatprep.subr.mxu1 %v13956_v2  ;;  %8505 = vmatpush3.msra.mxu0 %v13968_v37 }
 0x51d   :  { %8548 = vmatpush3.msra.mxu1 %v11954_v34  ;;  %8506 = vmatprep.subr.mxu0 %v13956_v2  ;;  %v13432_v34 = vand.u32 4294901760, %v12199_v31 }
 0x51e   :  { %8549 = vmatprep.subr.mxu1 %v13956_v2  ;;  %8507 = vmatpush3.msra.mxu0 %v13969_v4  ;;  %v5961_v4 = vand.u32 4294901760, %v5960_v5  ;;  %v12352_v5 = vand.u32 4294901760, %v5710_v51 }
 0x51f   :  { %8550 = vmatpush3.msra.mxu1 %v11962_v20  ;;  %8508 = vmatprep.subr.mxu0 %v13956_v2  ;;  %v13976_v20 = vand.u32 4294901760, %v11990_v8  ;;  %v5716_v8 = vld [vmem:[#allocation4 + $0xf0] sm:$0xff] }
 0x520   :  { %8551 = vmatprep.subr.mxu1 %v13956_v2  ;;  %8509 = vmatpush3.msra.mxu0 %v13970_v59  ;;  %v12239_v15 = vand.u32 4294901760, %v5716_v8 }
 0x521   :  { %8552 = vmatpush3.msra.mxu1 %v11968_v6  ;;  %8510 = vmatprep.subr.mxu0 %v13956_v2  ;;  %v5817_v6 = vsub.f32 %v12199_v31, %v13432_v34  ;;  %v5689_v34 = vld [vmem:[#allocation4 + $0x18] sm:$0xff] }
 0x522   :  { %8553 = vmatprep.subr.mxu1 %v13956_v2  ;;  %8511 = vmatpush3.msra.mxu0 %v13972_v57  ;;  %v12254_v35 = vsub.f32 %v5716_v8, %v12239_v15  ;;  %v12317_v57 = vand.u32 4294901760, %v5697_v36 }
 0x523   :  { %8554 = vmatpush3.msra.mxu1 %v11970_v63  ;;  %8512 = vmatprep.subr.mxu0 %v13956_v2  ;;  %v13978_v63 = vand.u32 4294901760, %v11999_v39  ;;  %v5818_v1 = vand.u32 4294901760, %v5817_v6  ;;  %v5700_v39 = vld [vmem:[#allocation4 + $0x70] sm:$0xff] }
 0x524   :  { %8555 = vmatprep.subr.mxu1 %v13956_v2  ;;  %8513 = vmatpush3.msra.mxu0 %v13973_v19  ;;  %v13427_v54 = vand.u32 4294901760, %v12254_v35  ;;  %v12319_v19 = vand.u32 4294901760, %v5712_v48 }
 0x525   :  { %8556 = vmatpush3.msra.mxu1 %v11973_v23  ;;  %8514 = vmatprep.subr.mxu0 %v13956_v2  ;;  %v13979_v23 = vand.u32 4294901760, %v13961_v0  ;;  %v5713_v0 = vld [vmem:[#allocation4 + $0xd8] sm:$0xff] }
 0x526   :  { %8557 = vmatprep.subr.mxu1 %v13956_v2  ;;  %8515 = vmatpush3.msra.mxu0 %v13974_v44  ;;  %v5953_v27 = vsub.f32 %v12254_v35, %v13427_v54  ;;  %v12315_v59 = vand.u32 4294901760, %v5713_v0  ;;  %v5849_v44 = vand.u32 4294901760, %v5848_v18 }
 0x527   :  { %8558 = vmatpush3.msra.mxu1 %v11983_v16  ;;  %8516 = vmatprep.subr.mxu0 %v13956_v2  ;;  %v5717_v16 = vld [vmem:[#allocation4 + $0xf8] sm:$0xff] }
 0x528   :  { %8559 = vmatprep.subr.mxu1 %v13956_v2  ;;  %8517 = vmatpush3.msra.mxu0 %v13975_v45  ;;  %v12235_v41 = vand.u32 4294901760, %v5717_v16  ;;  %v5954_v53 = vand.u32 4294901760, %v5953_v27  ;;  %v12324_v6 = vsub.f32 %v5713_v0, %v12315_v59 }
 0x529   :  { %8560 = vmatpush3.msra.mxu1 %v12002_v29  ;;  %8561 = vmatprep.mubr.msk.f32.mxu1 %vm8840_vm0, %v13956_v2  ;;  %v12237_v29 = vand.u32 4294901760, %v5701_v60 }
 0x52a   :  { %8518 = vmatprep.subr.mxu0 %v13956_v2  ;;  %8562 = vmatmul.mubr.f32.vlgmr.msra.gmra.mxu1 %v12062_v42  ;;  %13980 = vst [vmem:[#allocation29_spill] sm:$0xff] %v12235_v41  ;;  %v12248_v38 = vsub.f32 %v5717_v16, %v12235_v41  ;;  %v5695_v16 = vld [vmem:[#allocation4 + $0x48] sm:$0xff]  ;;  %v13418_v52 = vand.u32 4294901760, %v12324_v6 }
 0x52b   :  { %8519 = vmatpush3.msra.mxu0 %v13976_v20  ;;  %6055 = vmatprep.mubr.f32.mxu1 %v12186_v33  ;;  %v12251_v50 = vsub.f32 %v5701_v60, %v12237_v29  ;;  %v12321_v20 = vand.u32 4294901760, %v5696_v11  ;;  %v5856_v60 = vand.u32 4294901760, %v5855_v40  ;;  %v5693_v40 = vld [vmem:[#allocation4 + $0x38] sm:$0xff] }
 0x52c   :  { %8520 = vmatprep.subr.mxu0 %v13956_v2  ;;  %8526 = vmatprep.mubr.msk.f32.mxu0 %vm8840_vm0, %v13956_v2  ;;  %13981 = vst [vmem:[#allocation19_spill] sm:$0xff] %v12248_v38  ;;  %v13431_v61 = vand.u32 4294901760, %v12248_v38  ;;  %v5974_v0 = vsub.f32 %v12324_v6, %v13418_v52 }
 0x52d   :  { %8521 = vmatpush3.msra.mxu0 %v13977_v10  ;;  %v13428_v55 = vand.u32 4294901760, %v12251_v50  ;;  %v5711_v10 = vld [vmem:[#allocation4 + $0xc8] sm:$0xff]  ;;  %v12336_v8 = vsub.f32 %v5696_v11, %v12321_v20 }
 0x52e   :  { %8522 = vmatprep.subr.mxu0 %v13956_v2  ;;  %v5946_v21 = vsub.f32 %v12248_v38, %v13431_v61  ;;  %v5705_v61 = vld [vmem:[#allocation4 + $0x98] sm:$0xff] }
 0x52f   :  { %8523 = vmatpush3.msra.mxu0 %v13978_v63  ;;  %v5834_v17 = vsub.f32 %v12251_v50, %v13428_v55  ;;  %v12327_v63 = vsub.f32 %v5697_v36, %v12317_v57  ;;  %v13414_v27 = vand.u32 4294901760, %v12336_v8 }
 0x530   :  { %8524 = vmatprep.subr.mxu0 %v13956_v2  ;;  %v12241_v2 = vand.u32 4294901760, %v5700_v39  ;;  %v5947_v30 = vand.u32 4294901760, %v5946_v21 }
 0x531   :  { %8525 = vmatpush3.msra.mxu0 %v13979_v23  ;;  %v5835_v47 = vand.u32 4294901760, %v5834_v17  ;;  %v12330_v23 = vsub.f32 %v5712_v48, %v12319_v19  ;;  %v13416_v28 = vand.u32 4294901760, %v12327_v63  ;;  %v5694_v17 = vld [vmem:[#allocation4 + $0x40] sm:$0xff] }
 0x532   :  { %8527 = vmatmul.mubr.f32.vlgmr.msra.gmra.mxu0 %v12062_v42  ;;  %7616 = vmatprep.subr.mxu0 %v12235_v41  ;;  %v12260_v3 = vsub.f32 %v5700_v39, %v12241_v2  ;;  %v13421_v42 = vand.u32 4294901760, %v12275_v7  ;;  %v12338_v39 = vand.u32 4294901760, %v5695_v16  ;;  %v12354_v18 = vand.u32 4294901760, %v5694_v17 }
 0x533   :  { %5819 = vmatprep.mubr.f32.mxu0 %v5818_v1  ;;  %7617 = vmatpush3.msra.mxu0 %v12237_v29  ;;  %v12332_v1 = vand.u32 4294901760, %v5711_v10  ;;  %v13415_v13 = vand.u32 4294901760, %v12330_v23  ;;  %v5862_v36 = vsub.f32 %v12327_v63, %v13416_v28  ;;  %v5707_v28 = vld [vmem:[#allocation4 + $0xa8] sm:$0xff] }
 0x534   :  { %7618 = vmatprep.subr.mxu0 %v12239_v15  ;;  %v13426_v14 = vand.u32 4294901760, %v12260_v3  ;;  %v5967_v62 = vsub.f32 %v12275_v7, %v13421_v42  ;;  %7651 = vmatprep.subr.mxu1 %v5947_v30  ;;  %v12376_v11 = vsub.f32 %v5694_v17, %v12354_v18 }
 0x535   :  { %7619 = vmatpush3.msra.mxu0 %v12241_v2  ;;  %7652 = vmatpush3.msra.mxu1 %v5835_v47  ;;  %v12345_v21 = vsub.f32 %v5711_v10, %v12332_v1  ;;  %v5981_v48 = vsub.f32 %v12330_v23, %v13415_v13  ;;  %v5869_v47 = vsub.f32 %v12336_v8, %v13414_v27 }
 0x536   :  { %7620 = vmatprep.subr.mxu0 %v12243_v49  ;;  %v5841_v12 = vsub.f32 %v12260_v3, %v13426_v14  ;;  %v5968_v45 = vand.u32 4294901760, %v5967_v62  ;;  %7653 = vmatprep.subr.mxu1 %v5954_v53  ;;  %v12373_v62 = vsub.f32 %v5710_v51, %v12352_v5  ;;  %13982 = vst [vmem:[#allocation30_spill] sm:$0xff] %v12376_v11  ;;  %v13424_v13 = vand.u32 4294901760, %v12376_v11 }
 0x537   :  { %7621 = vmatpush3.msra.mxu0 %v12245_v24  ;;  %v13417_v30 = vand.u32 4294901760, %v12345_v21  ;;  %v5982_v10 = vand.u32 4294901760, %v5981_v48  ;;  %v5870_v51 = vand.u32 4294901760, %v5869_v47  ;;  %v12391_v48 = vand.u32 4294901760, %v5693_v40  ;;  %v5691_v47 = vld [vmem:[#allocation4 + $0x28] sm:$0xff] }
 0x538   :  { %7622 = vmatprep.subr.mxu0 %v12256_v56  ;;  %v5842_v37 = vand.u32 4294901760, %v5841_v12  ;;  %v12350_v12 = vsub.f32 %v5695_v16, %v12338_v39  ;;  %v13423_v27 = vand.u32 4294901760, %v12373_v62  ;;  %v5883_v32 = vsub.f32 %v12376_v11, %v13424_v13  ;;  %v5702_v11 = vld [vmem:[#allocation4 + $0x80] sm:$0xff] }
 0x539   :  { %7623 = vmatpush3.msra.mxu0 %v12268_v58  ;;  %v5988_v16 = vsub.f32 %v12345_v21, %v13417_v30 }
 0x53a   :  { %7624 = vmatprep.subr.mxu0 %v12315_v59  ;;  %7654 = vmatpush3.msra.mxu1 %v5842_v37  ;;  %v13419_v53 = vand.u32 4294901760, %v12350_v12  ;;  %v5709_v37 = vld [vmem:[#allocation4 + $0xb8] sm:$0xff]  ;;  %v5884_v43 = vand.u32 4294901760, %v5883_v32 }
 0x53b   :  { %7625 = vmatpush3.msra.mxu0 %v12317_v57  ;;  %7655 = vmatprep.subr.mxu1 %v5961_v4  ;;  %v5708_v4 = vld [vmem:[#allocation4 + $0xb0] sm:$0xff] }
 0x53c   :  { %7626 = vmatprep.subr.mxu0 %v12319_v19  ;;  %7656 = vmatpush3.msra.mxu1 %v5849_v44  ;;  %v5975_v44 = vand.u32 4294901760, %v5974_v0  ;;  %v5876_v17 = vsub.f32 %v12350_v12, %v13419_v53  ;;  %v5989_v0 = vand.u32 4294901760, %v5988_v16  ;;  %v12393_v30 = vand.u32 4294901760, %v5708_v4 }
 0x53d   :  { %7627 = vmatpush3.msra.mxu0 %v12321_v20  ;;  %7657 = vmatprep.subr.mxu1 %v5968_v45  ;;  %v5863_v45 = vand.u32 4294901760, %v5862_v36  ;;  %v12389_v36 = vand.u32 4294901760, %v5709_v37  ;;  %v5995_v53 = vsub.f32 %v12373_v62, %v13423_v27  ;;  %v12407_v16 = vsub.f32 %v5693_v40, %v12391_v48  ;;  %v5690_v27 = vld [vmem:[#allocation4 + $0x20] sm:$0xff] }
 0x53e   :  { %7628 = vmatprep.subr.mxu0 %v12332_v1  ;;  %7658 = vmatpush3.msra.mxu1 %v5856_v60  ;;  %v5692_v60 = vld [vmem:[#allocation4 + $0x30] sm:$0xff]  ;;  %v5877_v52 = vand.u32 4294901760, %v5876_v17  ;;  %v12412_v17 = vand.u32 4294901760, %v5707_v28 }
 0x53f   :  { %7629 = vmatpush3.msra.mxu0 %v12338_v39  ;;  %7659 = vmatprep.subr.mxu1 %v5975_v44  ;;  %v12401_v42 = vand.u32 4294901760, %v5692_v60  ;;  %v12404_v44 = vsub.f32 %v5709_v37, %v12389_v36  ;;  %13984 = vst [vmem:[#allocation35_spill] sm:$0xff] %v12407_v16  ;;  %v5996_v13 = vand.u32 4294901760, %v5995_v53  ;;  %v12418_v37 = vand.u32 4294901760, %v5691_v47 }
 0x540   :  { %7630 = vmatprep.subr.mxu0 %v12352_v5  ;;  %7660 = vmatpush3.msra.mxu1 %v5863_v45  ;;  %v12410_v45 = vsub.f32 %v5708_v4, %v12393_v30  ;;  %v13430_v4 = vand.u32 4294901760, %v12407_v16  ;;  %v12425_v54 = vsub.f32 %v5707_v28, %v12412_v17 }
 0x541   :  { %7631 = vmatpush3.msra.mxu0 %v12354_v18  ;;  %7661 = vmatprep.subr.mxu1 %v5982_v10  ;;  %13983 = vst [vmem:[#allocation33_spill] sm:$0xff] %v12404_v44  ;;  %v12416_v10 = vsub.f32 %v5692_v60, %v12401_v42  ;;  %v13429_v40 = vand.u32 4294901760, %v12404_v44  ;;  %v12430_v53 = vsub.f32 %v5691_v47, %v12418_v37  ;;  %v12432_v60 = vand.u32 4294901760, %v5706_v22 }
 0x542   :  { %13985 = vst [vmem:[#allocation25_spill] sm:$0xff] %v12410_v45  ;;  %7632 = vmatprep.subr.mxu0 %v12389_v36  ;;  %7662 = vmatpush3.msra.mxu1 %v5870_v51  ;;  %v13433_v14 = vand.u32 4294901760, %v12410_v45  ;;  %13987 = vst [vmem:[#allocation31_spill] sm:$0xff] %v12425_v54  ;;  %v12434_v51 = vand.u32 4294901760, %v5690_v27  ;;  %v13993_v33 = vand.u32 4294901760, %v12425_v54 }
 0x543   :  { %13986 = vst [vmem:[#allocation37_spill] sm:$0xff] %v12416_v10  ;;  %7633 = vmatpush3.msra.mxu0 %v12391_v48  ;;  %7663 = vmatprep.subr.mxu1 %v5989_v0  ;;  %v13437_v32 = vand.u32 4294901760, %v12416_v10  ;;  %13988 = vst [vmem:[#allocation32_spill] sm:$0xff] %v12430_v53  ;;  %v6002_v28 = vsub.f32 %v12404_v44, %v13429_v40  ;;  %v13448_v55 = vand.u32 4294901760, %v12430_v53  ;;  %v5703_v44 = vld [vmem:[#allocation4 + $0x88] sm:$0xff] }
 0x544   :  { %7634 = vmatprep.subr.mxu0 %v12393_v30  ;;  %7664 = vmatpush3.msra.mxu1 %v5877_v52  ;;  %13989 = vst [vmem:[#allocation39_spill] sm:$0xff] %v12432_v60  ;;  %13990 = vst [vmem:[#allocation36_spill] sm:$0xff] %v12434_v51  ;;  %v5890_v52 = vsub.f32 %v12407_v16, %v13430_v4  ;;  %v6009_v0 = vsub.f32 %v12410_v45, %v13433_v14  ;;  %v5704_v14 = vld [vmem:[#allocation4 + $0x90] sm:$0xff] }
 0x545   :  { %7635 = vmatpush3.msra.mxu0 %v12401_v42  ;;  %7665 = vmatprep.subr.mxu1 %v5996_v13  ;;  %v5897_v13 = vsub.f32 %v12416_v10, %v13437_v32  ;;  %v12453_v40 = vsub.f32 %v5706_v22, %v12432_v60  ;;  %v12456_v4 = vsub.f32 %v5690_v27, %v12434_v51  ;;  %v6003_v47 = vand.u32 4294901760, %v6002_v28  ;;  %v5688_v10 = vld [vmem:[#allocation4 + $0x10] sm:$0xff] }
 0x546   :  { %7636 = vmatprep.subr.mxu0 %v12412_v17  ;;  %7666 = vmatpush3.msra.mxu1 %v5884_v43  ;;  %v5891_v46 = vand.u32 4294901760, %v5890_v52  ;;  %v6010_v43 = vand.u32 4294901760, %v6009_v0  ;;  %v6016_v32 = vsub.f32 %v12425_v54, %v13993_v33  ;;  %v5904_v27 = vsub.f32 %v12430_v53, %v13448_v55 }
 0x547   :  { %13991 = vst [vmem:[#allocation38_spill] sm:$0xff] %v12453_v40  ;;  %13992 = vst [vmem:[#allocation40_spill] sm:$0xff] %v12456_v4  ;;  %7637 = vmatpush3.msra.mxu0 %v12418_v37  ;;  %v5898_v22 = vand.u32 4294901760, %v5897_v13  ;;  %v13455_v45 = vand.u32 4294901760, %v12453_v40  ;;  %v13456_v16 = vand.u32 4294901760, %v12456_v4  ;;  %7667 = vmatprep.subr.mxu1 %v6003_v47  ;;  %v12469_v52 = vand.u32 4294901760, %v5705_v61 }
 0x548   :  { %7638 = vmatprep.subr.mxu0 %v12432_v60  ;;  %v6017_v28 = vand.u32 4294901760, %v6016_v32  ;;  %v12471_v33 = vand.u32 4294901760, %v5689_v34  ;;  %v12473_v0 = vand.u32 4294901760, %v5704_v14  ;;  %v5687_v13 = vld [vmem:[#allocation4 + $0x8] sm:$0xff]  ;;  %7668 = vmatpush3.msra.mxu1 %v5891_v46  ;;  %v5905_v54 = vand.u32 4294901760, %v5904_v27 }
 0x549   :  { %7639 = vmatpush3.msra.mxu0 %v12434_v51  ;;  %v6023_v55 = vsub.f32 %v12453_v40, %v13455_v45  ;;  %v5911_v53 = vsub.f32 %v12456_v4, %v13456_v16  ;;  %v12481_v51 = vand.u32 4294901760, %v5688_v10  ;;  %7669 = vmatprep.subr.mxu1 %v6010_v43  ;;  %v12484_v32 = vsub.f32 %v5705_v61, %v12469_v52  ;;  %v5686_v45 = vld [vmem:[#allocation4] sm:$0xff] }
 0x54a   :  { %v12487_v47 = vsub.f32 %v5689_v34, %v12471_v33  ;;  %v12490_v46 = vsub.f32 %v5704_v14, %v12473_v0  ;;  %v12492_v27 = vand.u32 4294901760, %v5703_v44  ;;  %7640 = vmatprep.subr.mxu0 %v12469_v52  ;;  %7670 = vmatpush3.msra.mxu1 %v5898_v22  ;;  %v12498_v61 = vand.u32 4294901760, %v5687_v13 }
 0x54b   :  { %13994 = vst [vmem:[#allocation41_spill] sm:$0xff] %v12481_v51  ;;  %13995 = vst [vmem:[#allocation9_spill] sm:$0xff] %v12484_v32  ;;  %v6024_v16 = vand.u32 4294901760, %v6023_v55  ;;  %v5912_v4 = vand.u32 4294901760, %v5911_v53  ;;  %v12496_v43 = vsub.f32 %v5688_v10, %v12481_v51  ;;  %7641 = vmatpush3.msra.mxu0 %v12471_v33  ;;  %7671 = vmatprep.subr.mxu1 %v6017_v28  ;;  %v13465_v34 = vand.u32 4294901760, %v12484_v32 }
 0x54c   :  { %13996 = vst [vmem:[#allocation26_spill] sm:$0xff] %v12487_v47  ;;  %13997 = vst [vmem:[#allocation10_spill] sm:$0xff] %v12490_v46  ;;  %v13466_v14 = vand.u32 4294901760, %v12487_v47  ;;  %v13467_v40 = vand.u32 4294901760, %v12490_v46  ;;  %v12505_v60 = vsub.f32 %v5703_v44, %v12492_v27  ;;  %7642 = vmatprep.subr.mxu0 %v12473_v0  ;;  %7672 = vmatpush3.msra.mxu1 %v5905_v54  ;;  %v12512_v53 = vand.u32 4294901760, %v5702_v11 }
 0x54d   :  { %13998 = vst [vmem:[#allocation11_spill] sm:$0xff] %v12496_v43  ;;  %v13472_v55 = vand.u32 4294901760, %v12496_v43  ;;  %v12510_v10 = vsub.f32 %v5687_v13, %v12498_v61  ;;  %v12514_v22 = vand.u32 4294901760, %v5686_v45  ;;  %7643 = vmatpush3.msra.mxu0 %v12481_v51  ;;  %7673 = vmatprep.subr.mxu1 %v6024_v16  ;;  %v6030_v44 = vsub.f32 %v12484_v32, %v13465_v34 }
 0x54e   :  { %13999 = vst [vmem:[#allocation22_spill] sm:$0xff] %v12505_v60  ;;  %v5918_v54 = vsub.f32 %v12487_v47, %v13466_v14  ;;  %v6037_v28 = vsub.f32 %v12490_v46, %v13467_v40  ;;  %7644 = vmatprep.subr.mxu0 %v12492_v27  ;;  %7674 = vmatpush3.msra.mxu1 %v5912_v4  ;;  %v14003_v47 = vand.u32 4294901760, %v12505_v60 }
 0x54f   :  { %14000 = vst [vmem:[#allocation12_spill] sm:$0xff] %v12510_v10  ;;  %v5925_v16 = vsub.f32 %v12496_v43, %v13472_v55  ;;  %v13475_v51 = vand.u32 4294901760, %v12510_v10  ;;  %v12533_v34 = vsub.f32 %v5702_v11, %v12512_v53  ;;  %v12536_v14 = vsub.f32 %v5686_v45, %v12514_v22  ;;  %7645 = vmatpush3.msra.mxu0 %v12498_v61 }
 0x550   :  { %v6031_v40 = vand.u32 4294901760, %v6030_v44  ;;  %v5919_v46 = vand.u32 4294901760, %v5918_v54  ;;  %v6038_v13 = vand.u32 4294901760, %v6037_v28  ;;  %v6044_v4 = vsub.f32 %v12505_v60, %v14003_v47  ;;  %7646 = vmatprep.subr.mxu0 %v12512_v53 }
 0x551   :  { %14001 = vst [vmem:[#allocation14_spill] sm:$0xff] %v12533_v34  ;;  %14002 = vst [vmem:[#allocation15_spill] sm:$0xff] %v12536_v14  ;;  %v5926_v55 = vand.u32 4294901760, %v5925_v16  ;;  %v5932_v11 = vsub.f32 %v12510_v10, %v13475_v51  ;;  %v13477_v43 = vand.u32 4294901760, %v12533_v34  ;;  %v13484_v45 = vand.u32 4294901760, %v12536_v14  ;;  %7647 = vmatpush3.msra.mxu0 %v12514_v22 }
 0x552   :  { %7675 = vmatprep.subr.mxu1 %v6031_v40  ;;  %v6045_v44 = vand.u32 4294901760, %v6044_v4  ;;  %7686 = vmatprep.subr.mxu0 %v12248_v38 }
 0x553   :  { %7676 = vmatpush3.msra.mxu1 %v5919_v46  ;;  %v5933_v54 = vand.u32 4294901760, %v5932_v11  ;;  %v6051_v47 = vsub.f32 %v12533_v34, %v13477_v43  ;;  %v5939_v28 = vsub.f32 %v12536_v14, %v13484_v45 }
 0x554   :  { %7677 = vmatprep.subr.mxu1 %v6038_v13 }
 0x555   :  { %7678 = vmatpush3.msra.mxu1 %v5926_v55  ;;  %v6052_v16 = vand.u32 4294901760, %v6051_v47  ;;  %v5940_v51 = vand.u32 4294901760, %v5939_v28 }
 0x556   :  { %7679 = vmatprep.subr.mxu1 %v6045_v44 }
 0x557   :  { %7680 = vmatpush3.msra.mxu1 %v5933_v54 }
 0x558   :  { %7681 = vmatprep.subr.mxu1 %v6052_v16 }
 0x559   :  { %7682 = vmatpush3.msra.mxu1 %v5940_v51  ;;  %v14004_v51 = vld [vmem:[#allocation13_spill] sm:$0xff] }
 0x55a   :  { %7721 = vmatprep.subr.mxu1 %v12235_v41 }
 0x5a8   :  { %v5280_v40 = vpop.f32.mrf.mxu1 }
 0x5aa   :  { %v8423_v46 = vpop.f32.mrf.mxu1 }
 0x5b0   :  { %v5129_v4 = vpop.f32.mrf.mxu0 }
 0x5b1   :  { %v5281_v45 = vadd.f32 %v5280_v40, %v5129_v4  ;;  %v14011_v40 = vld [vmem:[#allocation25_spill] sm:$0xff] }
 0x5b2   :  { %v8388_v11 = vpop.f32.mrf.mxu0  ;;  %v14012_v4 = vld [vmem:[#allocation37_spill] sm:$0xff] }
 0x5b3   :  { %v14013_v11 = vld [vmem:[#allocation41_spill] sm:$0xff] }
 0x5c8   :  { %v5473_v38 = vpop.f32.mrf.mxu1 }
 0x5ca   :  { %v8493_v43 = vpop.f32.mrf.mxu1 }
 0x5d1   :  { %v5384_v34 = vpop.f32.mrf.mxu0 }
 0x5d2   :  { %v5385_v55 = vadd.f32 %v5384_v34, %v5281_v45  ;;  %v14005_v34 = vand.u32 4294901760, %v12199_v31  ;;  %v14010_v45 = vld [vmem:[#allocation35_spill] sm:$0xff] }
 0x5d3   :  { %v8458_v10 = vpop.f32.mrf.mxu0 }
 0x5d4   :  { %v5474_v47 = vadd.f32 %v5473_v38, %v5385_v55  ;;  %v14009_v10 = vld [vmem:[#allocation33_spill] sm:$0xff]  ;;  %v14015_v55 = vld [vmem:[#allocation32_spill] sm:$0xff] }
 0x5ea   :  { %v5679_v60 = vpop.f32.mrf.mxu1 }
 0x5ec   :  { %v8563_v13 = vpop.f32.mrf.mxu1 }
 0x5ed   :  { %v14014_v13 = vld [vmem:[#allocation31_spill] sm:$0xff] }
 0x5f2   :  { %v5592_v28 = vpop.f32.mrf.mxu0 }
 0x5f3   :  { %v5593_v44 = vadd.f32 %v5592_v28, %v5474_v47  ;;  %v14016_v47 = vld [vmem:[#allocation38_spill] sm:$0xff]  ;;  %v14017_v28 = vld [vmem:[#allocation40_spill] sm:$0xff] }
 0x5f4   :  { %v8528_v54 = vpop.f32.mrf.mxu0 }
 0x5f5   :  { %v5680_v16 = vadd.f32 %v5679_v60, %v5593_v44  ;;  %v14018_v44 = vld [vmem:[#allocation9_spill] sm:$0xff] }
 0x5f6   :  { %v14019_v54 = vld [vmem:[#allocation29_spill] sm:$0xff] }
 0x5f7   :  { %v5683_v14 = vadd.f32 %v5680_v16, %v14004_v51  ;;  %v14020_v16 = vld [vmem:[#allocation26_spill] sm:$0xff] }
 0x5f8   :  { %v14021_v51 = vld [vmem:[#allocation34_spill] sm:$0xff] }
 0x5f9   :  { %v5684_v41 = vmul.f32 0.01, %v5683_v14 }
 0x5fb   :  { %v5685_v32 = vmax.f32 %v5683_v14, %v5684_v41  ;;  %v14008_v14 = vld [vmem:[#allocation36_spill] sm:$0xff] }
 0x5fd   :  { %v12558_v46 = vand.u32 4294901760, %v5685_v32 }
 0x5ff   :  { %6057 = vmatmul.mubr.f32.vlgmr.msra.gmra.mxu1 %v12558_v46  ;;  %v12562_v43 = vsub.f32 %v5685_v32, %v12558_v46  ;;  %v14007_v32 = vld [vmem:[#allocation30_spill] sm:$0xff] }
 0x600   :  { %7722 = vmatpush3.msra.mxu1 %v12237_v29  ;;  %6299 = vmatprep.mubr.f32.mxu1 %v14005_v34  ;;  %v14022_v34 = vld [vmem:[#allocation10_spill] sm:$0xff] }
 0x601   :  { %7723 = vmatprep.subr.mxu1 %v12239_v15  ;;  %v5822_v38 = vand.u32 4294901760, %v12562_v43 }
 0x602   :  { %7724 = vmatpush3.msra.mxu1 %v12241_v2 }
 0x603   :  { %7725 = vmatprep.subr.mxu1 %v12243_v49  ;;  %v5823_v41 = vsub.f32 %v12562_v43, %v5822_v38 }
 0x604   :  { %7726 = vmatpush3.msra.mxu1 %v12245_v24 }
 0x605   :  { %7727 = vmatprep.subr.mxu1 %v12256_v56  ;;  %v5824_v60 = vand.u32 4294901760, %v5823_v41  ;;  %v14023_v41 = vld [vmem:[#allocation11_spill] sm:$0xff] }
 0x606   :  { %7728 = vmatpush3.msra.mxu1 %v12268_v58 }
 0x607   :  { %7729 = vmatprep.subr.mxu1 %v12315_v59  ;;  %5825 = vmatmul.mubr.f32.vlgmr.msra.gmra.mxu0 %v5824_v60  ;;  %v14024_v60 = vld [vmem:[#allocation22_spill] sm:$0xff] }
 0x608   :  { %7687 = vmatpush3.msra.mxu0 %v12251_v50  ;;  %7730 = vmatpush3.msra.mxu1 %v12317_v57 }
 0x609   :  { %7688 = vmatprep.subr.mxu0 %v12254_v35  ;;  %6192 = vmatprep.mubr.f32.mxu0 %v12199_v31  ;;  %v14006_v31 = vld [vmem:[#allocation39_spill] sm:$0xff] }
 0x60a   :  { %7731 = vmatprep.subr.mxu1 %v12319_v19  ;;  %7689 = vmatpush3.msra.mxu0 %v12260_v3 }
 0x60b   :  { %7732 = vmatpush3.msra.mxu1 %v12321_v20  ;;  %7690 = vmatprep.subr.mxu0 %v12263_v26 }
 0x60c   :  { %7733 = vmatprep.subr.mxu1 %v12332_v1  ;;  %7691 = vmatpush3.msra.mxu0 %v12266_v9 }
 0x60d   :  { %7734 = vmatpush3.msra.mxu1 %v12338_v39  ;;  %7692 = vmatprep.subr.mxu0 %v12275_v7 }
 0x60e   :  { %7735 = vmatprep.subr.mxu1 %v12352_v5  ;;  %7693 = vmatpush3.msra.mxu0 %v12282_v25 }
 0x60f   :  { %7736 = vmatpush3.msra.mxu1 %v12354_v18  ;;  %7694 = vmatprep.subr.mxu0 %v12324_v6 }
 0x610   :  { %7737 = vmatprep.subr.mxu1 %v12389_v36  ;;  %7695 = vmatpush3.msra.mxu0 %v12327_v63 }
 0x611   :  { %7738 = vmatpush3.msra.mxu1 %v12391_v48  ;;  %7696 = vmatprep.subr.mxu0 %v12330_v23 }
 0x612   :  { %7739 = vmatprep.subr.mxu1 %v12393_v30  ;;  %7697 = vmatpush3.msra.mxu0 %v12336_v8 }
 0x613   :  { %7740 = vmatpush3.msra.mxu1 %v12401_v42  ;;  %7698 = vmatprep.subr.mxu0 %v12345_v21 }
 0x614   :  { %7741 = vmatprep.subr.mxu1 %v12412_v17  ;;  %7699 = vmatpush3.msra.mxu0 %v12350_v12 }
 0x615   :  { %7742 = vmatpush3.msra.mxu1 %v12418_v37  ;;  %7700 = vmatprep.subr.mxu0 %v12373_v62 }
 0x616   :  { %7743 = vmatprep.subr.mxu1 %v14006_v31  ;;  %7701 = vmatpush3.msra.mxu0 %v14007_v32 }
 0x617   :  { %7744 = vmatpush3.msra.mxu1 %v14008_v14  ;;  %7702 = vmatprep.subr.mxu0 %v14009_v10 }
 0x618   :  { %7745 = vmatprep.subr.mxu1 %v12469_v52  ;;  %7703 = vmatpush3.msra.mxu0 %v14010_v45 }
 0x619   :  { %7746 = vmatpush3.msra.mxu1 %v12471_v33  ;;  %7704 = vmatprep.subr.mxu0 %v14011_v40 }
 0x61a   :  { %7747 = vmatprep.subr.mxu1 %v12473_v0  ;;  %7705 = vmatpush3.msra.mxu0 %v14012_v4 }
 0x61b   :  { %7748 = vmatpush3.msra.mxu1 %v14013_v11  ;;  %7706 = vmatprep.subr.mxu0 %v14014_v13 }
 0x61c   :  { %7749 = vmatprep.subr.mxu1 %v12492_v27  ;;  %7707 = vmatpush3.msra.mxu0 %v14015_v55 }
 0x61d   :  { %7750 = vmatpush3.msra.mxu1 %v12498_v61  ;;  %7708 = vmatprep.subr.mxu0 %v14016_v47 }
 0x61e   :  { %7751 = vmatprep.subr.mxu1 %v12512_v53  ;;  %7709 = vmatpush3.msra.mxu0 %v14017_v28 }
 0x61f   :  { %7752 = vmatpush3.msra.mxu1 %v12514_v22  ;;  %7710 = vmatprep.subr.mxu0 %v14018_v44 }
 0x620   :  { %6303 = vmatmul.mubr.f32.vlgmr.msra.gmra.mxu1 %v5822_v38  ;;  %7791 = vmatprep.subr.mxu1 %v14019_v54  ;;  %v14025_v38 = vld [vmem:[#allocation12_spill] sm:$0xff]  ;;  %v14026_v54 = vld [vmem:[#allocation14_spill] sm:$0xff] }
 0x621   :  { %7711 = vmatpush3.msra.mxu0 %v14020_v16  ;;  %7792 = vmatpush3.msra.mxu1 %v12237_v29  ;;  %v14027_v29 = vld [vmem:[#allocation15_spill] sm:$0xff] }
 0x622   :  { %6573 = vmatprep.mubr.f32.mxu1 %v14021_v51  ;;  %7712 = vmatprep.subr.mxu0 %v14022_v34 }
 0x623   :  { %7793 = vmatprep.subr.mxu1 %v12239_v15  ;;  %7713 = vmatpush3.msra.mxu0 %v14023_v41  ;;  %v14028_v15 = vld [vmem:[#allocation19_spill] sm:$0xff] }
 0x624   :  { %7794 = vmatpush3.msra.mxu1 %v12241_v2  ;;  %7714 = vmatprep.subr.mxu0 %v14024_v60  ;;  %v14029_v2 = vand.u32 4294901760, %v14028_v15 }
 0x625   :  { %7795 = vmatprep.subr.mxu1 %v12243_v49  ;;  %7715 = vmatpush3.msra.mxu0 %v14025_v38  ;;  %v14030_v49 = vand.u32 4294901760, %v12251_v50  ;;  %v14034_v50 = vand.u32 4294901760, %v12266_v9  ;;  %v14038_v9 = vand.u32 4294901760, %v12327_v63  ;;  %v14047_v63 = vand.u32 4294901760, %v14011_v40 }
 0x626   :  { %7796 = vmatpush3.msra.mxu1 %v12245_v24  ;;  %7716 = vmatprep.subr.mxu0 %v14026_v54  ;;  %v14031_v24 = vand.u32 4294901760, %v12254_v35  ;;  %v14035_v35 = vand.u32 4294901760, %v12275_v7  ;;  %v14039_v7 = vand.u32 4294901760, %v12330_v23  ;;  %v14048_v23 = vand.u32 4294901760, %v14012_v4 }
 0x627   :  { %7797 = vmatprep.subr.mxu1 %v12256_v56  ;;  %7717 = vmatpush3.msra.mxu0 %v14027_v29  ;;  %v14032_v56 = vand.u32 4294901760, %v12260_v3  ;;  %v14036_v3 = vand.u32 4294901760, %v12282_v25  ;;  %v14040_v25 = vand.u32 4294901760, %v12336_v8  ;;  %v14050_v8 = vand.u32 4294901760, %v14015_v55 }
 0x628   :  { %7798 = vmatpush3.msra.mxu1 %v12268_v58  ;;  %6195 = vmatmul.mubr.f32.vlgmr.msra.gmra.mxu0 %v12562_v43  ;;  %v14033_v58 = vand.u32 4294901760, %v12263_v26  ;;  %v14037_v26 = vand.u32 4294901760, %v12324_v6  ;;  %v14046_v6 = vand.u32 4294901760, %v14010_v45  ;;  %v6601_v43 = vld [vmem:[#allocation2 + $0x478] sm:$0xff] }
 0x629   :  { %7756 = vmatprep.subr.mxu0 %v14029_v2  ;;  %7799 = vmatprep.subr.mxu1 %v12315_v59  ;;  %v14041_v59 = vand.u32 4294901760, %v12345_v21  ;;  %v14052_v21 = vand.u32 4294901760, %v14017_v28  ;;  %v6599_v2 = vld [vmem:[#allocation2 + $0x3b8] sm:$0xff] }
 0x62a   :  { %7757 = vmatpush3.msra.mxu0 %v14030_v49  ;;  %6469 = vmatprep.mubr.f32.mxu0 %v14021_v51 }
 0x62b   :  { %7800 = vmatpush3.msra.mxu1 %v12317_v57  ;;  %7758 = vmatprep.subr.mxu0 %v14031_v24  ;;  %v14042_v57 = vand.u32 4294901760, %v12350_v12  ;;  %v14053_v12 = vand.u32 4294901760, %v14018_v44 }
 0x62c   :  { %7801 = vmatprep.subr.mxu1 %v12319_v19  ;;  %7759 = vmatpush3.msra.mxu0 %v14032_v56  ;;  %v14043_v19 = vand.u32 4294901760, %v12373_v62  ;;  %v14057_v62 = vand.u32 4294901760, %v14024_v60  ;;  %v12802_v56 = vand.u32 4294901760, %v6599_v2 }
 0x62d   :  { %7802 = vmatpush3.msra.mxu1 %v12321_v20  ;;  %7760 = vmatprep.subr.mxu0 %v14033_v58  ;;  %v14044_v20 = vand.u32 4294901760, %v14007_v32  ;;  %v6598_v58 = vld [vmem:[#allocation2 + $0x358] sm:$0xff] }
 0x62e   :  { %7803 = vmatprep.subr.mxu1 %v12332_v1  ;;  %7761 = vmatpush3.msra.mxu0 %v14034_v50  ;;  %v14049_v1 = vand.u32 4294901760, %v14014_v13 }
 0x62f   :  { %7804 = vmatpush3.msra.mxu1 %v12338_v39  ;;  %7762 = vmatprep.subr.mxu0 %v14035_v35  ;;  %v14051_v39 = vand.u32 4294901760, %v14016_v47  ;;  %v12807_v35 = vsub.f32 %v6599_v2, %v12802_v56 }
 0x630   :  { %7805 = vmatprep.subr.mxu1 %v12352_v5  ;;  %7763 = vmatpush3.msra.mxu0 %v14036_v3  ;;  %v14054_v5 = vand.u32 4294901760, %v14020_v16  ;;  %v12809_v3 = vand.u32 4294901760, %v6598_v58 }
 0x631   :  { %7806 = vmatpush3.msra.mxu1 %v12354_v18  ;;  %7764 = vmatprep.subr.mxu0 %v14037_v26  ;;  %v14055_v18 = vand.u32 4294901760, %v14022_v34  ;;  %v6597_v26 = vld [vmem:[#allocation2 + $0x2f8] sm:$0xff] }
 0x632   :  { %7807 = vmatprep.subr.mxu1 %v12389_v36  ;;  %7765 = vmatpush3.msra.mxu0 %v14038_v9  ;;  %v14058_v36 = vand.u32 4294901760, %v14025_v38 }
 0x633   :  { %7808 = vmatpush3.msra.mxu1 %v12391_v48  ;;  %7766 = vmatprep.subr.mxu0 %v14039_v7  ;;  %v14059_v48 = vand.u32 4294901760, %v14026_v54  ;;  %v12814_v7 = vand.u32 4294901760, %v12807_v35 }
 0x634   :  { %7809 = vmatprep.subr.mxu1 %v12393_v30  ;;  %7767 = vmatpush3.msra.mxu0 %v14040_v25  ;;  %v14056_v30 = vand.u32 4294901760, %v14023_v41  ;;  %v12817_v25 = vsub.f32 %v6598_v58, %v12809_v3 }
 0x635   :  { %7810 = vmatpush3.msra.mxu1 %v12401_v42  ;;  %7768 = vmatprep.subr.mxu0 %v14041_v59  ;;  %v14045_v42 = vand.u32 4294901760, %v14009_v10  ;;  %14062 = vst [vmem:[#allocation20_spill] sm:$0xff] %v12814_v7  ;;  %v12819_v59 = vand.u32 4294901760, %v6597_v26 }
 0x636   :  { %7811 = vmatprep.subr.mxu1 %v12412_v17  ;;  %7769 = vmatpush3.msra.mxu0 %v14042_v57  ;;  %v14060_v17 = vand.u32 4294901760, %v14027_v29  ;;  %v6596_v57 = vld [vmem:[#allocation2 + $0x298] sm:$0xff] }
 0x637   :  { %7812 = vmatpush3.msra.mxu1 %v12418_v37  ;;  %7770 = vmatprep.subr.mxu0 %v14043_v19  ;;  %v6605_v37 = vld [vmem:[#allocation2 + $0x5f8] sm:$0xff]  ;;  %v6753_v19 = vsub.f32 %v12807_v35, %v12814_v7 }
 0x638   :  { %7813 = vmatprep.subr.mxu1 %v14006_v31  ;;  %7771 = vmatpush3.msra.mxu0 %v14044_v20  ;;  %v6600_v31 = vld [vmem:[#allocation2 + $0x418] sm:$0xff]  ;;  %v12826_v20 = vand.u32 4294901760, %v12817_v25 }
 0x639   :  { %7814 = vmatpush3.msra.mxu1 %v14008_v14  ;;  %7772 = vmatprep.subr.mxu0 %v14045_v42  ;;  %v12746_v14 = vand.u32 4294901760, %v6600_v31  ;;  %v12829_v42 = vsub.f32 %v6597_v26, %v12819_v59 }
 0x63a   :  { %7815 = vmatprep.subr.mxu1 %v12469_v52  ;;  %7773 = vmatpush3.msra.mxu0 %v14046_v6  ;;  %v12732_v52 = vand.u32 4294901760, %v6605_v37  ;;  %14063 = vst [vmem:[#allocation27_spill] sm:$0xff] %v12826_v20  ;;  %v12831_v6 = vand.u32 4294901760, %v6596_v57 }
 0x63b   :  { %7816 = vmatpush3.msra.mxu1 %v12471_v33  ;;  %7774 = vmatprep.subr.mxu0 %v14047_v63  ;;  %v6604_v33 = vld [vmem:[#allocation2 + $0x598] sm:$0xff]  ;;  %v12766_v13 = vsub.f32 %v6600_v31, %v12746_v14 }
 0x63c   :  { %7817 = vmatprep.subr.mxu1 %v12473_v0  ;;  %7775 = vmatpush3.msra.mxu0 %v14048_v23  ;;  %v6603_v0 = vld [vmem:[#allocation2 + $0x538] sm:$0xff]  ;;  %v12741_v32 = vsub.f32 %v6605_v37, %v12732_v52  ;;  %v6754_v23 = vand.u32 4294901760, %v6753_v19 }
 0x63d   :  { %7818 = vmatpush3.msra.mxu1 %v14013_v11  ;;  %7776 = vmatprep.subr.mxu0 %v14049_v1  ;;  %v12792_v38 = vand.u32 4294901760, %v12766_v13  ;;  %v6595_v63 = vld [vmem:[#allocation2 + $0x238] sm:$0xff]  ;;  %v6760_v1 = vsub.f32 %v12817_v25, %v12826_v20 }
 0x63e   :  { %7819 = vmatprep.subr.mxu1 %v12492_v27  ;;  %7777 = vmatpush3.msra.mxu0 %v14050_v8  ;;  %v6602_v27 = vld [vmem:[#allocation2 + $0x4d8] sm:$0xff]  ;;  %v12759_v4 = vand.u32 4294901760, %v12741_v32  ;;  %v12838_v8 = vand.u32 4294901760, %v12829_v42 }
 0x63f   :  { %7820 = vmatpush3.msra.mxu1 %v12498_v61  ;;  %7778 = vmatprep.subr.mxu0 %v14051_v39  ;;  %v12734_v61 = vand.u32 4294901760, %v6604_v33  ;;  %14061 = vst [vmem:[#allocation16_spill] sm:$0xff] %v12792_v38  ;;  %v6746_v24 = vsub.f32 %v12766_v13, %v12792_v38  ;;  %v12841_v39 = vsub.f32 %v6596_v57, %v12831_v6 }
 0x640   :  { %7821 = vmatprep.subr.mxu1 %v12512_v53  ;;  %7779 = vmatpush3.msra.mxu0 %v14052_v21  ;;  %v12736_v53 = vand.u32 4294901760, %v6603_v0  ;;  %v6711_v44 = vsub.f32 %v12741_v32, %v12759_v4  ;;  %14064 = vst [vmem:[#allocation21_spill] sm:$0xff] %v12838_v8  ;;  %v12844_v21 = vand.u32 4294901760, %v6595_v63 }
 0x641   :  { %7822 = vmatpush3.msra.mxu1 %v12514_v22  ;;  %7780 = vmatprep.subr.mxu0 %v14053_v12  ;;  %v12738_v22 = vand.u32 4294901760, %v6602_v27  ;;  %v12749_v10 = vsub.f32 %v6604_v33, %v12734_v61  ;;  %v6747_v9 = vand.u32 4294901760, %v6746_v24  ;;  %v6594_v12 = vld [vmem:[#allocation2 + $0x1d8] sm:$0xff] }
 0x642   :  { %6575 = vmatmul.mubr.f32.vlgmr.msra.gmra.mxu1 %v12558_v46  ;;  %7781 = vmatpush3.msra.mxu0 %v14054_v5  ;;  %v12752_v45 = vsub.f32 %v6603_v0, %v12736_v53  ;;  %v6712_v41 = vand.u32 4294901760, %v6711_v44  ;;  %v6761_v5 = vand.u32 4294901760, %v6760_v1  ;;  %v6590_v24 = vld [vmem:[#allocation2 + $0x58] sm:$0xff] }
 0x643   :  { %7782 = vmatprep.subr.mxu0 %v14055_v18  ;;  %v12755_v40 = vsub.f32 %v6602_v27, %v12738_v22  ;;  %v12769_v55 = vand.u32 4294901760, %v12749_v10  ;;  %v6767_v18 = vsub.f32 %v12829_v42, %v12838_v8  ;;  %v12903_v57 = vand.u32 4294901760, %v6590_v24 }
 0x644   :  { %7783 = vmatpush3.msra.mxu0 %v14056_v30  ;;  %v12772_v47 = vand.u32 4294901760, %v12752_v45  ;;  %8599 = vmatprep.subr.mxu1 %v6712_v41  ;;  %v12850_v30 = vand.u32 4294901760, %v12841_v39 }
 0x645   :  { %7784 = vmatprep.subr.mxu0 %v14057_v62  ;;  %v12775_v28 = vand.u32 4294901760, %v12755_v40  ;;  %v6718_v51 = vsub.f32 %v12749_v10, %v12769_v55  ;;  %8600 = vmatpush3.msra.mxu1 %v6712_v41  ;;  %v12852_v62 = vand.u32 4294901760, %v6594_v12  ;;  %v12913_v1 = vsub.f32 %v6590_v24, %v12903_v57 }
 0x646   :  { %7785 = vmatpush3.msra.mxu0 %v14058_v36  ;;  %v6725_v34 = vsub.f32 %v12752_v45, %v12772_v47  ;;  %14065 = vst [vmem:[#allocation8_spill] sm:$0xff] %v12850_v30  ;;  %v12855_v36 = vsub.f32 %v6595_v63, %v12844_v21  ;;  %v6774_v37 = vsub.f32 %v12841_v39, %v12850_v30 }
 0x647   :  { %7786 = vmatprep.subr.mxu0 %v14059_v48  ;;  %v6732_v60 = vsub.f32 %v12755_v40, %v12775_v28  ;;  %v6719_v54 = vand.u32 4294901760, %v6718_v51  ;;  %v6593_v48 = vld [vmem:[#allocation2 + $0x178] sm:$0xff]  ;;  %v12861_v33 = vsub.f32 %v6594_v12, %v12852_v62 }
 0x648   :  { %7787 = vmatpush3.msra.mxu0 %v14060_v17  ;;  %v6726_v29 = vand.u32 4294901760, %v6725_v34  ;;  %v6768_v17 = vand.u32 4294901760, %v6767_v18  ;;  %v12863_v0 = vand.u32 4294901760, %v6593_v48  ;;  %v12867_v27 = vand.u32 4294901760, %v12855_v36 }
 0x649   :  { %6471 = vmatmul.mubr.f32.vlgmr.msra.gmra.mxu0 %v12558_v46  ;;  %8564 = vmatprep.subr.mxu0 %v12732_v52  ;;  %v12744_v46 = vand.u32 4294901760, %v6601_v43  ;;  %v6733_v49 = vand.u32 4294901760, %v6732_v60  ;;  %v6775_v31 = vand.u32 4294901760, %v6774_v37  ;;  %v12871_v44 = vand.u32 4294901760, %v12861_v33  ;;  %v6591_v60 = vld [vmem:[#allocation2 + $0xb8] sm:$0xff] }
 0x64a   :  { %8565 = vmatpush3.msra.mxu0 %v12732_v52  ;;  %8601 = vmatprep.subr.mxu1 %v6719_v54  ;;  %14066 = vst [vmem:[#allocation24_spill] sm:$0xff] %v12867_v27  ;;  %v12874_v51 = vsub.f32 %v6593_v48, %v12863_v0  ;;  %v6781_v41 = vsub.f32 %v12855_v36, %v12867_v27  ;;  %v12890_v2 = vand.u32 4294901760, %v6591_v60  ;;  %v12920_v18 = vand.u32 4294901760, %v12913_v1 }
 0x64b   :  { %v12762_v11 = vsub.f32 %v6601_v43, %v12744_v46  ;;  %8566 = vmatprep.subr.mxu0 %v12734_v61  ;;  %8602 = vmatpush3.msra.mxu1 %v6719_v54  ;;  %v6592_v43 = vld [vmem:[#allocation2 + $0x118] sm:$0xff]  ;;  %14067 = vst [vmem:[#allocation17_spill] sm:$0xff] %v12871_v44  ;;  %v6788_v54 = vsub.f32 %v12861_v33, %v12871_v44 }
 0x64c   :  { %8567 = vmatpush3.msra.mxu0 %v12734_v61  ;;  %8603 = vmatprep.subr.mxu1 %v6726_v29  ;;  %v12876_v34 = vand.u32 4294901760, %v6592_v43  ;;  %14071 = vst [vmem:[#allocation39_spill] sm:$0xff] %v12920_v18 }
 0x64d   :  { %v12781_v16 = vand.u32 4294901760, %v12762_v11  ;;  %8568 = vmatprep.subr.mxu0 %v12736_v53  ;;  %8604 = vmatpush3.msra.mxu1 %v6726_v29  ;;  %v12885_v29 = vand.u32 4294901760, %v12874_v51  ;;  %v6789_v58 = vand.u32 4294901760, %v6788_v54 }
 0x64e   :  { %8569 = vmatpush3.msra.mxu0 %v12736_v53  ;;  %8605 = vmatprep.subr.mxu1 %v6733_v49 }
 0x64f   :  { %8570 = vmatprep.subr.mxu0 %v12738_v22  ;;  %v6739_v15 = vsub.f32 %v12762_v11, %v12781_v16  ;;  %8606 = vmatpush3.msra.mxu1 %v6733_v49  ;;  %14068 = vst [vmem:[#allocation23_spill] sm:$0xff] %v12885_v29  ;;  %v6782_v49 = vand.u32 4294901760, %v6781_v41 }
 0x650   :  { %8571 = vmatpush3.msra.mxu0 %v12738_v22 }
 0x651   :  { %8572 = vmatprep.subr.mxu0 %v12744_v46  ;;  %v6740_v50 = vand.u32 4294901760, %v6739_v15  ;;  %v12888_v15 = vsub.f32 %v6592_v43, %v12876_v34  ;;  %v14072_v43 = vld [vmem:[#allocation28_spill] sm:$0xff] }
 0x652   :  { %8573 = vmatpush3.msra.mxu0 %v12744_v46 }
 0x653   :  { %8574 = vmatprep.subr.mxu0 %v12746_v14  ;;  %8607 = vmatprep.subr.mxu1 %v6740_v50  ;;  %v12897_v26 = vand.u32 4294901760, %v12888_v15 }
 0x654   :  { %8575 = vmatpush3.msra.mxu0 %v12746_v14  ;;  %8608 = vmatpush3.msra.mxu1 %v6740_v50  ;;  %v6795_v50 = vsub.f32 %v12874_v51, %v12885_v29 }
 0x655   :  { %8576 = vmatprep.subr.mxu0 %v12802_v56  ;;  %8609 = vmatprep.subr.mxu1 %v6747_v9  ;;  %14069 = vst [vmem:[#allocation18_spill] sm:$0xff] %v12897_v26  ;;  %v6802_v63 = vsub.f32 %v12888_v15, %v12897_v26 }
 0x656   :  { %8577 = vmatpush3.msra.mxu0 %v12802_v56  ;;  %8610 = vmatpush3.msra.mxu1 %v6747_v9  ;;  %v12900_v9 = vsub.f32 %v6591_v60, %v12890_v2  ;;  %v6796_v19 = vand.u32 4294901760, %v6795_v50 }
 0x657   :  { %8578 = vmatprep.subr.mxu0 %v12809_v3  ;;  %8611 = vmatprep.subr.mxu1 %v6754_v23  ;;  %v6803_v12 = vand.u32 4294901760, %v6802_v63 }
 0x658   :  { %8579 = vmatpush3.msra.mxu0 %v12809_v3  ;;  %8612 = vmatpush3.msra.mxu1 %v6754_v23  ;;  %v12909_v23 = vand.u32 4294901760, %v12900_v9 }
 0x659   :  { %8580 = vmatprep.subr.mxu0 %v12819_v59  ;;  %8613 = vmatprep.subr.mxu1 %v6761_v5 }
 0x65a   :  { %8581 = vmatpush3.msra.mxu0 %v12819_v59  ;;  %8614 = vmatpush3.msra.mxu1 %v6761_v5  ;;  %14070 = vst [vmem:[#allocation13_spill] sm:$0xff] %v12909_v23  ;;  %v6809_v5 = vsub.f32 %v12900_v9, %v12909_v23 }
 0x65b   :  { %8582 = vmatprep.subr.mxu0 %v12831_v6  ;;  %8615 = vmatprep.subr.mxu1 %v6768_v17 }
 0x65c   :  { %8583 = vmatpush3.msra.mxu0 %v12831_v6  ;;  %8616 = vmatpush3.msra.mxu1 %v6768_v17  ;;  %v6810_v48 = vand.u32 4294901760, %v6809_v5  ;;  %v6816_v17 = vsub.f32 %v12913_v1, %v12920_v18 }
 0x65d   :  { %8584 = vmatprep.subr.mxu0 %v12844_v21  ;;  %8617 = vmatprep.subr.mxu1 %v6775_v31 }
 0x65e   :  { %8585 = vmatpush3.msra.mxu0 %v12844_v21  ;;  %8618 = vmatpush3.msra.mxu1 %v6775_v31  ;;  %v6817_v37 = vand.u32 4294901760, %v6816_v17  ;;  %v6584_v31 = vrot.slane %v14072_v43, 4 }
 0x65f   :  { %8586 = vmatprep.subr.mxu0 %v12852_v62  ;;  %8619 = vmatprep.subr.mxu1 %v6782_v49 }
 0x660   :  { %8587 = vmatpush3.msra.mxu0 %v12852_v62  ;;  %8620 = vmatpush3.msra.mxu1 %v6782_v49  ;;  %v6585_v60 = vadd.f32 %v6584_v31, %v14072_v43 }
 0x661   :  { %8588 = vmatprep.subr.mxu0 %v12863_v0  ;;  %8621 = vmatprep.subr.mxu1 %v6789_v58 }
 0x662   :  { %8589 = vmatpush3.msra.mxu0 %v12863_v0  ;;  %8622 = vmatpush3.msra.mxu1 %v6789_v58  ;;  %v6586_v24 = vrot.slane %v6585_v60, 2 }
 0x663   :  { %8590 = vmatprep.subr.mxu0 %v12876_v34  ;;  %8623 = vmatprep.subr.mxu1 %v6796_v19 }
 0x664   :  { %8591 = vmatpush3.msra.mxu0 %v12876_v34  ;;  %8624 = vmatpush3.msra.mxu1 %v6796_v19  ;;  %v6587_v19 = vadd.f32 %v6586_v24, %v6585_v60 }
 0x665   :  { %8592 = vmatprep.subr.mxu0 %v12890_v2  ;;  %8625 = vmatprep.subr.mxu1 %v6803_v12 }
 0x666   :  { %8593 = vmatpush3.msra.mxu0 %v12890_v2  ;;  %8626 = vmatpush3.msra.mxu1 %v6803_v12 }
 0x667   :  { %8594 = vmatprep.subr.mxu0 %v12903_v57  ;;  %8627 = vmatprep.subr.mxu1 %v6810_v48 }
 0x668   :  { %8595 = vmatpush3.msra.mxu0 %v12903_v57  ;;  %8628 = vmatpush3.msra.mxu1 %v6810_v48 }
 0x669   :  { %8634 = vmatprep.subr.mxu0 %v12741_v32  ;;  %8629 = vmatprep.subr.mxu1 %v6817_v37 }
 0x66a   :  { %8630 = vmatpush3.msra.mxu1 %v6817_v37  ;;  %v6588_v37 = vrot.slane %v6587_v19, 1 }
 0x66b   :  { %8669 = vmatprep.subr.mxu1 %v12732_v52 }
 0x66c   :  { %v6589_v27 = vadd.f32 %v6588_v37, %v6587_v19 }
 0x66e   :  { %v12928_v7 = vand.u32 4294901760, %v6589_v27 }
 0x6bf   :  { %v7683_v54 = vpop.f32.mrf.mxu1 }
 0x6c1   :  { %v7684_v50 = vpop.f32.mrf.mxu1 }
 0x6c2   :  { %v7685_v17 = vadd.f32 %v7684_v50, %v7683_v54  ;;  %v8788_v54 = vld [vmem:[%s13084_s0] sm:$0xff] }
 0x6c7   :  { %v7648_v41 = vpop.f32.mrf.mxu0 }
 0x6c9   :  { %v7649_v49 = vpop.f32.mrf.mxu0 }
 0x6ca   :  { %v7650_v5 = vadd.f32 %v7649_v49, %v7648_v41  ;;  %v12931_v41 = vsub.f32 %v6589_v27, %v12928_v7 }
 0x6cc   :  { %v6059_v23 = vadd.f32 %v7685_v17, %v7650_v5 }
 0x6e0   :  { %v7753_v63 = vpop.f32.mrf.mxu1 }
 0x6e2   :  { %v7754_v18 = vpop.f32.mrf.mxu1 }
 0x6e3   :  { %v7755_v30 = vadd.f32 %v7754_v18, %v7753_v63  ;;  %v6699_v18 = vand.u32 4294901760, %v12931_v41 }
 0x6e8   :  { %v7718_v58 = vpop.f32.mrf.mxu0 }
 0x6ea   :  { %v7719_v12 = vpop.f32.mrf.mxu0 }
 0x6eb   :  { %v7720_v48 = vadd.f32 %v7719_v12, %v7718_v58 }
 0x6ed   :  { %v6197_v29 = vadd.f32 %v7720_v48, %v6059_v23 }
 0x6ef   :  { %v6305_v8 = vadd.f32 %v7755_v30, %v6197_v29 }
 0x702   :  { %v7823_v26 = vpop.f32.mrf.mxu1 }
 0x704   :  { %v7824_v43 = vpop.f32.mrf.mxu1 }
 0x705   :  { %v7825_v60 = vadd.f32 %v7824_v43, %v7823_v26 }
 0x709   :  { %v7788_v44 = vpop.f32.mrf.mxu0 }
 0x70b   :  { %v7789_v31 = vpop.f32.mrf.mxu0 }
 0x70c   :  { %v7790_v20 = vadd.f32 %v7789_v31, %v7788_v44 }
 0x70e   :  { %v6473_v24 = vadd.f32 %v7790_v20, %v6305_v8  ;;  %v6700_v8 = vsub.f32 %v12931_v41, %v6699_v18 }
 0x710   :  { %v6577_v38 = vadd.f32 %v7825_v60, %v6473_v24  ;;  %v6701_v44 = vand.u32 4294901760, %v6700_v8 }
 0x712   :  { %v6580_v23 = vmul.f32 %v8788_v54, %v6577_v38 }
 0x714   :  { %v12936_v49 = vand.u32 4294901760, %v6580_v23 }
 0x716   :  { %8631 = vmatprep.mubr.f32.mxu1 %v12936_v49  ;;  %v6688_v30 = vsub.f32 %v6580_v23, %v12936_v49 }
 0x717   :  { %8632 = vmatmul.mubr.f32.vlgmr.msra.gmra.mxu1 %v12928_v7 }
 0x718   :  { %8670 = vmatpush3.msra.mxu1 %v12732_v52  ;;  %v6689_v20 = vand.u32 4294901760, %v6688_v30 }
 0x719   :  { %8671 = vmatprep.subr.mxu1 %v12734_v61 }
 0x71a   :  { %8672 = vmatpush3.msra.mxu1 %v12734_v61  ;;  %8701 = vmatprep.mubr.f32.mxu1 %v6689_v20  ;;  %v6690_v38 = vsub.f32 %v6688_v30, %v6689_v20 }
 0x71b   :  { %8673 = vmatprep.subr.mxu1 %v12736_v53 }
 0x71c   :  { %8674 = vmatpush3.msra.mxu1 %v12736_v53  ;;  %v6691_v27 = vand.u32 4294901760, %v6690_v38 }
 0x71d   :  { %8675 = vmatprep.subr.mxu1 %v12738_v22 }
 0x71e   :  { %8676 = vmatpush3.msra.mxu1 %v12738_v22  ;;  %8596 = vmatprep.mubr.f32.mxu0 %v6691_v27 }
 0x71f   :  { %8677 = vmatprep.subr.mxu1 %v12744_v46  ;;  %8597 = vmatmul.mubr.f32.vlgmr.msra.gmra.mxu0 %v6701_v44 }
 0x720   :  { %8635 = vmatpush3.msra.mxu0 %v12741_v32  ;;  %8678 = vmatpush3.msra.mxu1 %v12744_v46  ;;  %v14077_v32 = vld [vmem:[#allocation8_spill] sm:$0xff] }
 0x721   :  { %8636 = vmatprep.subr.mxu0 %v12749_v10  ;;  %8666 = vmatprep.mubr.f32.mxu0 %v6688_v30 }
 0x722   :  { %8679 = vmatprep.subr.mxu1 %v12746_v14  ;;  %8637 = vmatpush3.msra.mxu0 %v12749_v10  ;;  %v14080_v10 = vld [vmem:[#allocation23_spill] sm:$0xff] }
 0x723   :  { %8680 = vmatpush3.msra.mxu1 %v12746_v14  ;;  %8638 = vmatprep.subr.mxu0 %v12752_v45 }
 0x724   :  { %8681 = vmatprep.subr.mxu1 %v12802_v56  ;;  %8639 = vmatpush3.msra.mxu0 %v12752_v45  ;;  %v14081_v45 = vld [vmem:[#allocation18_spill] sm:$0xff] }
 0x725   :  { %8682 = vmatpush3.msra.mxu1 %v12802_v56  ;;  %8640 = vmatprep.subr.mxu0 %v12755_v40 }
 0x726   :  { %8683 = vmatprep.subr.mxu1 %v12809_v3  ;;  %8641 = vmatpush3.msra.mxu0 %v12755_v40  ;;  %v14082_v40 = vld [vmem:[#allocation13_spill] sm:$0xff] }
 0x727   :  { %8684 = vmatpush3.msra.mxu1 %v12809_v3  ;;  %8642 = vmatprep.subr.mxu0 %v12762_v11 }
 0x728   :  { %8685 = vmatprep.subr.mxu1 %v12819_v59  ;;  %8643 = vmatpush3.msra.mxu0 %v12762_v11 }
 0x729   :  { %8686 = vmatpush3.msra.mxu1 %v12819_v59  ;;  %8644 = vmatprep.subr.mxu0 %v12766_v13 }
 0x72a   :  { %8687 = vmatprep.subr.mxu1 %v12831_v6  ;;  %8645 = vmatpush3.msra.mxu0 %v12766_v13 }
 0x72b   :  { %8688 = vmatpush3.msra.mxu1 %v12831_v6  ;;  %8646 = vmatprep.subr.mxu0 %v12807_v35 }
 0x72c   :  { %8689 = vmatprep.subr.mxu1 %v12844_v21  ;;  %8647 = vmatpush3.msra.mxu0 %v12807_v35 }
 0x72d   :  { %8690 = vmatpush3.msra.mxu1 %v12844_v21  ;;  %8648 = vmatprep.subr.mxu0 %v12817_v25 }
 0x72e   :  { %8691 = vmatprep.subr.mxu1 %v12852_v62  ;;  %8649 = vmatpush3.msra.mxu0 %v12817_v25 }
 0x72f   :  { %8692 = vmatpush3.msra.mxu1 %v12852_v62  ;;  %8650 = vmatprep.subr.mxu0 %v12829_v42 }
 0x730   :  { %8693 = vmatprep.subr.mxu1 %v12863_v0  ;;  %8651 = vmatpush3.msra.mxu0 %v12829_v42 }
 0x731   :  { %8694 = vmatpush3.msra.mxu1 %v12863_v0  ;;  %8652 = vmatprep.subr.mxu0 %v12841_v39 }
 0x732   :  { %8695 = vmatprep.subr.mxu1 %v12876_v34  ;;  %8653 = vmatpush3.msra.mxu0 %v12841_v39 }
 0x733   :  { %8696 = vmatpush3.msra.mxu1 %v12876_v34  ;;  %8654 = vmatprep.subr.mxu0 %v12855_v36 }
 0x734   :  { %8697 = vmatprep.subr.mxu1 %v12890_v2  ;;  %8655 = vmatpush3.msra.mxu0 %v12855_v36 }
 0x735   :  { %8698 = vmatpush3.msra.mxu1 %v12890_v2  ;;  %8656 = vmatprep.subr.mxu0 %v12861_v33 }
 0x736   :  { %8699 = vmatprep.subr.mxu1 %v12903_v57  ;;  %8657 = vmatpush3.msra.mxu0 %v12861_v33 }
 0x737   :  { %8700 = vmatpush3.msra.mxu1 %v12903_v57  ;;  %8658 = vmatprep.subr.mxu0 %v12874_v51 }
 0x738   :  { %8702 = vmatmul.mubr.f32.vlgmr.msra.gmra.mxu1 %v6699_v18  ;;  %8739 = vmatprep.subr.mxu1 %v12732_v52 }
 0x739   :  { %8659 = vmatpush3.msra.mxu0 %v12874_v51  ;;  %8740 = vmatpush3.msra.mxu1 %v12732_v52  ;;  %v14073_v52 = vld [vmem:[#allocation16_spill] sm:$0xff] }
 0x73a   :  { %8771 = vmatprep.mubr.f32.mxu1 %v12936_v49  ;;  %8660 = vmatprep.subr.mxu0 %v12888_v15 }
 0x73b   :  { %8741 = vmatprep.subr.mxu1 %v12734_v61  ;;  %8661 = vmatpush3.msra.mxu0 %v12888_v15 }
 0x73c   :  { %8742 = vmatpush3.msra.mxu1 %v12734_v61  ;;  %8662 = vmatprep.subr.mxu0 %v12900_v9  ;;  %v14074_v61 = vld [vmem:[#allocation20_spill] sm:$0xff] }
 0x73d   :  { %8743 = vmatprep.subr.mxu1 %v12736_v53  ;;  %8663 = vmatpush3.msra.mxu0 %v12900_v9 }
 0x73e   :  { %8744 = vmatpush3.msra.mxu1 %v12736_v53  ;;  %8664 = vmatprep.subr.mxu0 %v12913_v1  ;;  %v14075_v53 = vld [vmem:[#allocation27_spill] sm:$0xff] }
 0x73f   :  { %8745 = vmatprep.subr.mxu1 %v12738_v22  ;;  %8665 = vmatpush3.msra.mxu0 %v12913_v1 }
 0x740   :  { %8746 = vmatpush3.msra.mxu1 %v12738_v22  ;;  %8667 = vmatmul.mubr.f32.vlgmr.msra.gmra.mxu0 %v12931_v41  ;;  %v14076_v22 = vld [vmem:[#allocation21_spill] sm:$0xff] }
 0x741   :  { %8704 = vmatprep.subr.mxu0 %v12759_v4  ;;  %8747 = vmatprep.subr.mxu1 %v12744_v46 }
 0x742   :  { %8705 = vmatpush3.msra.mxu0 %v12759_v4  ;;  %8736 = vmatprep.mubr.f32.mxu0 %v12936_v49  ;;  %v14083_v4 = vld [vmem:[#allocation39_spill] sm:$0xff] }
 0x743   :  { %8748 = vmatpush3.msra.mxu1 %v12744_v46  ;;  %8706 = vmatprep.subr.mxu0 %v12769_v55  ;;  %v14078_v46 = vld [vmem:[#allocation24_spill] sm:$0xff] }
 0x744   :  { %8749 = vmatprep.subr.mxu1 %v12746_v14  ;;  %8707 = vmatpush3.msra.mxu0 %v12769_v55 }
 0x745   :  { %8750 = vmatpush3.msra.mxu1 %v12746_v14  ;;  %8708 = vmatprep.subr.mxu0 %v12772_v47  ;;  %v14079_v14 = vld [vmem:[#allocation17_spill] sm:$0xff] }
 0x746   :  { %8751 = vmatprep.subr.mxu1 %v12802_v56  ;;  %8709 = vmatpush3.msra.mxu0 %v12772_v47 }
 0x747   :  { %8752 = vmatpush3.msra.mxu1 %v12802_v56  ;;  %8710 = vmatprep.subr.mxu0 %v12775_v28 }
 0x748   :  { %8753 = vmatprep.subr.mxu1 %v12809_v3  ;;  %8711 = vmatpush3.msra.mxu0 %v12775_v28 }
 0x749   :  { %8754 = vmatpush3.msra.mxu1 %v12809_v3  ;;  %8712 = vmatprep.subr.mxu0 %v12781_v16 }
 0x74a   :  { %8755 = vmatprep.subr.mxu1 %v12819_v59  ;;  %8713 = vmatpush3.msra.mxu0 %v12781_v16 }
 0x74b   :  { %8756 = vmatpush3.msra.mxu1 %v12819_v59  ;;  %8714 = vmatprep.subr.mxu0 %v14073_v52 }
 0x74c   :  { %8757 = vmatprep.subr.mxu1 %v12831_v6  ;;  %8715 = vmatpush3.msra.mxu0 %v14073_v52 }
 0x74d   :  { %8758 = vmatpush3.msra.mxu1 %v12831_v6  ;;  %8716 = vmatprep.subr.mxu0 %v14074_v61 }
 0x74e   :  { %8759 = vmatprep.subr.mxu1 %v12844_v21  ;;  %8717 = vmatpush3.msra.mxu0 %v14074_v61 }
 0x74f   :  { %8760 = vmatpush3.msra.mxu1 %v12844_v21  ;;  %8718 = vmatprep.subr.mxu0 %v14075_v53 }
 0x750   :  { %8761 = vmatprep.subr.mxu1 %v12852_v62  ;;  %8719 = vmatpush3.msra.mxu0 %v14075_v53 }
 0x751   :  { %8762 = vmatpush3.msra.mxu1 %v12852_v62  ;;  %8720 = vmatprep.subr.mxu0 %v14076_v22 }
 0x752   :  { %8763 = vmatprep.subr.mxu1 %v12863_v0  ;;  %8721 = vmatpush3.msra.mxu0 %v14076_v22 }
 0x753   :  { %8764 = vmatpush3.msra.mxu1 %v12863_v0  ;;  %8722 = vmatprep.subr.mxu0 %v14077_v32 }
 0x754   :  { %8765 = vmatprep.subr.mxu1 %v12876_v34  ;;  %8723 = vmatpush3.msra.mxu0 %v14077_v32 }
 0x755   :  { %8766 = vmatpush3.msra.mxu1 %v12876_v34  ;;  %8724 = vmatprep.subr.mxu0 %v14078_v46 }
 0x756   :  { %8767 = vmatprep.subr.mxu1 %v12890_v2  ;;  %8725 = vmatpush3.msra.mxu0 %v14078_v46 }
 0x757   :  { %8768 = vmatpush3.msra.mxu1 %v12890_v2  ;;  %8726 = vmatprep.subr.mxu0 %v14079_v14 }
 0x758   :  { %8769 = vmatprep.subr.mxu1 %v12903_v57  ;;  %8727 = vmatpush3.msra.mxu0 %v14079_v14 }
 0x759   :  { %8770 = vmatpush3.msra.mxu1 %v12903_v57  ;;  %8728 = vmatprep.subr.mxu0 %v14080_v10 }
 0x75a   :  { %8772 = vmatmul.mubr.f32.vlgmr.msra.gmra.mxu1 %v12928_v7  ;;  %8729 = vmatpush3.msra.mxu0 %v14080_v10 }
 0x75b   :  { %8730 = vmatprep.subr.mxu0 %v14081_v45 }
 0x75c   :  { %8731 = vmatpush3.msra.mxu0 %v14081_v45 }
 0x75d   :  { %8732 = vmatprep.subr.mxu0 %v14082_v40 }
 0x75e   :  { %8733 = vmatpush3.msra.mxu0 %v14082_v40 }
 0x75f   :  { %8734 = vmatprep.subr.mxu0 %v14083_v4 }
 0x760   :  { %8735 = vmatpush3.msra.mxu0 %v14083_v4 }
 0x761   :  { %8737 = vmatmul.mubr.f32.vlgmr.msra.gmra.mxu0 %v12928_v7 }
 0x7d7   :  { %v8633_v13 = vpop.f32.mrf.mxu1 }
 0x7d9   :  { %v6854_v28 = vpop.f32.mrf.mxu1 }
 0x7df   :  { %v8598_v11 = vpop.f32.mrf.mxu0 }
 0x7e0   :  { %v6861_v16 = vadd.f32 %v8633_v13, %v8598_v11 }
 0x7e1   :  { %v6693_v55 = vpop.f32.mrf.mxu0 }
 0x7e2   :  { %v6855_v3 = vadd.f32 %v6854_v28, %v6693_v55 }
 0x7f8   :  { %v8703_v56 = vpop.f32.mrf.mxu1 }
 0x7fa   :  { %v7060_v42 = vpop.f32.mrf.mxu1 }
 0x800   :  { %v8668_v47 = vpop.f32.mrf.mxu0 }
 0x801   :  { %v6972_v25 = vadd.f32 %v8668_v47, %v6861_v16 }
 0x802   :  { %v6964_v35 = vpop.f32.mrf.mxu0 }
 0x803   :  { %v6965_v59 = vadd.f32 %v6964_v35, %v6855_v3  ;;  %v7069_v6 = vadd.f32 %v8703_v56, %v6972_v25 }
 0x805   :  { %v7061_v36 = vadd.f32 %v7060_v42, %v6965_v59 }
 0x81a   :  { %v8773_v39 = vpop.f32.mrf.mxu1 }
 0x81c   :  { %v7280_v51 = vpop.f32.mrf.mxu1 }
 0x821   :  { %v8738_v21 = vpop.f32.mrf.mxu0 }
 0x822   :  { %v7194_v62 = vadd.f32 %v8738_v21, %v7069_v6 }
 0x823   :  { %v7187_v33 = vpop.f32.mrf.mxu0 }
 0x824   :  { %v7287_v0 = vadd.f32 %v8773_v39, %v7194_v62  ;;  %v7188_v7 = vadd.f32 %v7187_v33, %v7061_v36 }
 0x826   :  { %7293 = vst [vmem:[%s13088_s4 + $0x8] sm:$0xff] %v7287_v0  ;;  %v7281_v34 = vadd.f32 %v7280_v51, %v7188_v7 }
 0x828   :  { %7292 = vst [vmem:[%s13088_s4] sm:$0xff] %v7281_v34 }
 0x829   :  { %7302 = vsyncpa [#allocation3], 1 }
 0x82a   :  { %7303 = vsyncpa [#allocation5], 1 }

</bundles_post_ra>
